<compile_context>
chip_gen: v7x
topology: tpu7x:2x2x1
jax: 0.10.0
libtpu: 0.0.40
codegen_flags: <defaults>
</compile_context>

<pallas_src>
import functools
import math

import jax
import jax.numpy as jnp
from jax import lax
from jax.experimental import pallas as pl
from jax.experimental.pallas import tpu as pltpu


_LN_EPS = 1e-10  # matches the reference LayerNorm

_CP = pltpu.CompilerParams(
    dimension_semantics=("parallel",),          # grid=(B,): v7x gets both TCs busy
    vmem_limit_bytes=32 * 1024 * 1024,
)


# ----------------------------------------------------------------------------
# In-kernel helpers
# ----------------------------------------------------------------------------

def _layer_norm_res(y, res, gamma, beta, eps):
    # (y + res) then LayerNorm with clamped biased variance and eps under the
    # sqrt -- exactly the reference LayerNorm (clamp + eps).
    z = y + res
    mean = jnp.mean(z, axis=-1, keepdims=True)
    var = jnp.mean((z - mean) ** 2, axis=-1, keepdims=True)
    var = jnp.maximum(var, eps)                 # torch.clamp(var, min=eps)
    norm = (z - mean) * lax.rsqrt(var + eps)
    return gamma * norm + beta


def _mha_fused(xq_bf, xkv_bf, mask, wq, bq, wk, bk, wv, bv, wo, *, n_head, scale):
    """Multi-head attention with the output projection folded into the head
    loop.  Weight stacks are head-major refs:
        wq/wk/wv: (n_head, D, dh) bf16, bq/bk/bv: (n_head, 1, dh) f32,
        wo: (n_head, dh, D) bf16.
    No lane slicing of activations, no concat: acc += (p_h @ v_h) @ wo[h].
    Returns (Sq, D) f32 context (out-proj bias NOT added here).
    """
    sq = xq_bf.shape[0]
    d_model = wo.shape[-1]
    acc = jnp.zeros((sq, d_model), jnp.float32)
    for h in range(n_head):                     # static unroll (tiny n_head)
        q = jnp.dot(xq_bf, wq[h], preferred_element_type=jnp.float32) + bq[h]
        k = jnp.dot(xkv_bf, wk[h], preferred_element_type=jnp.float32) + bk[h]
        v = jnp.dot(xkv_bf, wv[h], preferred_element_type=jnp.float32) + bv[h]
        # q @ k^T without an explicit transpose (contract last dims).
        s = lax.dot_general(q.astype(jnp.bfloat16), k.astype(jnp.bfloat16),
                            (((1,), (1,)), ((), ())),
                            preferred_element_type=jnp.float32) * scale
        # masked_fill(mask == 0, -10000); mask entries are exactly 0/1.
        s = jnp.where(mask > 0, s, jnp.float32(-10000.0))
        s = s - jnp.max(s, axis=-1, keepdims=True)
        p = jnp.exp(s)
        p = p * pl.reciprocal(jnp.sum(p, axis=-1, keepdims=True), approx=True)
        ctx = jnp.dot(p.astype(jnp.bfloat16), v.astype(jnp.bfloat16),
                      preferred_element_type=jnp.float32)          # (Sq, dh)
        acc = acc + jnp.dot(ctx.astype(jnp.bfloat16), wo[h],
                            preferred_element_type=jnp.float32)    # (Sq, D)
    return acc


# ----------------------------------------------------------------------------
# Fully-fused decoder-layer kernel (one grid step == one batch element)
# ----------------------------------------------------------------------------

def _decoder_layer_kernel(*args, n_head, scale, eps, has_enc):
    if has_enc:
        (dec_ref, enc_ref, mask_ref, pmask_ref,
         a1_wq, a1_bq, a1_wk, a1_bk, a1_wv, a1_bv, a1_wo, a1_bo, g1, be1,
         a2_wq, a2_bq, a2_wk, a2_bk, a2_wv, a2_bv, a2_wo, a2_bo, g2, be2,
         w1, b1, w2, b2, g3, be3, o_ref) = args
    else:
        (dec_ref, mask_ref,
         a1_wq, a1_bq, a1_wk, a1_bk, a1_wv, a1_bv, a1_wo, a1_bo, g1, be1,
         w1, b1, w2, b2, g3, be3, o_ref) = args

    x = dec_ref[0]                                   # (Sq, D) f32
    mask = mask_ref[0]                               # (Sq, Sq) f32

    # ---- self attention (+ fused out-proj) + residual + norm1 -------------
    x_bf = x.astype(jnp.bfloat16)                    # cast once
    ctx = _mha_fused(x_bf, x_bf, mask,
                     a1_wq, a1_bq, a1_wk, a1_bk, a1_wv, a1_bv, a1_wo,
                     n_head=n_head, scale=scale)
    x = _layer_norm_res(ctx + a1_bo[...], x, g1[...], be1[...], eps)

    # ---- cross attention (+ fused out-proj) + residual + norm2 ------------
    if has_enc:
        enc = enc_ref[0]                             # (Sk, D) f32
        pmask = pmask_ref[0]                         # (Sq, Sk) f32
        x_bf = x.astype(jnp.bfloat16)
        e_bf = enc.astype(jnp.bfloat16)
        ctx = _mha_fused(x_bf, e_bf, pmask,
                         a2_wq, a2_bq, a2_wk, a2_bk, a2_wv, a2_bv, a2_wo,
                         n_head=n_head, scale=scale)
        x = _layer_norm_res(ctx + a2_bo[...], x, g2[...], be2[...], eps)

    # ---- FFN (fc1 + ReLU + fc2) + residual + norm3 -------------------------
    hdn = jnp.dot(x.astype(jnp.bfloat16), w1[...],
                  preferred_element_type=jnp.float32) + b1[...]
    hdn = jnp.maximum(hdn, 0.0)                      # ReLU in f32
    y = jnp.dot(hdn.astype(jnp.bfloat16), w2[...],
                preferred_element_type=jnp.float32) + b2[...]
    x = _layer_norm_res(y, x, g3[...], be3[...], eps)

    o_ref[0] = x.astype(o_ref.dtype)


# ----------------------------------------------------------------------------
# Wrapper
# ----------------------------------------------------------------------------

def _const_spec(shape):
    nd = len(shape)
    return pl.BlockSpec(shape, lambda b, _nd=nd: (0,) * _nd)


def _flatten_mha(a):
    return [a["wq"], a["bq"], a["wk"], a["bk"], a["wv"], a["bv"], a["wo"], a["bo"]]


def decoder_layer(p, dec, enc, pad_mask, mask, n_head):
    """dec: (B, Sq, D), enc: (B, Sk, D) or None,
    pad_mask: (B, 1, Sq, Sk) or None, mask: (B, 1, Sq, Sq). 0/1 masks."""
    B, Sq, D = dec.shape
    dh = D // n_head
    scale = 1.0 / math.sqrt(dh)
    has_enc = enc is not None

    mask3 = mask.reshape(B, Sq, Sq).astype(jnp.float32)

    inputs = [dec.astype(jnp.float32)]
    in_specs = [pl.BlockSpec((1, Sq, D), lambda b: (b, 0, 0))]
    if has_enc:
        Sk = enc.shape[1]
        pmask3 = pad_mask.reshape(B, Sq, Sk).astype(jnp.float32)
        inputs += [enc.astype(jnp.float32), mask3, pmask3]
        in_specs += [
            pl.BlockSpec((1, Sk, D), lambda b: (b, 0, 0)),
            pl.BlockSpec((1, Sq, Sq), lambda b: (b, 0, 0)),
            pl.BlockSpec((1, Sq, Sk), lambda b: (b, 0, 0)),
        ]
    else:
        inputs += [mask3]
        in_specs += [pl.BlockSpec((1, Sq, Sq), lambda b: (b, 0, 0))]

    weights = _flatten_mha(p["attn1"]) + [p["norm1_g"], p["norm1_b"]]
    if has_enc:
        weights += _flatten_mha(p["attn2"]) + [p["norm2_g"], p["norm2_b"]]
    weights += [p["ffn"]["w1"], p["ffn"]["b1"], p["ffn"]["w2"], p["ffn"]["b2"],
                p["norm3_g"], p["norm3_b"]]
    inputs += weights
    in_specs += [_const_spec(w.shape) for w in weights]

    kernel = functools.partial(_decoder_layer_kernel, n_head=n_head,
                               scale=scale, eps=_LN_EPS, has_enc=has_enc)
    return pl.pallas_call(
        kernel,
        out_shape=jax.ShapeDtypeStruct((B, Sq, D), jnp.float32),
        grid=(B,),
        in_specs=in_specs,
        out_specs=pl.BlockSpec((1, Sq, D), lambda b: (b, 0, 0)),
        compiler_params=_CP,
    )(*inputs)


# ----------------------------------------------------------------------------
# Deterministic parameter init (shapes follow the PyTorch module; q/k/v/out
# projection weights stored head-major for the fused kernel)
# ----------------------------------------------------------------------------

def _uniform(key, shape, bound, dtype=jnp.float32):
    return jax.random.uniform(key, shape, jnp.float32, -bound, bound).astype(dtype)


def _init_mha(key, d_model, n_head):
    dh = d_model // n_head
    bound = 1.0 / math.sqrt(d_model)
    ks = jax.random.split(key, 8)
    return dict(
        wq=_uniform(ks[0], (n_head, d_model, dh), bound, jnp.bfloat16),
        bq=_uniform(ks[1], (n_head, 1, dh), bound),
        wk=_uniform(ks[2], (n_head, d_model, dh), bound, jnp.bfloat16),
        bk=_uniform(ks[3], (n_head, 1, dh), bound),
        wv=_uniform(ks[4], (n_head, d_model, dh), bound, jnp.bfloat16),
        bv=_uniform(ks[5], (n_head, 1, dh), bound),
        wo=_uniform(ks[6], (n_head, dh, d_model), bound, jnp.bfloat16),
        bo=_uniform(ks[7], (1, d_model), bound),
    )


def init_decoder_layer(key, d_model, ffn_hidden, n_head):
    k1, k2, k3 = jax.random.split(key, 3)
    kf = jax.random.split(k3, 4)
    b1b = 1.0 / math.sqrt(d_model)
    b2b = 1.0 / math.sqrt(ffn_hidden)
    ones = jnp.ones((1, d_model), jnp.float32)
    zeros = jnp.zeros((1, d_model), jnp.float32)
    return dict(
        attn1=_init_mha(k1, d_model, n_head),
        attn2=_init_mha(k2, d_model, n_head),
        ffn=dict(
            w1=_uniform(kf[0], (d_model, ffn_hidden), b1b, jnp.bfloat16),
            b1=_uniform(kf[1], (1, ffn_hidden), b1b),
            w2=_uniform(kf[2], (ffn_hidden, d_model), b2b, jnp.bfloat16),
            b2=_uniform(kf[3], (1, d_model), b2b),
        ),
        norm1_g=ones, norm1_b=zeros,
        norm2_g=ones, norm2_b=zeros,
        norm3_g=ones, norm3_b=zeros,
    )


# ----------------------------------------------------------------------------
# Main
# ----------------------------------------------------------------------------

if __name__ == "__main__":
    B, Sq, Sk = 2, 8, 8
    d_model, n_head, ffn_hidden = 32, 4, 64

    key = jax.random.PRNGKey(0)
    kp, kd, ke = jax.random.split(key, 3)

    params = init_decoder_layer(kp, d_model, ffn_hidden, n_head)

    dec = jax.random.normal(kd, (B, Sq, d_model), jnp.float32)
    enc = jax.random.normal(ke, (B, Sk, d_model), jnp.float32)

    # Masks (1.0 = keep, 0.0 = masked); same semantics as masked_fill(mask==0,-1e4).
    trg_pad = jnp.ones((B, Sq), jnp.float32).at[1, -1].set(0.0)
    src_pad = jnp.ones((B, Sk), jnp.float32).at[0, -1].set(0.0)
    causal = jnp.tril(jnp.ones((Sq, Sq), jnp.float32))
    mask = (causal[None, None, :, :]
            * trg_pad[:, None, :, None] * trg_pad[:, None, None, :])   # (B,1,Sq,Sq)
    pad_mask = trg_pad[:, None, :, None] * src_pad[:, None, None, :]   # (B,1,Sq,Sk)

    out = decoder_layer(params, dec, enc, pad_mask, mask, n_head)
    out = jax.block_until_ready(out)

    assert out.shape == (B, Sq, d_model)
    assert bool(jnp.all(jnp.isfinite(out)))
    print("KERNEL_OK")
</pallas_src>

<mosaic_0001>
module attributes {stable_mosaic.version = 11 : i64} {
  func.func @_decoder_layer_kernel(%arg0: i32, %arg1: memref<1x8x32xf32, #tpu.memory_space<vmem>>, %arg2: memref<1x8x32xf32, #tpu.memory_space<vmem>>, %arg3: memref<1x8x8xf32, #tpu.memory_space<vmem>>, %arg4: memref<1x8x8xf32, #tpu.memory_space<vmem>>, %arg5: memref<4x32x8xbf16, #tpu.memory_space<vmem>>, %arg6: memref<4x1x8xf32, #tpu.memory_space<vmem>>, %arg7: memref<4x32x8xbf16, #tpu.memory_space<vmem>>, %arg8: memref<4x1x8xf32, #tpu.memory_space<vmem>>, %arg9: memref<4x32x8xbf16, #tpu.memory_space<vmem>>, %arg10: memref<4x1x8xf32, #tpu.memory_space<vmem>>, %arg11: memref<4x8x32xbf16, #tpu.memory_space<vmem>>, %arg12: memref<1x32xf32, #tpu.memory_space<vmem>>, %arg13: memref<1x32xf32, #tpu.memory_space<vmem>>, %arg14: memref<1x32xf32, #tpu.memory_space<vmem>>, %arg15: memref<4x32x8xbf16, #tpu.memory_space<vmem>>, %arg16: memref<4x1x8xf32, #tpu.memory_space<vmem>>, %arg17: memref<4x32x8xbf16, #tpu.memory_space<vmem>>, %arg18: memref<4x1x8xf32, #tpu.memory_space<vmem>>, %arg19: memref<4x32x8xbf16, #tpu.memory_space<vmem>>, %arg20: memref<4x1x8xf32, #tpu.memory_space<vmem>>, %arg21: memref<4x8x32xbf16, #tpu.memory_space<vmem>>, %arg22: memref<1x32xf32, #tpu.memory_space<vmem>>, %arg23: memref<1x32xf32, #tpu.memory_space<vmem>>, %arg24: memref<1x32xf32, #tpu.memory_space<vmem>>, %arg25: memref<32x64xbf16, #tpu.memory_space<vmem>>, %arg26: memref<1x64xf32, #tpu.memory_space<vmem>>, %arg27: memref<64x32xbf16, #tpu.memory_space<vmem>>, %arg28: memref<1x32xf32, #tpu.memory_space<vmem>>, %arg29: memref<1x32xf32, #tpu.memory_space<vmem>>, %arg30: memref<1x32xf32, #tpu.memory_space<vmem>>, %arg31: memref<1x8x32xf32, #tpu.memory_space<vmem>>) attributes {dimension_semantics = [#tpu.dimension_semantics<parallel>], iteration_bounds = array<i64: 2>, scalar_prefetch = 0 : i64, scratch_operands = 0 : i64, tpu.core_type = #tpu.core_type<tc>, window_params = [{transform_indices = @transform_0, window_bounds = array<i64: 1, 8, 32>}, {transform_indices = @transform_1, window_bounds = array<i64: 1, 8, 32>}, {transform_indices = @transform_2, window_bounds = array<i64: 1, 8, 8>}, {transform_indices = @transform_3, window_bounds = array<i64: 1, 8, 8>}, {pipeline_mode = #tpu.pipeline_mode<synchronous>, transform_indices = @transform_4, window_bounds = array<i64: 4, 32, 8>}, {pipeline_mode = #tpu.pipeline_mode<synchronous>, transform_indices = @transform_5, window_bounds = array<i64: 4, 1, 8>}, {pipeline_mode = #tpu.pipeline_mode<synchronous>, transform_indices = @transform_6, window_bounds = array<i64: 4, 32, 8>}, {pipeline_mode = #tpu.pipeline_mode<synchronous>, transform_indices = @transform_7, window_bounds = array<i64: 4, 1, 8>}, {pipeline_mode = #tpu.pipeline_mode<synchronous>, transform_indices = @transform_8, window_bounds = array<i64: 4, 32, 8>}, {pipeline_mode = #tpu.pipeline_mode<synchronous>, transform_indices = @transform_9, window_bounds = array<i64: 4, 1, 8>}, {pipeline_mode = #tpu.pipeline_mode<synchronous>, transform_indices = @transform_10, window_bounds = array<i64: 4, 8, 32>}, {pipeline_mode = #tpu.pipeline_mode<synchronous>, transform_indices = @transform_11, window_bounds = array<i64: 1, 32>}, {pipeline_mode = #tpu.pipeline_mode<synchronous>, transform_indices = @transform_12, window_bounds = array<i64: 1, 32>}, {pipeline_mode = #tpu.pipeline_mode<synchronous>, transform_indices = @transform_13, window_bounds = array<i64: 1, 32>}, {pipeline_mode = #tpu.pipeline_mode<synchronous>, transform_indices = @transform_14, window_bounds = array<i64: 4, 32, 8>}, {pipeline_mode = #tpu.pipeline_mode<synchronous>, transform_indices = @transform_15, window_bounds = array<i64: 4, 1, 8>}, {pipeline_mode = #tpu.pipeline_mode<synchronous>, transform_indices = @transform_16, window_bounds = array<i64: 4, 32, 8>}, {pipeline_mode = #tpu.pipeline_mode<synchronous>, transform_indices = @transform_17, window_bounds = array<i64: 4, 1, 8>}, {pipeline_mode = #tpu.pipeline_mode<synchronous>, transform_indices = @transform_18, window_bounds = array<i64: 4, 32, 8>}, {pipeline_mode = #tpu.pipeline_mode<synchronous>, transform_indices = @transform_19, window_bounds = array<i64: 4, 1, 8>}, {pipeline_mode = #tpu.pipeline_mode<synchronous>, transform_indices = @transform_20, window_bounds = array<i64: 4, 8, 32>}, {pipeline_mode = #tpu.pipeline_mode<synchronous>, transform_indices = @transform_21, window_bounds = array<i64: 1, 32>}, {pipeline_mode = #tpu.pipeline_mode<synchronous>, transform_indices = @transform_22, window_bounds = array<i64: 1, 32>}, {pipeline_mode = #tpu.pipeline_mode<synchronous>, transform_indices = @transform_23, window_bounds = array<i64: 1, 32>}, {pipeline_mode = #tpu.pipeline_mode<synchronous>, transform_indices = @transform_24, window_bounds = array<i64: 32, 64>}, {pipeline_mode = #tpu.pipeline_mode<synchronous>, transform_indices = @transform_25, window_bounds = array<i64: 1, 64>}, {pipeline_mode = #tpu.pipeline_mode<synchronous>, transform_indices = @transform_26, window_bounds = array<i64: 64, 32>}, {pipeline_mode = #tpu.pipeline_mode<synchronous>, transform_indices = @transform_27, window_bounds = array<i64: 1, 32>}, {pipeline_mode = #tpu.pipeline_mode<synchronous>, transform_indices = @transform_28, window_bounds = array<i64: 1, 32>}, {pipeline_mode = #tpu.pipeline_mode<synchronous>, transform_indices = @transform_29, window_bounds = array<i64: 1, 32>}, {transform_indices = @transform_30, window_bounds = array<i64: 1, 8, 32>}]} {
    %c0 = arith.constant 0 : index
    %c0_0 = arith.constant 0 : index
    %c0_1 = arith.constant 0 : index
    %0 = vector.load %arg1[%c0, %c0_0, %c0_1] : memref<1x8x32xf32, #tpu.memory_space<vmem>>, vector<1x8x32xf32>
    %1 = vector.shape_cast %0 : vector<1x8x32xf32> to vector<8x32xf32>
    %c0_2 = arith.constant 0 : index
    %c0_3 = arith.constant 0 : index
    %c0_4 = arith.constant 0 : index
    %2 = vector.load %arg3[%c0_2, %c0_3, %c0_4] : memref<1x8x8xf32, #tpu.memory_space<vmem>>, vector<1x8x8xf32>
    %3 = vector.shape_cast %2 : vector<1x8x8xf32> to vector<8x8xf32>
    %4 = arith.truncf %1 : vector<8x32xf32> to vector<8x32xbf16>
    %cst = arith.constant 0.000000e+00 : f32
    %5 = vector.broadcast %cst : f32 to vector<8x32xf32>
    %c0_5 = arith.constant 0 : index
    %c0_6 = arith.constant 0 : index
    %c0_7 = arith.constant 0 : index
    %6 = vector.load %arg5[%c0_5, %c0_6, %c0_7] : memref<4x32x8xbf16, #tpu.memory_space<vmem>>, vector<1x32x8xbf16>
    %7 = vector.shape_cast %6 : vector<1x32x8xbf16> to vector<32x8xbf16>
    %cst_8 = arith.constant dense<0.000000e+00> : vector<8x8xf32>
    %8 = tpu.matmul %4, %7, %cst_8 {dimension_numbers = #tpu.dot_dimension_numbers<[1], [0], [0], [1], [0, 0, 1, 1], [], []>} : vector<8x32xbf16>, vector<32x8xbf16>, vector<8x8xf32> -> vector<8x8xf32>
    %c0_9 = arith.constant 0 : index
    %c0_10 = arith.constant 0 : index
    %c0_11 = arith.constant 0 : index
    %9 = vector.load %arg6[%c0_9, %c0_10, %c0_11] : memref<4x1x8xf32, #tpu.memory_space<vmem>>, vector<1x1x8xf32>
    %10 = vector.shape_cast %9 : vector<1x1x8xf32> to vector<1x8xf32>
    %11 = vector.broadcast %10 : vector<1x8xf32> to vector<8x8xf32>
    %12 = arith.addf %8, %11 : vector<8x8xf32>
    %c0_12 = arith.constant 0 : index
    %c0_13 = arith.constant 0 : index
    %c0_14 = arith.constant 0 : index
    %13 = vector.load %arg7[%c0_12, %c0_13, %c0_14] : memref<4x32x8xbf16, #tpu.memory_space<vmem>>, vector<1x32x8xbf16>
    %14 = vector.shape_cast %13 : vector<1x32x8xbf16> to vector<32x8xbf16>
    %cst_15 = arith.constant dense<0.000000e+00> : vector<8x8xf32>
    %15 = tpu.matmul %4, %14, %cst_15 {dimension_numbers = #tpu.dot_dimension_numbers<[1], [0], [0], [1], [0, 0, 1, 1], [], []>} : vector<8x32xbf16>, vector<32x8xbf16>, vector<8x8xf32> -> vector<8x8xf32>
    %c0_16 = arith.constant 0 : index
    %c0_17 = arith.constant 0 : index
    %c0_18 = arith.constant 0 : index
    %16 = vector.load %arg8[%c0_16, %c0_17, %c0_18] : memref<4x1x8xf32, #tpu.memory_space<vmem>>, vector<1x1x8xf32>
    %17 = vector.shape_cast %16 : vector<1x1x8xf32> to vector<1x8xf32>
    %18 = vector.broadcast %17 : vector<1x8xf32> to vector<8x8xf32>
    %19 = arith.addf %15, %18 : vector<8x8xf32>
    %c0_19 = arith.constant 0 : index
    %c0_20 = arith.constant 0 : index
    %c0_21 = arith.constant 0 : index
    %20 = vector.load %arg9[%c0_19, %c0_20, %c0_21] : memref<4x32x8xbf16, #tpu.memory_space<vmem>>, vector<1x32x8xbf16>
    %21 = vector.shape_cast %20 : vector<1x32x8xbf16> to vector<32x8xbf16>
    %cst_22 = arith.constant dense<0.000000e+00> : vector<8x8xf32>
    %22 = tpu.matmul %4, %21, %cst_22 {dimension_numbers = #tpu.dot_dimension_numbers<[1], [0], [0], [1], [0, 0, 1, 1], [], []>} : vector<8x32xbf16>, vector<32x8xbf16>, vector<8x8xf32> -> vector<8x8xf32>
    %c0_23 = arith.constant 0 : index
    %c0_24 = arith.constant 0 : index
    %c0_25 = arith.constant 0 : index
    %23 = vector.load %arg10[%c0_23, %c0_24, %c0_25] : memref<4x1x8xf32, #tpu.memory_space<vmem>>, vector<1x1x8xf32>
    %24 = vector.shape_cast %23 : vector<1x1x8xf32> to vector<1x8xf32>
    %25 = vector.broadcast %24 : vector<1x8xf32> to vector<8x8xf32>
    %26 = arith.addf %22, %25 : vector<8x8xf32>
    %27 = arith.truncf %12 : vector<8x8xf32> to vector<8x8xbf16>
    %28 = arith.truncf %19 : vector<8x8xf32> to vector<8x8xbf16>
    %cst_26 = arith.constant dense<0.000000e+00> : vector<8x8xf32>
    %29 = tpu.matmul %27, %28, %cst_26 {dimension_numbers = #tpu.dot_dimension_numbers<[1], [1], [0], [0], [0, 0, 1, 0], [], []>} : vector<8x8xbf16>, vector<8x8xbf16>, vector<8x8xf32> -> vector<8x8xf32>
    %cst_27 = arith.constant 0.353553385 : f32
    %30 = vector.broadcast %cst_27 : f32 to vector<8x8xf32>
    %31 = arith.mulf %29, %30 : vector<8x8xf32>
    %cst_28 = arith.constant 0.000000e+00 : f32
    %32 = vector.broadcast %cst_28 : f32 to vector<8x8xf32>
    %33 = arith.cmpf ogt, %3, %32 : vector<8x8xf32>
    %cst_29 = arith.constant -1.000000e+04 : f32
    %34 = vector.broadcast %cst_29 : f32 to vector<8x8xf32>
    %35 = arith.select %33, %31, %34 : vector<8x8xi1>, vector<8x8xf32>
    %cst_30 = arith.constant dense<0xFF800000> : vector<8xf32>
    %36 = vector.multi_reduction <maximumf>, %35, %cst_30 [1] : vector<8x8xf32> to vector<8xf32>
    %37 = vector.shape_cast %36 : vector<8xf32> to vector<8x1xf32>
    %38 = vector.broadcast %37 : vector<8x1xf32> to vector<8x8xf32>
    %39 = arith.subf %35, %38 : vector<8x8xf32>
    %40 = math.exp %39 : vector<8x8xf32>
    %cst_31 = arith.constant dense<0.000000e+00> : vector<8xf32>
    %41 = vector.multi_reduction <add>, %40, %cst_31 [1] : vector<8x8xf32> to vector<8xf32>
    %42 = vector.shape_cast %41 : vector<8xf32> to vector<8x1xf32>
    %43 = tpu.reciprocal %42 {approx = true} : vector<8x1xf32> -> vector<8x1xf32>
    %44 = vector.broadcast %43 : vector<8x1xf32> to vector<8x8xf32>
    %45 = arith.mulf %40, %44 : vector<8x8xf32>
    %46 = arith.truncf %45 : vector<8x8xf32> to vector<8x8xbf16>
    %47 = arith.truncf %26 : vector<8x8xf32> to vector<8x8xbf16>
    %cst_32 = arith.constant dense<0.000000e+00> : vector<8x8xf32>
    %48 = tpu.matmul %46, %47, %cst_32 {dimension_numbers = #tpu.dot_dimension_numbers<[1], [0], [0], [1], [0, 0, 1, 1], [], []>} : vector<8x8xbf16>, vector<8x8xbf16>, vector<8x8xf32> -> vector<8x8xf32>
    %49 = arith.truncf %48 : vector<8x8xf32> to vector<8x8xbf16>
    %c0_33 = arith.constant 0 : index
    %c0_34 = arith.constant 0 : index
    %c0_35 = arith.constant 0 : index
    %50 = vector.load %arg11[%c0_33, %c0_34, %c0_35] : memref<4x8x32xbf16, #tpu.memory_space<vmem>>, vector<1x8x32xbf16>
    %51 = vector.shape_cast %50 : vector<1x8x32xbf16> to vector<8x32xbf16>
    %cst_36 = arith.constant dense<0.000000e+00> : vector<8x32xf32>
    %52 = tpu.matmul %49, %51, %cst_36 {dimension_numbers = #tpu.dot_dimension_numbers<[1], [0], [0], [1], [0, 0, 1, 1], [], []>} : vector<8x8xbf16>, vector<8x32xbf16>, vector<8x32xf32> -> vector<8x32xf32>
    %53 = arith.addf %5, %52 : vector<8x32xf32>
    %c1 = arith.constant 1 : index
    %c0_37 = arith.constant 0 : index
    %c0_38 = arith.constant 0 : index
    %54 = vector.load %arg5[%c1, %c0_37, %c0_38] : memref<4x32x8xbf16, #tpu.memory_space<vmem>>, vector<1x32x8xbf16>
    %55 = vector.shape_cast %54 : vector<1x32x8xbf16> to vector<32x8xbf16>
    %cst_39 = arith.constant dense<0.000000e+00> : vector<8x8xf32>
    %56 = tpu.matmul %4, %55, %cst_39 {dimension_numbers = #tpu.dot_dimension_numbers<[1], [0], [0], [1], [0, 0, 1, 1], [], []>} : vector<8x32xbf16>, vector<32x8xbf16>, vector<8x8xf32> -> vector<8x8xf32>
    %c1_40 = arith.constant 1 : index
    %c0_41 = arith.constant 0 : index
    %c0_42 = arith.constant 0 : index
    %57 = vector.load %arg6[%c1_40, %c0_41, %c0_42] : memref<4x1x8xf32, #tpu.memory_space<vmem>>, vector<1x1x8xf32>
    %58 = vector.shape_cast %57 : vector<1x1x8xf32> to vector<1x8xf32>
    %59 = vector.broadcast %58 : vector<1x8xf32> to vector<8x8xf32>
    %60 = arith.addf %56, %59 : vector<8x8xf32>
    %c1_43 = arith.constant 1 : index
    %c0_44 = arith.constant 0 : index
    %c0_45 = arith.constant 0 : index
    %61 = vector.load %arg7[%c1_43, %c0_44, %c0_45] : memref<4x32x8xbf16, #tpu.memory_space<vmem>>, vector<1x32x8xbf16>
    %62 = vector.shape_cast %61 : vector<1x32x8xbf16> to vector<32x8xbf16>
    %cst_46 = arith.constant dense<0.000000e+00> : vector<8x8xf32>
    %63 = tpu.matmul %4, %62, %cst_46 {dimension_numbers = #tpu.dot_dimension_numbers<[1], [0], [0], [1], [0, 0, 1, 1], [], []>} : vector<8x32xbf16>, vector<32x8xbf16>, vector<8x8xf32> -> vector<8x8xf32>
    %c1_47 = arith.constant 1 : index
    %c0_48 = arith.constant 0 : index
    %c0_49 = arith.constant 0 : index
    %64 = vector.load %arg8[%c1_47, %c0_48, %c0_49] : memref<4x1x8xf32, #tpu.memory_space<vmem>>, vector<1x1x8xf32>
    %65 = vector.shape_cast %64 : vector<1x1x8xf32> to vector<1x8xf32>
    %66 = vector.broadcast %65 : vector<1x8xf32> to vector<8x8xf32>
    %67 = arith.addf %63, %66 : vector<8x8xf32>
    %c1_50 = arith.constant 1 : index
    %c0_51 = arith.constant 0 : index
    %c0_52 = arith.constant 0 : index
    %68 = vector.load %arg9[%c1_50, %c0_51, %c0_52] : memref<4x32x8xbf16, #tpu.memory_space<vmem>>, vector<1x32x8xbf16>
    %69 = vector.shape_cast %68 : vector<1x32x8xbf16> to vector<32x8xbf16>
    %cst_53 = arith.constant dense<0.000000e+00> : vector<8x8xf32>
    %70 = tpu.matmul %4, %69, %cst_53 {dimension_numbers = #tpu.dot_dimension_numbers<[1], [0], [0], [1], [0, 0, 1, 1], [], []>} : vector<8x32xbf16>, vector<32x8xbf16>, vector<8x8xf32> -> vector<8x8xf32>
    %c1_54 = arith.constant 1 : index
    %c0_55 = arith.constant 0 : index
    %c0_56 = arith.constant 0 : index
    %71 = vector.load %arg10[%c1_54, %c0_55, %c0_56] : memref<4x1x8xf32, #tpu.memory_space<vmem>>, vector<1x1x8xf32>
    %72 = vector.shape_cast %71 : vector<1x1x8xf32> to vector<1x8xf32>
    %73 = vector.broadcast %72 : vector<1x8xf32> to vector<8x8xf32>
    %74 = arith.addf %70, %73 : vector<8x8xf32>
    %75 = arith.truncf %60 : vector<8x8xf32> to vector<8x8xbf16>
    %76 = arith.truncf %67 : vector<8x8xf32> to vector<8x8xbf16>
    %cst_57 = arith.constant dense<0.000000e+00> : vector<8x8xf32>
    %77 = tpu.matmul %75, %76, %cst_57 {dimension_numbers = #tpu.dot_dimension_numbers<[1], [1], [0], [0], [0, 0, 1, 0], [], []>} : vector<8x8xbf16>, vector<8x8xbf16>, vector<8x8xf32> -> vector<8x8xf32>
    %cst_58 = arith.constant 0.353553385 : f32
    %78 = vector.broadcast %cst_58 : f32 to vector<8x8xf32>
    %79 = arith.mulf %77, %78 : vector<8x8xf32>
    %cst_59 = arith.constant 0.000000e+00 : f32
    %80 = vector.broadcast %cst_59 : f32 to vector<8x8xf32>
    %81 = arith.cmpf ogt, %3, %80 : vector<8x8xf32>
    %cst_60 = arith.constant -1.000000e+04 : f32
    %82 = vector.broadcast %cst_60 : f32 to vector<8x8xf32>
    %83 = arith.select %81, %79, %82 : vector<8x8xi1>, vector<8x8xf32>
    %cst_61 = arith.constant dense<0xFF800000> : vector<8xf32>
    %84 = vector.multi_reduction <maximumf>, %83, %cst_61 [1] : vector<8x8xf32> to vector<8xf32>
    %85 = vector.shape_cast %84 : vector<8xf32> to vector<8x1xf32>
    %86 = vector.broadcast %85 : vector<8x1xf32> to vector<8x8xf32>
    %87 = arith.subf %83, %86 : vector<8x8xf32>
    %88 = math.exp %87 : vector<8x8xf32>
    %cst_62 = arith.constant dense<0.000000e+00> : vector<8xf32>
    %89 = vector.multi_reduction <add>, %88, %cst_62 [1] : vector<8x8xf32> to vector<8xf32>
    %90 = vector.shape_cast %89 : vector<8xf32> to vector<8x1xf32>
    %91 = tpu.reciprocal %90 {approx = true} : vector<8x1xf32> -> vector<8x1xf32>
    %92 = vector.broadcast %91 : vector<8x1xf32> to vector<8x8xf32>
    %93 = arith.mulf %88, %92 : vector<8x8xf32>
    %94 = arith.truncf %93 : vector<8x8xf32> to vector<8x8xbf16>
    %95 = arith.truncf %74 : vector<8x8xf32> to vector<8x8xbf16>
    %cst_63 = arith.constant dense<0.000000e+00> : vector<8x8xf32>
    %96 = tpu.matmul %94, %95, %cst_63 {dimension_numbers = #tpu.dot_dimension_numbers<[1], [0], [0], [1], [0, 0, 1, 1], [], []>} : vector<8x8xbf16>, vector<8x8xbf16>, vector<8x8xf32> -> vector<8x8xf32>
    %97 = arith.truncf %96 : vector<8x8xf32> to vector<8x8xbf16>
    %c1_64 = arith.constant 1 : index
    %c0_65 = arith.constant 0 : index
    %c0_66 = arith.constant 0 : index
    %98 = vector.load %arg11[%c1_64, %c0_65, %c0_66] : memref<4x8x32xbf16, #tpu.memory_space<vmem>>, vector<1x8x32xbf16>
    %99 = vector.shape_cast %98 : vector<1x8x32xbf16> to vector<8x32xbf16>
    %cst_67 = arith.constant dense<0.000000e+00> : vector<8x32xf32>
    %100 = tpu.matmul %97, %99, %cst_67 {dimension_numbers = #tpu.dot_dimension_numbers<[1], [0], [0], [1], [0, 0, 1, 1], [], []>} : vector<8x8xbf16>, vector<8x32xbf16>, vector<8x32xf32> -> vector<8x32xf32>
    %101 = arith.addf %53, %100 : vector<8x32xf32>
    %c2 = arith.constant 2 : index
    %c0_68 = arith.constant 0 : index
    %c0_69 = arith.constant 0 : index
    %102 = vector.load %arg5[%c2, %c0_68, %c0_69] : memref<4x32x8xbf16, #tpu.memory_space<vmem>>, vector<1x32x8xbf16>
    %103 = vector.shape_cast %102 : vector<1x32x8xbf16> to vector<32x8xbf16>
    %cst_70 = arith.constant dense<0.000000e+00> : vector<8x8xf32>
    %104 = tpu.matmul %4, %103, %cst_70 {dimension_numbers = #tpu.dot_dimension_numbers<[1], [0], [0], [1], [0, 0, 1, 1], [], []>} : vector<8x32xbf16>, vector<32x8xbf16>, vector<8x8xf32> -> vector<8x8xf32>
    %c2_71 = arith.constant 2 : index
    %c0_72 = arith.constant 0 : index
    %c0_73 = arith.constant 0 : index
    %105 = vector.load %arg6[%c2_71, %c0_72, %c0_73] : memref<4x1x8xf32, #tpu.memory_space<vmem>>, vector<1x1x8xf32>
    %106 = vector.shape_cast %105 : vector<1x1x8xf32> to vector<1x8xf32>
    %107 = vector.broadcast %106 : vector<1x8xf32> to vector<8x8xf32>
    %108 = arith.addf %104, %107 : vector<8x8xf32>
    %c2_74 = arith.constant 2 : index
    %c0_75 = arith.constant 0 : index
    %c0_76 = arith.constant 0 : index
    %109 = vector.load %arg7[%c2_74, %c0_75, %c0_76] : memref<4x32x8xbf16, #tpu.memory_space<vmem>>, vector<1x32x8xbf16>
    %110 = vector.shape_cast %109 : vector<1x32x8xbf16> to vector<32x8xbf16>
    %cst_77 = arith.constant dense<0.000000e+00> : vector<8x8xf32>
    %111 = tpu.matmul %4, %110, %cst_77 {dimension_numbers = #tpu.dot_dimension_numbers<[1], [0], [0], [1], [0, 0, 1, 1], [], []>} : vector<8x32xbf16>, vector<32x8xbf16>, vector<8x8xf32> -> vector<8x8xf32>
    %c2_78 = arith.constant 2 : index
    %c0_79 = arith.constant 0 : index
    %c0_80 = arith.constant 0 : index
    %112 = vector.load %arg8[%c2_78, %c0_79, %c0_80] : memref<4x1x8xf32, #tpu.memory_space<vmem>>, vector<1x1x8xf32>
    %113 = vector.shape_cast %112 : vector<1x1x8xf32> to vector<1x8xf32>
    %114 = vector.broadcast %113 : vector<1x8xf32> to vector<8x8xf32>
    %115 = arith.addf %111, %114 : vector<8x8xf32>
    %c2_81 = arith.constant 2 : index
    %c0_82 = arith.constant 0 : index
    %c0_83 = arith.constant 0 : index
    %116 = vector.load %arg9[%c2_81, %c0_82, %c0_83] : memref<4x32x8xbf16, #tpu.memory_space<vmem>>, vector<1x32x8xbf16>
    %117 = vector.shape_cast %116 : vector<1x32x8xbf16> to vector<32x8xbf16>
    %cst_84 = arith.constant dense<0.000000e+00> : vector<8x8xf32>
    %118 = tpu.matmul %4, %117, %cst_84 {dimension_numbers = #tpu.dot_dimension_numbers<[1], [0], [0], [1], [0, 0, 1, 1], [], []>} : vector<8x32xbf16>, vector<32x8xbf16>, vector<8x8xf32> -> vector<8x8xf32>
    %c2_85 = arith.constant 2 : index
    %c0_86 = arith.constant 0 : index
    %c0_87 = arith.constant 0 : index
    %119 = vector.load %arg10[%c2_85, %c0_86, %c0_87] : memref<4x1x8xf32, #tpu.memory_space<vmem>>, vector<1x1x8xf32>
    %120 = vector.shape_cast %119 : vector<1x1x8xf32> to vector<1x8xf32>
    %121 = vector.broadcast %120 : vector<1x8xf32> to vector<8x8xf32>
    %122 = arith.addf %118, %121 : vector<8x8xf32>
    %123 = arith.truncf %108 : vector<8x8xf32> to vector<8x8xbf16>
    %124 = arith.truncf %115 : vector<8x8xf32> to vector<8x8xbf16>
    %cst_88 = arith.constant dense<0.000000e+00> : vector<8x8xf32>
    %125 = tpu.matmul %123, %124, %cst_88 {dimension_numbers = #tpu.dot_dimension_numbers<[1], [1], [0], [0], [0, 0, 1, 0], [], []>} : vector<8x8xbf16>, vector<8x8xbf16>, vector<8x8xf32> -> vector<8x8xf32>
    %cst_89 = arith.constant 0.353553385 : f32
    %126 = vector.broadcast %cst_89 : f32 to vector<8x8xf32>
    %127 = arith.mulf %125, %126 : vector<8x8xf32>
    %cst_90 = arith.constant 0.000000e+00 : f32
    %128 = vector.broadcast %cst_90 : f32 to vector<8x8xf32>
    %129 = arith.cmpf ogt, %3, %128 : vector<8x8xf32>
    %cst_91 = arith.constant -1.000000e+04 : f32
    %130 = vector.broadcast %cst_91 : f32 to vector<8x8xf32>
    %131 = arith.select %129, %127, %130 : vector<8x8xi1>, vector<8x8xf32>
    %cst_92 = arith.constant dense<0xFF800000> : vector<8xf32>
    %132 = vector.multi_reduction <maximumf>, %131, %cst_92 [1] : vector<8x8xf32> to vector<8xf32>
    %133 = vector.shape_cast %132 : vector<8xf32> to vector<8x1xf32>
    %134 = vector.broadcast %133 : vector<8x1xf32> to vector<8x8xf32>
    %135 = arith.subf %131, %134 : vector<8x8xf32>
    %136 = math.exp %135 : vector<8x8xf32>
    %cst_93 = arith.constant dense<0.000000e+00> : vector<8xf32>
    %137 = vector.multi_reduction <add>, %136, %cst_93 [1] : vector<8x8xf32> to vector<8xf32>
    %138 = vector.shape_cast %137 : vector<8xf32> to vector<8x1xf32>
    %139 = tpu.reciprocal %138 {approx = true} : vector<8x1xf32> -> vector<8x1xf32>
    %140 = vector.broadcast %139 : vector<8x1xf32> to vector<8x8xf32>
    %141 = arith.mulf %136, %140 : vector<8x8xf32>
    %142 = arith.truncf %141 : vector<8x8xf32> to vector<8x8xbf16>
    %143 = arith.truncf %122 : vector<8x8xf32> to vector<8x8xbf16>
    %cst_94 = arith.constant dense<0.000000e+00> : vector<8x8xf32>
    %144 = tpu.matmul %142, %143, %cst_94 {dimension_numbers = #tpu.dot_dimension_numbers<[1], [0], [0], [1], [0, 0, 1, 1], [], []>} : vector<8x8xbf16>, vector<8x8xbf16>, vector<8x8xf32> -> vector<8x8xf32>
    %145 = arith.truncf %144 : vector<8x8xf32> to vector<8x8xbf16>
    %c2_95 = arith.constant 2 : index
    %c0_96 = arith.constant 0 : index
    %c0_97 = arith.constant 0 : index
    %146 = vector.load %arg11[%c2_95, %c0_96, %c0_97] : memref<4x8x32xbf16, #tpu.memory_space<vmem>>, vector<1x8x32xbf16>
    %147 = vector.shape_cast %146 : vector<1x8x32xbf16> to vector<8x32xbf16>
    %cst_98 = arith.constant dense<0.000000e+00> : vector<8x32xf32>
    %148 = tpu.matmul %145, %147, %cst_98 {dimension_numbers = #tpu.dot_dimension_numbers<[1], [0], [0], [1], [0, 0, 1, 1], [], []>} : vector<8x8xbf16>, vector<8x32xbf16>, vector<8x32xf32> -> vector<8x32xf32>
    %149 = arith.addf %101, %148 : vector<8x32xf32>
    %c3 = arith.constant 3 : index
    %c0_99 = arith.constant 0 : index
    %c0_100 = arith.constant 0 : index
    %150 = vector.load %arg5[%c3, %c0_99, %c0_100] : memref<4x32x8xbf16, #tpu.memory_space<vmem>>, vector<1x32x8xbf16>
    %151 = vector.shape_cast %150 : vector<1x32x8xbf16> to vector<32x8xbf16>
    %cst_101 = arith.constant dense<0.000000e+00> : vector<8x8xf32>
    %152 = tpu.matmul %4, %151, %cst_101 {dimension_numbers = #tpu.dot_dimension_numbers<[1], [0], [0], [1], [0, 0, 1, 1], [], []>} : vector<8x32xbf16>, vector<32x8xbf16>, vector<8x8xf32> -> vector<8x8xf32>
    %c3_102 = arith.constant 3 : index
    %c0_103 = arith.constant 0 : index
    %c0_104 = arith.constant 0 : index
    %153 = vector.load %arg6[%c3_102, %c0_103, %c0_104] : memref<4x1x8xf32, #tpu.memory_space<vmem>>, vector<1x1x8xf32>
    %154 = vector.shape_cast %153 : vector<1x1x8xf32> to vector<1x8xf32>
    %155 = vector.broadcast %154 : vector<1x8xf32> to vector<8x8xf32>
    %156 = arith.addf %152, %155 : vector<8x8xf32>
    %c3_105 = arith.constant 3 : index
    %c0_106 = arith.constant 0 : index
    %c0_107 = arith.constant 0 : index
    %157 = vector.load %arg7[%c3_105, %c0_106, %c0_107] : memref<4x32x8xbf16, #tpu.memory_space<vmem>>, vector<1x32x8xbf16>
    %158 = vector.shape_cast %157 : vector<1x32x8xbf16> to vector<32x8xbf16>
    %cst_108 = arith.constant dense<0.000000e+00> : vector<8x8xf32>
    %159 = tpu.matmul %4, %158, %cst_108 {dimension_numbers = #tpu.dot_dimension_numbers<[1], [0], [0], [1], [0, 0, 1, 1], [], []>} : vector<8x32xbf16>, vector<32x8xbf16>, vector<8x8xf32> -> vector<8x8xf32>
    %c3_109 = arith.constant 3 : index
    %c0_110 = arith.constant 0 : index
    %c0_111 = arith.constant 0 : index
    %160 = vector.load %arg8[%c3_109, %c0_110, %c0_111] : memref<4x1x8xf32, #tpu.memory_space<vmem>>, vector<1x1x8xf32>
    %161 = vector.shape_cast %160 : vector<1x1x8xf32> to vector<1x8xf32>
    %162 = vector.broadcast %161 : vector<1x8xf32> to vector<8x8xf32>
    %163 = arith.addf %159, %162 : vector<8x8xf32>
    %c3_112 = arith.constant 3 : index
    %c0_113 = arith.constant 0 : index
    %c0_114 = arith.constant 0 : index
    %164 = vector.load %arg9[%c3_112, %c0_113, %c0_114] : memref<4x32x8xbf16, #tpu.memory_space<vmem>>, vector<1x32x8xbf16>
    %165 = vector.shape_cast %164 : vector<1x32x8xbf16> to vector<32x8xbf16>
    %cst_115 = arith.constant dense<0.000000e+00> : vector<8x8xf32>
    %166 = tpu.matmul %4, %165, %cst_115 {dimension_numbers = #tpu.dot_dimension_numbers<[1], [0], [0], [1], [0, 0, 1, 1], [], []>} : vector<8x32xbf16>, vector<32x8xbf16>, vector<8x8xf32> -> vector<8x8xf32>
    %c3_116 = arith.constant 3 : index
    %c0_117 = arith.constant 0 : index
    %c0_118 = arith.constant 0 : index
    %167 = vector.load %arg10[%c3_116, %c0_117, %c0_118] : memref<4x1x8xf32, #tpu.memory_space<vmem>>, vector<1x1x8xf32>
    %168 = vector.shape_cast %167 : vector<1x1x8xf32> to vector<1x8xf32>
    %169 = vector.broadcast %168 : vector<1x8xf32> to vector<8x8xf32>
    %170 = arith.addf %166, %169 : vector<8x8xf32>
    %171 = arith.truncf %156 : vector<8x8xf32> to vector<8x8xbf16>
    %172 = arith.truncf %163 : vector<8x8xf32> to vector<8x8xbf16>
    %cst_119 = arith.constant dense<0.000000e+00> : vector<8x8xf32>
    %173 = tpu.matmul %171, %172, %cst_119 {dimension_numbers = #tpu.dot_dimension_numbers<[1], [1], [0], [0], [0, 0, 1, 0], [], []>} : vector<8x8xbf16>, vector<8x8xbf16>, vector<8x8xf32> -> vector<8x8xf32>
    %cst_120 = arith.constant 0.353553385 : f32
    %174 = vector.broadcast %cst_120 : f32 to vector<8x8xf32>
    %175 = arith.mulf %173, %174 : vector<8x8xf32>
    %cst_121 = arith.constant 0.000000e+00 : f32
    %176 = vector.broadcast %cst_121 : f32 to vector<8x8xf32>
    %177 = arith.cmpf ogt, %3, %176 : vector<8x8xf32>
    %cst_122 = arith.constant -1.000000e+04 : f32
    %178 = vector.broadcast %cst_122 : f32 to vector<8x8xf32>
    %179 = arith.select %177, %175, %178 : vector<8x8xi1>, vector<8x8xf32>
    %cst_123 = arith.constant dense<0xFF800000> : vector<8xf32>
    %180 = vector.multi_reduction <maximumf>, %179, %cst_123 [1] : vector<8x8xf32> to vector<8xf32>
    %181 = vector.shape_cast %180 : vector<8xf32> to vector<8x1xf32>
    %182 = vector.broadcast %181 : vector<8x1xf32> to vector<8x8xf32>
    %183 = arith.subf %179, %182 : vector<8x8xf32>
    %184 = math.exp %183 : vector<8x8xf32>
    %cst_124 = arith.constant dense<0.000000e+00> : vector<8xf32>
    %185 = vector.multi_reduction <add>, %184, %cst_124 [1] : vector<8x8xf32> to vector<8xf32>
    %186 = vector.shape_cast %185 : vector<8xf32> to vector<8x1xf32>
    %187 = tpu.reciprocal %186 {approx = true} : vector<8x1xf32> -> vector<8x1xf32>
    %188 = vector.broadcast %187 : vector<8x1xf32> to vector<8x8xf32>
    %189 = arith.mulf %184, %188 : vector<8x8xf32>
    %190 = arith.truncf %189 : vector<8x8xf32> to vector<8x8xbf16>
    %191 = arith.truncf %170 : vector<8x8xf32> to vector<8x8xbf16>
    %cst_125 = arith.constant dense<0.000000e+00> : vector<8x8xf32>
    %192 = tpu.matmul %190, %191, %cst_125 {dimension_numbers = #tpu.dot_dimension_numbers<[1], [0], [0], [1], [0, 0, 1, 1], [], []>} : vector<8x8xbf16>, vector<8x8xbf16>, vector<8x8xf32> -> vector<8x8xf32>
    %193 = arith.truncf %192 : vector<8x8xf32> to vector<8x8xbf16>
    %c3_126 = arith.constant 3 : index
    %c0_127 = arith.constant 0 : index
    %c0_128 = arith.constant 0 : index
    %194 = vector.load %arg11[%c3_126, %c0_127, %c0_128] : memref<4x8x32xbf16, #tpu.memory_space<vmem>>, vector<1x8x32xbf16>
    %195 = vector.shape_cast %194 : vector<1x8x32xbf16> to vector<8x32xbf16>
    %cst_129 = arith.constant dense<0.000000e+00> : vector<8x32xf32>
    %196 = tpu.matmul %193, %195, %cst_129 {dimension_numbers = #tpu.dot_dimension_numbers<[1], [0], [0], [1], [0, 0, 1, 1], [], []>} : vector<8x8xbf16>, vector<8x32xbf16>, vector<8x32xf32> -> vector<8x32xf32>
    %197 = arith.addf %149, %196 : vector<8x32xf32>
    %c0_130 = arith.constant 0 : index
    %c0_131 = arith.constant 0 : index
    %198 = vector.load %arg12[%c0_130, %c0_131] : memref<1x32xf32, #tpu.memory_space<vmem>>, vector<1x32xf32>
    %199 = vector.broadcast %198 : vector<1x32xf32> to vector<8x32xf32>
    %200 = arith.addf %197, %199 : vector<8x32xf32>
    %c0_132 = arith.constant 0 : index
    %c0_133 = arith.constant 0 : index
    %201 = vector.load %arg13[%c0_132, %c0_133] : memref<1x32xf32, #tpu.memory_space<vmem>>, vector<1x32xf32>
    %c0_134 = arith.constant 0 : index
    %c0_135 = arith.constant 0 : index
    %202 = vector.load %arg14[%c0_134, %c0_135] : memref<1x32xf32, #tpu.memory_space<vmem>>, vector<1x32xf32>
    %203 = arith.addf %200, %1 : vector<8x32xf32>
    %cst_136 = arith.constant dense<0.000000e+00> : vector<8xf32>
    %204 = vector.multi_reduction <add>, %203, %cst_136 [1] : vector<8x32xf32> to vector<8xf32>
    %205 = vector.shape_cast %204 : vector<8xf32> to vector<8x1xf32>
    %cst_137 = arith.constant 3.200000e+01 : f32
    %206 = vector.broadcast %cst_137 : f32 to vector<8x1xf32>
    %207 = arith.divf %205, %206 : vector<8x1xf32>
    %208 = vector.broadcast %207 : vector<8x1xf32> to vector<8x32xf32>
    %209 = arith.subf %203, %208 : vector<8x32xf32>
    %210 = arith.mulf %209, %209 : vector<8x32xf32>
    %cst_138 = arith.constant dense<0.000000e+00> : vector<8xf32>
    %211 = vector.multi_reduction <add>, %210, %cst_138 [1] : vector<8x32xf32> to vector<8xf32>
    %212 = vector.shape_cast %211 : vector<8xf32> to vector<8x1xf32>
    %cst_139 = arith.constant 3.200000e+01 : f32
    %213 = vector.broadcast %cst_139 : f32 to vector<8x1xf32>
    %214 = arith.divf %212, %213 : vector<8x1xf32>
    %cst_140 = arith.constant 1.000000e-10 : f32
    %215 = vector.broadcast %cst_140 : f32 to vector<8x1xf32>
    %216 = arith.maximumf %214, %215 : vector<8x1xf32>
    %217 = vector.broadcast %207 : vector<8x1xf32> to vector<8x32xf32>
    %218 = arith.subf %203, %217 : vector<8x32xf32>
    %cst_141 = arith.constant 1.000000e-10 : f32
    %219 = vector.broadcast %cst_141 : f32 to vector<8x1xf32>
    %220 = arith.addf %216, %219 : vector<8x1xf32>
    %221 = math.rsqrt %220 : vector<8x1xf32>
    %222 = vector.broadcast %221 : vector<8x1xf32> to vector<8x32xf32>
    %223 = arith.mulf %218, %222 : vector<8x32xf32>
    %224 = vector.broadcast %201 : vector<1x32xf32> to vector<8x32xf32>
    %225 = arith.mulf %224, %223 : vector<8x32xf32>
    %226 = vector.broadcast %202 : vector<1x32xf32> to vector<8x32xf32>
    %227 = arith.addf %225, %226 : vector<8x32xf32>
    %c0_142 = arith.constant 0 : index
    %c0_143 = arith.constant 0 : index
    %c0_144 = arith.constant 0 : index
    %228 = vector.load %arg2[%c0_142, %c0_143, %c0_144] : memref<1x8x32xf32, #tpu.memory_space<vmem>>, vector<1x8x32xf32>
    %229 = vector.shape_cast %228 : vector<1x8x32xf32> to vector<8x32xf32>
    %c0_145 = arith.constant 0 : index
    %c0_146 = arith.constant 0 : index
    %c0_147 = arith.constant 0 : index
    %230 = vector.load %arg4[%c0_145, %c0_146, %c0_147] : memref<1x8x8xf32, #tpu.memory_space<vmem>>, vector<1x8x8xf32>
    %231 = vector.shape_cast %230 : vector<1x8x8xf32> to vector<8x8xf32>
    %232 = arith.truncf %227 : vector<8x32xf32> to vector<8x32xbf16>
    %233 = arith.truncf %229 : vector<8x32xf32> to vector<8x32xbf16>
    %cst_148 = arith.constant 0.000000e+00 : f32
    %234 = vector.broadcast %cst_148 : f32 to vector<8x32xf32>
    %c0_149 = arith.constant 0 : index
    %c0_150 = arith.constant 0 : index
    %c0_151 = arith.constant 0 : index
    %235 = vector.load %arg15[%c0_149, %c0_150, %c0_151] : memref<4x32x8xbf16, #tpu.memory_space<vmem>>, vector<1x32x8xbf16>
    %236 = vector.shape_cast %235 : vector<1x32x8xbf16> to vector<32x8xbf16>
    %cst_152 = arith.constant dense<0.000000e+00> : vector<8x8xf32>
    %237 = tpu.matmul %232, %236, %cst_152 {dimension_numbers = #tpu.dot_dimension_numbers<[1], [0], [0], [1], [0, 0, 1, 1], [], []>} : vector<8x32xbf16>, vector<32x8xbf16>, vector<8x8xf32> -> vector<8x8xf32>
    %c0_153 = arith.constant 0 : index
    %c0_154 = arith.constant 0 : index
    %c0_155 = arith.constant 0 : index
    %238 = vector.load %arg16[%c0_153, %c0_154, %c0_155] : memref<4x1x8xf32, #tpu.memory_space<vmem>>, vector<1x1x8xf32>
    %239 = vector.shape_cast %238 : vector<1x1x8xf32> to vector<1x8xf32>
    %240 = vector.broadcast %239 : vector<1x8xf32> to vector<8x8xf32>
    %241 = arith.addf %237, %240 : vector<8x8xf32>
    %c0_156 = arith.constant 0 : index
    %c0_157 = arith.constant 0 : index
    %c0_158 = arith.constant 0 : index
    %242 = vector.load %arg17[%c0_156, %c0_157, %c0_158] : memref<4x32x8xbf16, #tpu.memory_space<vmem>>, vector<1x32x8xbf16>
    %243 = vector.shape_cast %242 : vector<1x32x8xbf16> to vector<32x8xbf16>
    %cst_159 = arith.constant dense<0.000000e+00> : vector<8x8xf32>
    %244 = tpu.matmul %233, %243, %cst_159 {dimension_numbers = #tpu.dot_dimension_numbers<[1], [0], [0], [1], [0, 0, 1, 1], [], []>} : vector<8x32xbf16>, vector<32x8xbf16>, vector<8x8xf32> -> vector<8x8xf32>
    %c0_160 = arith.constant 0 : index
    %c0_161 = arith.constant 0 : index
    %c0_162 = arith.constant 0 : index
    %245 = vector.load %arg18[%c0_160, %c0_161, %c0_162] : memref<4x1x8xf32, #tpu.memory_space<vmem>>, vector<1x1x8xf32>
    %246 = vector.shape_cast %245 : vector<1x1x8xf32> to vector<1x8xf32>
    %247 = vector.broadcast %246 : vector<1x8xf32> to vector<8x8xf32>
    %248 = arith.addf %244, %247 : vector<8x8xf32>
    %c0_163 = arith.constant 0 : index
    %c0_164 = arith.constant 0 : index
    %c0_165 = arith.constant 0 : index
    %249 = vector.load %arg19[%c0_163, %c0_164, %c0_165] : memref<4x32x8xbf16, #tpu.memory_space<vmem>>, vector<1x32x8xbf16>
    %250 = vector.shape_cast %249 : vector<1x32x8xbf16> to vector<32x8xbf16>
    %cst_166 = arith.constant dense<0.000000e+00> : vector<8x8xf32>
    %251 = tpu.matmul %233, %250, %cst_166 {dimension_numbers = #tpu.dot_dimension_numbers<[1], [0], [0], [1], [0, 0, 1, 1], [], []>} : vector<8x32xbf16>, vector<32x8xbf16>, vector<8x8xf32> -> vector<8x8xf32>
    %c0_167 = arith.constant 0 : index
    %c0_168 = arith.constant 0 : index
    %c0_169 = arith.constant 0 : index
    %252 = vector.load %arg20[%c0_167, %c0_168, %c0_169] : memref<4x1x8xf32, #tpu.memory_space<vmem>>, vector<1x1x8xf32>
    %253 = vector.shape_cast %252 : vector<1x1x8xf32> to vector<1x8xf32>
    %254 = vector.broadcast %253 : vector<1x8xf32> to vector<8x8xf32>
    %255 = arith.addf %251, %254 : vector<8x8xf32>
    %256 = arith.truncf %241 : vector<8x8xf32> to vector<8x8xbf16>
    %257 = arith.truncf %248 : vector<8x8xf32> to vector<8x8xbf16>
    %cst_170 = arith.constant dense<0.000000e+00> : vector<8x8xf32>
    %258 = tpu.matmul %256, %257, %cst_170 {dimension_numbers = #tpu.dot_dimension_numbers<[1], [1], [0], [0], [0, 0, 1, 0], [], []>} : vector<8x8xbf16>, vector<8x8xbf16>, vector<8x8xf32> -> vector<8x8xf32>
    %cst_171 = arith.constant 0.353553385 : f32
    %259 = vector.broadcast %cst_171 : f32 to vector<8x8xf32>
    %260 = arith.mulf %258, %259 : vector<8x8xf32>
    %cst_172 = arith.constant 0.000000e+00 : f32
    %261 = vector.broadcast %cst_172 : f32 to vector<8x8xf32>
    %262 = arith.cmpf ogt, %231, %261 : vector<8x8xf32>
    %cst_173 = arith.constant -1.000000e+04 : f32
    %263 = vector.broadcast %cst_173 : f32 to vector<8x8xf32>
    %264 = arith.select %262, %260, %263 : vector<8x8xi1>, vector<8x8xf32>
    %cst_174 = arith.constant dense<0xFF800000> : vector<8xf32>
    %265 = vector.multi_reduction <maximumf>, %264, %cst_174 [1] : vector<8x8xf32> to vector<8xf32>
    %266 = vector.shape_cast %265 : vector<8xf32> to vector<8x1xf32>
    %267 = vector.broadcast %266 : vector<8x1xf32> to vector<8x8xf32>
    %268 = arith.subf %264, %267 : vector<8x8xf32>
    %269 = math.exp %268 : vector<8x8xf32>
    %cst_175 = arith.constant dense<0.000000e+00> : vector<8xf32>
    %270 = vector.multi_reduction <add>, %269, %cst_175 [1] : vector<8x8xf32> to vector<8xf32>
    %271 = vector.shape_cast %270 : vector<8xf32> to vector<8x1xf32>
    %272 = tpu.reciprocal %271 {approx = true} : vector<8x1xf32> -> vector<8x1xf32>
    %273 = vector.broadcast %272 : vector<8x1xf32> to vector<8x8xf32>
    %274 = arith.mulf %269, %273 : vector<8x8xf32>
    %275 = arith.truncf %274 : vector<8x8xf32> to vector<8x8xbf16>
    %276 = arith.truncf %255 : vector<8x8xf32> to vector<8x8xbf16>
    %cst_176 = arith.constant dense<0.000000e+00> : vector<8x8xf32>
    %277 = tpu.matmul %275, %276, %cst_176 {dimension_numbers = #tpu.dot_dimension_numbers<[1], [0], [0], [1], [0, 0, 1, 1], [], []>} : vector<8x8xbf16>, vector<8x8xbf16>, vector<8x8xf32> -> vector<8x8xf32>
    %278 = arith.truncf %277 : vector<8x8xf32> to vector<8x8xbf16>
    %c0_177 = arith.constant 0 : index
    %c0_178 = arith.constant 0 : index
    %c0_179 = arith.constant 0 : index
    %279 = vector.load %arg21[%c0_177, %c0_178, %c0_179] : memref<4x8x32xbf16, #tpu.memory_space<vmem>>, vector<1x8x32xbf16>
    %280 = vector.shape_cast %279 : vector<1x8x32xbf16> to vector<8x32xbf16>
    %cst_180 = arith.constant dense<0.000000e+00> : vector<8x32xf32>
    %281 = tpu.matmul %278, %280, %cst_180 {dimension_numbers = #tpu.dot_dimension_numbers<[1], [0], [0], [1], [0, 0, 1, 1], [], []>} : vector<8x8xbf16>, vector<8x32xbf16>, vector<8x32xf32> -> vector<8x32xf32>
    %282 = arith.addf %234, %281 : vector<8x32xf32>
    %c1_181 = arith.constant 1 : index
    %c0_182 = arith.constant 0 : index
    %c0_183 = arith.constant 0 : index
    %283 = vector.load %arg15[%c1_181, %c0_182, %c0_183] : memref<4x32x8xbf16, #tpu.memory_space<vmem>>, vector<1x32x8xbf16>
    %284 = vector.shape_cast %283 : vector<1x32x8xbf16> to vector<32x8xbf16>
    %cst_184 = arith.constant dense<0.000000e+00> : vector<8x8xf32>
    %285 = tpu.matmul %232, %284, %cst_184 {dimension_numbers = #tpu.dot_dimension_numbers<[1], [0], [0], [1], [0, 0, 1, 1], [], []>} : vector<8x32xbf16>, vector<32x8xbf16>, vector<8x8xf32> -> vector<8x8xf32>
    %c1_185 = arith.constant 1 : index
    %c0_186 = arith.constant 0 : index
    %c0_187 = arith.constant 0 : index
    %286 = vector.load %arg16[%c1_185, %c0_186, %c0_187] : memref<4x1x8xf32, #tpu.memory_space<vmem>>, vector<1x1x8xf32>
    %287 = vector.shape_cast %286 : vector<1x1x8xf32> to vector<1x8xf32>
    %288 = vector.broadcast %287 : vector<1x8xf32> to vector<8x8xf32>
    %289 = arith.addf %285, %288 : vector<8x8xf32>
    %c1_188 = arith.constant 1 : index
    %c0_189 = arith.constant 0 : index
    %c0_190 = arith.constant 0 : index
    %290 = vector.load %arg17[%c1_188, %c0_189, %c0_190] : memref<4x32x8xbf16, #tpu.memory_space<vmem>>, vector<1x32x8xbf16>
    %291 = vector.shape_cast %290 : vector<1x32x8xbf16> to vector<32x8xbf16>
    %cst_191 = arith.constant dense<0.000000e+00> : vector<8x8xf32>
    %292 = tpu.matmul %233, %291, %cst_191 {dimension_numbers = #tpu.dot_dimension_numbers<[1], [0], [0], [1], [0, 0, 1, 1], [], []>} : vector<8x32xbf16>, vector<32x8xbf16>, vector<8x8xf32> -> vector<8x8xf32>
    %c1_192 = arith.constant 1 : index
    %c0_193 = arith.constant 0 : index
    %c0_194 = arith.constant 0 : index
    %293 = vector.load %arg18[%c1_192, %c0_193, %c0_194] : memref<4x1x8xf32, #tpu.memory_space<vmem>>, vector<1x1x8xf32>
    %294 = vector.shape_cast %293 : vector<1x1x8xf32> to vector<1x8xf32>
    %295 = vector.broadcast %294 : vector<1x8xf32> to vector<8x8xf32>
    %296 = arith.addf %292, %295 : vector<8x8xf32>
    %c1_195 = arith.constant 1 : index
    %c0_196 = arith.constant 0 : index
    %c0_197 = arith.constant 0 : index
    %297 = vector.load %arg19[%c1_195, %c0_196, %c0_197] : memref<4x32x8xbf16, #tpu.memory_space<vmem>>, vector<1x32x8xbf16>
    %298 = vector.shape_cast %297 : vector<1x32x8xbf16> to vector<32x8xbf16>
    %cst_198 = arith.constant dense<0.000000e+00> : vector<8x8xf32>
    %299 = tpu.matmul %233, %298, %cst_198 {dimension_numbers = #tpu.dot_dimension_numbers<[1], [0], [0], [1], [0, 0, 1, 1], [], []>} : vector<8x32xbf16>, vector<32x8xbf16>, vector<8x8xf32> -> vector<8x8xf32>
    %c1_199 = arith.constant 1 : index
    %c0_200 = arith.constant 0 : index
    %c0_201 = arith.constant 0 : index
    %300 = vector.load %arg20[%c1_199, %c0_200, %c0_201] : memref<4x1x8xf32, #tpu.memory_space<vmem>>, vector<1x1x8xf32>
    %301 = vector.shape_cast %300 : vector<1x1x8xf32> to vector<1x8xf32>
    %302 = vector.broadcast %301 : vector<1x8xf32> to vector<8x8xf32>
    %303 = arith.addf %299, %302 : vector<8x8xf32>
    %304 = arith.truncf %289 : vector<8x8xf32> to vector<8x8xbf16>
    %305 = arith.truncf %296 : vector<8x8xf32> to vector<8x8xbf16>
    %cst_202 = arith.constant dense<0.000000e+00> : vector<8x8xf32>
    %306 = tpu.matmul %304, %305, %cst_202 {dimension_numbers = #tpu.dot_dimension_numbers<[1], [1], [0], [0], [0, 0, 1, 0], [], []>} : vector<8x8xbf16>, vector<8x8xbf16>, vector<8x8xf32> -> vector<8x8xf32>
    %cst_203 = arith.constant 0.353553385 : f32
    %307 = vector.broadcast %cst_203 : f32 to vector<8x8xf32>
    %308 = arith.mulf %306, %307 : vector<8x8xf32>
    %cst_204 = arith.constant 0.000000e+00 : f32
    %309 = vector.broadcast %cst_204 : f32 to vector<8x8xf32>
    %310 = arith.cmpf ogt, %231, %309 : vector<8x8xf32>
    %cst_205 = arith.constant -1.000000e+04 : f32
    %311 = vector.broadcast %cst_205 : f32 to vector<8x8xf32>
    %312 = arith.select %310, %308, %311 : vector<8x8xi1>, vector<8x8xf32>
    %cst_206 = arith.constant dense<0xFF800000> : vector<8xf32>
    %313 = vector.multi_reduction <maximumf>, %312, %cst_206 [1] : vector<8x8xf32> to vector<8xf32>
    %314 = vector.shape_cast %313 : vector<8xf32> to vector<8x1xf32>
    %315 = vector.broadcast %314 : vector<8x1xf32> to vector<8x8xf32>
    %316 = arith.subf %312, %315 : vector<8x8xf32>
    %317 = math.exp %316 : vector<8x8xf32>
    %cst_207 = arith.constant dense<0.000000e+00> : vector<8xf32>
    %318 = vector.multi_reduction <add>, %317, %cst_207 [1] : vector<8x8xf32> to vector<8xf32>
    %319 = vector.shape_cast %318 : vector<8xf32> to vector<8x1xf32>
    %320 = tpu.reciprocal %319 {approx = true} : vector<8x1xf32> -> vector<8x1xf32>
    %321 = vector.broadcast %320 : vector<8x1xf32> to vector<8x8xf32>
    %322 = arith.mulf %317, %321 : vector<8x8xf32>
    %323 = arith.truncf %322 : vector<8x8xf32> to vector<8x8xbf16>
    %324 = arith.truncf %303 : vector<8x8xf32> to vector<8x8xbf16>
    %cst_208 = arith.constant dense<0.000000e+00> : vector<8x8xf32>
    %325 = tpu.matmul %323, %324, %cst_208 {dimension_numbers = #tpu.dot_dimension_numbers<[1], [0], [0], [1], [0, 0, 1, 1], [], []>} : vector<8x8xbf16>, vector<8x8xbf16>, vector<8x8xf32> -> vector<8x8xf32>
    %326 = arith.truncf %325 : vector<8x8xf32> to vector<8x8xbf16>
    %c1_209 = arith.constant 1 : index
    %c0_210 = arith.constant 0 : index
    %c0_211 = arith.constant 0 : index
    %327 = vector.load %arg21[%c1_209, %c0_210, %c0_211] : memref<4x8x32xbf16, #tpu.memory_space<vmem>>, vector<1x8x32xbf16>
    %328 = vector.shape_cast %327 : vector<1x8x32xbf16> to vector<8x32xbf16>
    %cst_212 = arith.constant dense<0.000000e+00> : vector<8x32xf32>
    %329 = tpu.matmul %326, %328, %cst_212 {dimension_numbers = #tpu.dot_dimension_numbers<[1], [0], [0], [1], [0, 0, 1, 1], [], []>} : vector<8x8xbf16>, vector<8x32xbf16>, vector<8x32xf32> -> vector<8x32xf32>
    %330 = arith.addf %282, %329 : vector<8x32xf32>
    %c2_213 = arith.constant 2 : index
    %c0_214 = arith.constant 0 : index
    %c0_215 = arith.constant 0 : index
    %331 = vector.load %arg15[%c2_213, %c0_214, %c0_215] : memref<4x32x8xbf16, #tpu.memory_space<vmem>>, vector<1x32x8xbf16>
    %332 = vector.shape_cast %331 : vector<1x32x8xbf16> to vector<32x8xbf16>
    %cst_216 = arith.constant dense<0.000000e+00> : vector<8x8xf32>
    %333 = tpu.matmul %232, %332, %cst_216 {dimension_numbers = #tpu.dot_dimension_numbers<[1], [0], [0], [1], [0, 0, 1, 1], [], []>} : vector<8x32xbf16>, vector<32x8xbf16>, vector<8x8xf32> -> vector<8x8xf32>
    %c2_217 = arith.constant 2 : index
    %c0_218 = arith.constant 0 : index
    %c0_219 = arith.constant 0 : index
    %334 = vector.load %arg16[%c2_217, %c0_218, %c0_219] : memref<4x1x8xf32, #tpu.memory_space<vmem>>, vector<1x1x8xf32>
    %335 = vector.shape_cast %334 : vector<1x1x8xf32> to vector<1x8xf32>
    %336 = vector.broadcast %335 : vector<1x8xf32> to vector<8x8xf32>
    %337 = arith.addf %333, %336 : vector<8x8xf32>
    %c2_220 = arith.constant 2 : index
    %c0_221 = arith.constant 0 : index
    %c0_222 = arith.constant 0 : index
    %338 = vector.load %arg17[%c2_220, %c0_221, %c0_222] : memref<4x32x8xbf16, #tpu.memory_space<vmem>>, vector<1x32x8xbf16>
    %339 = vector.shape_cast %338 : vector<1x32x8xbf16> to vector<32x8xbf16>
    %cst_223 = arith.constant dense<0.000000e+00> : vector<8x8xf32>
    %340 = tpu.matmul %233, %339, %cst_223 {dimension_numbers = #tpu.dot_dimension_numbers<[1], [0], [0], [1], [0, 0, 1, 1], [], []>} : vector<8x32xbf16>, vector<32x8xbf16>, vector<8x8xf32> -> vector<8x8xf32>
    %c2_224 = arith.constant 2 : index
    %c0_225 = arith.constant 0 : index
    %c0_226 = arith.constant 0 : index
    %341 = vector.load %arg18[%c2_224, %c0_225, %c0_226] : memref<4x1x8xf32, #tpu.memory_space<vmem>>, vector<1x1x8xf32>
    %342 = vector.shape_cast %341 : vector<1x1x8xf32> to vector<1x8xf32>
    %343 = vector.broadcast %342 : vector<1x8xf32> to vector<8x8xf32>
    %344 = arith.addf %340, %343 : vector<8x8xf32>
    %c2_227 = arith.constant 2 : index
    %c0_228 = arith.constant 0 : index
    %c0_229 = arith.constant 0 : index
    %345 = vector.load %arg19[%c2_227, %c0_228, %c0_229] : memref<4x32x8xbf16, #tpu.memory_space<vmem>>, vector<1x32x8xbf16>
    %346 = vector.shape_cast %345 : vector<1x32x8xbf16> to vector<32x8xbf16>
    %cst_230 = arith.constant dense<0.000000e+00> : vector<8x8xf32>
    %347 = tpu.matmul %233, %346, %cst_230 {dimension_numbers = #tpu.dot_dimension_numbers<[1], [0], [0], [1], [0, 0, 1, 1], [], []>} : vector<8x32xbf16>, vector<32x8xbf16>, vector<8x8xf32> -> vector<8x8xf32>
    %c2_231 = arith.constant 2 : index
    %c0_232 = arith.constant 0 : index
    %c0_233 = arith.constant 0 : index
    %348 = vector.load %arg20[%c2_231, %c0_232, %c0_233] : memref<4x1x8xf32, #tpu.memory_space<vmem>>, vector<1x1x8xf32>
    %349 = vector.shape_cast %348 : vector<1x1x8xf32> to vector<1x8xf32>
    %350 = vector.broadcast %349 : vector<1x8xf32> to vector<8x8xf32>
    %351 = arith.addf %347, %350 : vector<8x8xf32>
    %352 = arith.truncf %337 : vector<8x8xf32> to vector<8x8xbf16>
    %353 = arith.truncf %344 : vector<8x8xf32> to vector<8x8xbf16>
    %cst_234 = arith.constant dense<0.000000e+00> : vector<8x8xf32>
    %354 = tpu.matmul %352, %353, %cst_234 {dimension_numbers = #tpu.dot_dimension_numbers<[1], [1], [0], [0], [0, 0, 1, 0], [], []>} : vector<8x8xbf16>, vector<8x8xbf16>, vector<8x8xf32> -> vector<8x8xf32>
    %cst_235 = arith.constant 0.353553385 : f32
    %355 = vector.broadcast %cst_235 : f32 to vector<8x8xf32>
    %356 = arith.mulf %354, %355 : vector<8x8xf32>
    %cst_236 = arith.constant 0.000000e+00 : f32
    %357 = vector.broadcast %cst_236 : f32 to vector<8x8xf32>
    %358 = arith.cmpf ogt, %231, %357 : vector<8x8xf32>
    %cst_237 = arith.constant -1.000000e+04 : f32
    %359 = vector.broadcast %cst_237 : f32 to vector<8x8xf32>
    %360 = arith.select %358, %356, %359 : vector<8x8xi1>, vector<8x8xf32>
    %cst_238 = arith.constant dense<0xFF800000> : vector<8xf32>
    %361 = vector.multi_reduction <maximumf>, %360, %cst_238 [1] : vector<8x8xf32> to vector<8xf32>
    %362 = vector.shape_cast %361 : vector<8xf32> to vector<8x1xf32>
    %363 = vector.broadcast %362 : vector<8x1xf32> to vector<8x8xf32>
    %364 = arith.subf %360, %363 : vector<8x8xf32>
    %365 = math.exp %364 : vector<8x8xf32>
    %cst_239 = arith.constant dense<0.000000e+00> : vector<8xf32>
    %366 = vector.multi_reduction <add>, %365, %cst_239 [1] : vector<8x8xf32> to vector<8xf32>
    %367 = vector.shape_cast %366 : vector<8xf32> to vector<8x1xf32>
    %368 = tpu.reciprocal %367 {approx = true} : vector<8x1xf32> -> vector<8x1xf32>
    %369 = vector.broadcast %368 : vector<8x1xf32> to vector<8x8xf32>
    %370 = arith.mulf %365, %369 : vector<8x8xf32>
    %371 = arith.truncf %370 : vector<8x8xf32> to vector<8x8xbf16>
    %372 = arith.truncf %351 : vector<8x8xf32> to vector<8x8xbf16>
    %cst_240 = arith.constant dense<0.000000e+00> : vector<8x8xf32>
    %373 = tpu.matmul %371, %372, %cst_240 {dimension_numbers = #tpu.dot_dimension_numbers<[1], [0], [0], [1], [0, 0, 1, 1], [], []>} : vector<8x8xbf16>, vector<8x8xbf16>, vector<8x8xf32> -> vector<8x8xf32>
    %374 = arith.truncf %373 : vector<8x8xf32> to vector<8x8xbf16>
    %c2_241 = arith.constant 2 : index
    %c0_242 = arith.constant 0 : index
    %c0_243 = arith.constant 0 : index
    %375 = vector.load %arg21[%c2_241, %c0_242, %c0_243] : memref<4x8x32xbf16, #tpu.memory_space<vmem>>, vector<1x8x32xbf16>
    %376 = vector.shape_cast %375 : vector<1x8x32xbf16> to vector<8x32xbf16>
    %cst_244 = arith.constant dense<0.000000e+00> : vector<8x32xf32>
    %377 = tpu.matmul %374, %376, %cst_244 {dimension_numbers = #tpu.dot_dimension_numbers<[1], [0], [0], [1], [0, 0, 1, 1], [], []>} : vector<8x8xbf16>, vector<8x32xbf16>, vector<8x32xf32> -> vector<8x32xf32>
    %378 = arith.addf %330, %377 : vector<8x32xf32>
    %c3_245 = arith.constant 3 : index
    %c0_246 = arith.constant 0 : index
    %c0_247 = arith.constant 0 : index
    %379 = vector.load %arg15[%c3_245, %c0_246, %c0_247] : memref<4x32x8xbf16, #tpu.memory_space<vmem>>, vector<1x32x8xbf16>
    %380 = vector.shape_cast %379 : vector<1x32x8xbf16> to vector<32x8xbf16>
    %cst_248 = arith.constant dense<0.000000e+00> : vector<8x8xf32>
    %381 = tpu.matmul %232, %380, %cst_248 {dimension_numbers = #tpu.dot_dimension_numbers<[1], [0], [0], [1], [0, 0, 1, 1], [], []>} : vector<8x32xbf16>, vector<32x8xbf16>, vector<8x8xf32> -> vector<8x8xf32>
    %c3_249 = arith.constant 3 : index
    %c0_250 = arith.constant 0 : index
    %c0_251 = arith.constant 0 : index
    %382 = vector.load %arg16[%c3_249, %c0_250, %c0_251] : memref<4x1x8xf32, #tpu.memory_space<vmem>>, vector<1x1x8xf32>
    %383 = vector.shape_cast %382 : vector<1x1x8xf32> to vector<1x8xf32>
    %384 = vector.broadcast %383 : vector<1x8xf32> to vector<8x8xf32>
    %385 = arith.addf %381, %384 : vector<8x8xf32>
    %c3_252 = arith.constant 3 : index
    %c0_253 = arith.constant 0 : index
    %c0_254 = arith.constant 0 : index
    %386 = vector.load %arg17[%c3_252, %c0_253, %c0_254] : memref<4x32x8xbf16, #tpu.memory_space<vmem>>, vector<1x32x8xbf16>
    %387 = vector.shape_cast %386 : vector<1x32x8xbf16> to vector<32x8xbf16>
    %cst_255 = arith.constant dense<0.000000e+00> : vector<8x8xf32>
    %388 = tpu.matmul %233, %387, %cst_255 {dimension_numbers = #tpu.dot_dimension_numbers<[1], [0], [0], [1], [0, 0, 1, 1], [], []>} : vector<8x32xbf16>, vector<32x8xbf16>, vector<8x8xf32> -> vector<8x8xf32>
    %c3_256 = arith.constant 3 : index
    %c0_257 = arith.constant 0 : index
    %c0_258 = arith.constant 0 : index
    %389 = vector.load %arg18[%c3_256, %c0_257, %c0_258] : memref<4x1x8xf32, #tpu.memory_space<vmem>>, vector<1x1x8xf32>
    %390 = vector.shape_cast %389 : vector<1x1x8xf32> to vector<1x8xf32>
    %391 = vector.broadcast %390 : vector<1x8xf32> to vector<8x8xf32>
    %392 = arith.addf %388, %391 : vector<8x8xf32>
    %c3_259 = arith.constant 3 : index
    %c0_260 = arith.constant 0 : index
    %c0_261 = arith.constant 0 : index
    %393 = vector.load %arg19[%c3_259, %c0_260, %c0_261] : memref<4x32x8xbf16, #tpu.memory_space<vmem>>, vector<1x32x8xbf16>
    %394 = vector.shape_cast %393 : vector<1x32x8xbf16> to vector<32x8xbf16>
    %cst_262 = arith.constant dense<0.000000e+00> : vector<8x8xf32>
    %395 = tpu.matmul %233, %394, %cst_262 {dimension_numbers = #tpu.dot_dimension_numbers<[1], [0], [0], [1], [0, 0, 1, 1], [], []>} : vector<8x32xbf16>, vector<32x8xbf16>, vector<8x8xf32> -> vector<8x8xf32>
    %c3_263 = arith.constant 3 : index
    %c0_264 = arith.constant 0 : index
    %c0_265 = arith.constant 0 : index
    %396 = vector.load %arg20[%c3_263, %c0_264, %c0_265] : memref<4x1x8xf32, #tpu.memory_space<vmem>>, vector<1x1x8xf32>
    %397 = vector.shape_cast %396 : vector<1x1x8xf32> to vector<1x8xf32>
    %398 = vector.broadcast %397 : vector<1x8xf32> to vector<8x8xf32>
    %399 = arith.addf %395, %398 : vector<8x8xf32>
    %400 = arith.truncf %385 : vector<8x8xf32> to vector<8x8xbf16>
    %401 = arith.truncf %392 : vector<8x8xf32> to vector<8x8xbf16>
    %cst_266 = arith.constant dense<0.000000e+00> : vector<8x8xf32>
    %402 = tpu.matmul %400, %401, %cst_266 {dimension_numbers = #tpu.dot_dimension_numbers<[1], [1], [0], [0], [0, 0, 1, 0], [], []>} : vector<8x8xbf16>, vector<8x8xbf16>, vector<8x8xf32> -> vector<8x8xf32>
    %cst_267 = arith.constant 0.353553385 : f32
    %403 = vector.broadcast %cst_267 : f32 to vector<8x8xf32>
    %404 = arith.mulf %402, %403 : vector<8x8xf32>
    %cst_268 = arith.constant 0.000000e+00 : f32
    %405 = vector.broadcast %cst_268 : f32 to vector<8x8xf32>
    %406 = arith.cmpf ogt, %231, %405 : vector<8x8xf32>
    %cst_269 = arith.constant -1.000000e+04 : f32
    %407 = vector.broadcast %cst_269 : f32 to vector<8x8xf32>
    %408 = arith.select %406, %404, %407 : vector<8x8xi1>, vector<8x8xf32>
    %cst_270 = arith.constant dense<0xFF800000> : vector<8xf32>
    %409 = vector.multi_reduction <maximumf>, %408, %cst_270 [1] : vector<8x8xf32> to vector<8xf32>
    %410 = vector.shape_cast %409 : vector<8xf32> to vector<8x1xf32>
    %411 = vector.broadcast %410 : vector<8x1xf32> to vector<8x8xf32>
    %412 = arith.subf %408, %411 : vector<8x8xf32>
    %413 = math.exp %412 : vector<8x8xf32>
    %cst_271 = arith.constant dense<0.000000e+00> : vector<8xf32>
    %414 = vector.multi_reduction <add>, %413, %cst_271 [1] : vector<8x8xf32> to vector<8xf32>
    %415 = vector.shape_cast %414 : vector<8xf32> to vector<8x1xf32>
    %416 = tpu.reciprocal %415 {approx = true} : vector<8x1xf32> -> vector<8x1xf32>
    %417 = vector.broadcast %416 : vector<8x1xf32> to vector<8x8xf32>
    %418 = arith.mulf %413, %417 : vector<8x8xf32>
    %419 = arith.truncf %418 : vector<8x8xf32> to vector<8x8xbf16>
    %420 = arith.truncf %399 : vector<8x8xf32> to vector<8x8xbf16>
    %cst_272 = arith.constant dense<0.000000e+00> : vector<8x8xf32>
    %421 = tpu.matmul %419, %420, %cst_272 {dimension_numbers = #tpu.dot_dimension_numbers<[1], [0], [0], [1], [0, 0, 1, 1], [], []>} : vector<8x8xbf16>, vector<8x8xbf16>, vector<8x8xf32> -> vector<8x8xf32>
    %422 = arith.truncf %421 : vector<8x8xf32> to vector<8x8xbf16>
    %c3_273 = arith.constant 3 : index
    %c0_274 = arith.constant 0 : index
    %c0_275 = arith.constant 0 : index
    %423 = vector.load %arg21[%c3_273, %c0_274, %c0_275] : memref<4x8x32xbf16, #tpu.memory_space<vmem>>, vector<1x8x32xbf16>
    %424 = vector.shape_cast %423 : vector<1x8x32xbf16> to vector<8x32xbf16>
    %cst_276 = arith.constant dense<0.000000e+00> : vector<8x32xf32>
    %425 = tpu.matmul %422, %424, %cst_276 {dimension_numbers = #tpu.dot_dimension_numbers<[1], [0], [0], [1], [0, 0, 1, 1], [], []>} : vector<8x8xbf16>, vector<8x32xbf16>, vector<8x32xf32> -> vector<8x32xf32>
    %426 = arith.addf %378, %425 : vector<8x32xf32>
    %c0_277 = arith.constant 0 : index
    %c0_278 = arith.constant 0 : index
    %427 = vector.load %arg22[%c0_277, %c0_278] : memref<1x32xf32, #tpu.memory_space<vmem>>, vector<1x32xf32>
    %428 = vector.broadcast %427 : vector<1x32xf32> to vector<8x32xf32>
    %429 = arith.addf %426, %428 : vector<8x32xf32>
    %c0_279 = arith.constant 0 : index
    %c0_280 = arith.constant 0 : index
    %430 = vector.load %arg23[%c0_279, %c0_280] : memref<1x32xf32, #tpu.memory_space<vmem>>, vector<1x32xf32>
    %c0_281 = arith.constant 0 : index
    %c0_282 = arith.constant 0 : index
    %431 = vector.load %arg24[%c0_281, %c0_282] : memref<1x32xf32, #tpu.memory_space<vmem>>, vector<1x32xf32>
    %432 = arith.addf %429, %227 : vector<8x32xf32>
    %cst_283 = arith.constant dense<0.000000e+00> : vector<8xf32>
    %433 = vector.multi_reduction <add>, %432, %cst_283 [1] : vector<8x32xf32> to vector<8xf32>
    %434 = vector.shape_cast %433 : vector<8xf32> to vector<8x1xf32>
    %cst_284 = arith.constant 3.200000e+01 : f32
    %435 = vector.broadcast %cst_284 : f32 to vector<8x1xf32>
    %436 = arith.divf %434, %435 : vector<8x1xf32>
    %437 = vector.broadcast %436 : vector<8x1xf32> to vector<8x32xf32>
    %438 = arith.subf %432, %437 : vector<8x32xf32>
    %439 = arith.mulf %438, %438 : vector<8x32xf32>
    %cst_285 = arith.constant dense<0.000000e+00> : vector<8xf32>
    %440 = vector.multi_reduction <add>, %439, %cst_285 [1] : vector<8x32xf32> to vector<8xf32>
    %441 = vector.shape_cast %440 : vector<8xf32> to vector<8x1xf32>
    %cst_286 = arith.constant 3.200000e+01 : f32
    %442 = vector.broadcast %cst_286 : f32 to vector<8x1xf32>
    %443 = arith.divf %441, %442 : vector<8x1xf32>
    %cst_287 = arith.constant 1.000000e-10 : f32
    %444 = vector.broadcast %cst_287 : f32 to vector<8x1xf32>
    %445 = arith.maximumf %443, %444 : vector<8x1xf32>
    %446 = vector.broadcast %436 : vector<8x1xf32> to vector<8x32xf32>
    %447 = arith.subf %432, %446 : vector<8x32xf32>
    %cst_288 = arith.constant 1.000000e-10 : f32
    %448 = vector.broadcast %cst_288 : f32 to vector<8x1xf32>
    %449 = arith.addf %445, %448 : vector<8x1xf32>
    %450 = math.rsqrt %449 : vector<8x1xf32>
    %451 = vector.broadcast %450 : vector<8x1xf32> to vector<8x32xf32>
    %452 = arith.mulf %447, %451 : vector<8x32xf32>
    %453 = vector.broadcast %430 : vector<1x32xf32> to vector<8x32xf32>
    %454 = arith.mulf %453, %452 : vector<8x32xf32>
    %455 = vector.broadcast %431 : vector<1x32xf32> to vector<8x32xf32>
    %456 = arith.addf %454, %455 : vector<8x32xf32>
    %457 = arith.truncf %456 : vector<8x32xf32> to vector<8x32xbf16>
    %c0_289 = arith.constant 0 : index
    %c0_290 = arith.constant 0 : index
    %458 = vector.load %arg25[%c0_289, %c0_290] : memref<32x64xbf16, #tpu.memory_space<vmem>>, vector<32x64xbf16>
    %cst_291 = arith.constant dense<0.000000e+00> : vector<8x64xf32>
    %459 = tpu.matmul %457, %458, %cst_291 {dimension_numbers = #tpu.dot_dimension_numbers<[1], [0], [0], [1], [0, 0, 1, 1], [], []>} : vector<8x32xbf16>, vector<32x64xbf16>, vector<8x64xf32> -> vector<8x64xf32>
    %c0_292 = arith.constant 0 : index
    %c0_293 = arith.constant 0 : index
    %460 = vector.load %arg26[%c0_292, %c0_293] : memref<1x64xf32, #tpu.memory_space<vmem>>, vector<1x64xf32>
    %461 = vector.broadcast %460 : vector<1x64xf32> to vector<8x64xf32>
    %462 = arith.addf %459, %461 : vector<8x64xf32>
    %cst_294 = arith.constant 0.000000e+00 : f32
    %463 = vector.broadcast %cst_294 : f32 to vector<8x64xf32>
    %464 = arith.maximumf %462, %463 : vector<8x64xf32>
    %465 = arith.truncf %464 : vector<8x64xf32> to vector<8x64xbf16>
    %c0_295 = arith.constant 0 : index
    %c0_296 = arith.constant 0 : index
    %466 = vector.load %arg27[%c0_295, %c0_296] : memref<64x32xbf16, #tpu.memory_space<vmem>>, vector<64x32xbf16>
    %cst_297 = arith.constant dense<0.000000e+00> : vector<8x32xf32>
    %467 = tpu.matmul %465, %466, %cst_297 {dimension_numbers = #tpu.dot_dimension_numbers<[1], [0], [0], [1], [0, 0, 1, 1], [], []>} : vector<8x64xbf16>, vector<64x32xbf16>, vector<8x32xf32> -> vector<8x32xf32>
    %c0_298 = arith.constant 0 : index
    %c0_299 = arith.constant 0 : index
    %468 = vector.load %arg28[%c0_298, %c0_299] : memref<1x32xf32, #tpu.memory_space<vmem>>, vector<1x32xf32>
    %469 = vector.broadcast %468 : vector<1x32xf32> to vector<8x32xf32>
    %470 = arith.addf %467, %469 : vector<8x32xf32>
    %c0_300 = arith.constant 0 : index
    %c0_301 = arith.constant 0 : index
    %471 = vector.load %arg29[%c0_300, %c0_301] : memref<1x32xf32, #tpu.memory_space<vmem>>, vector<1x32xf32>
    %c0_302 = arith.constant 0 : index
    %c0_303 = arith.constant 0 : index
    %472 = vector.load %arg30[%c0_302, %c0_303] : memref<1x32xf32, #tpu.memory_space<vmem>>, vector<1x32xf32>
    %473 = arith.addf %470, %456 : vector<8x32xf32>
    %cst_304 = arith.constant dense<0.000000e+00> : vector<8xf32>
    %474 = vector.multi_reduction <add>, %473, %cst_304 [1] : vector<8x32xf32> to vector<8xf32>
    %475 = vector.shape_cast %474 : vector<8xf32> to vector<8x1xf32>
    %cst_305 = arith.constant 3.200000e+01 : f32
    %476 = vector.broadcast %cst_305 : f32 to vector<8x1xf32>
    %477 = arith.divf %475, %476 : vector<8x1xf32>
    %478 = vector.broadcast %477 : vector<8x1xf32> to vector<8x32xf32>
    %479 = arith.subf %473, %478 : vector<8x32xf32>
    %480 = arith.mulf %479, %479 : vector<8x32xf32>
    %cst_306 = arith.constant dense<0.000000e+00> : vector<8xf32>
    %481 = vector.multi_reduction <add>, %480, %cst_306 [1] : vector<8x32xf32> to vector<8xf32>
    %482 = vector.shape_cast %481 : vector<8xf32> to vector<8x1xf32>
    %cst_307 = arith.constant 3.200000e+01 : f32
    %483 = vector.broadcast %cst_307 : f32 to vector<8x1xf32>
    %484 = arith.divf %482, %483 : vector<8x1xf32>
    %cst_308 = arith.constant 1.000000e-10 : f32
    %485 = vector.broadcast %cst_308 : f32 to vector<8x1xf32>
    %486 = arith.maximumf %484, %485 : vector<8x1xf32>
    %487 = vector.broadcast %477 : vector<8x1xf32> to vector<8x32xf32>
    %488 = arith.subf %473, %487 : vector<8x32xf32>
    %cst_309 = arith.constant 1.000000e-10 : f32
    %489 = vector.broadcast %cst_309 : f32 to vector<8x1xf32>
    %490 = arith.addf %486, %489 : vector<8x1xf32>
    %491 = math.rsqrt %490 : vector<8x1xf32>
    %492 = vector.broadcast %491 : vector<8x1xf32> to vector<8x32xf32>
    %493 = arith.mulf %488, %492 : vector<8x32xf32>
    %494 = vector.broadcast %471 : vector<1x32xf32> to vector<8x32xf32>
    %495 = arith.mulf %494, %493 : vector<8x32xf32>
    %496 = vector.broadcast %472 : vector<1x32xf32> to vector<8x32xf32>
    %497 = arith.addf %495, %496 : vector<8x32xf32>
    %c0_310 = arith.constant 0 : index
    %c0_311 = arith.constant 0 : index
    %c0_312 = arith.constant 0 : index
    %498 = vector.load %arg31[%c0_310, %c0_311, %c0_312] : memref<1x8x32xf32, #tpu.memory_space<vmem>>, vector<1x8x32xf32>
    %499 = vector.shape_cast %498 : vector<1x8x32xf32> to vector<8x32xf32>
    %500 = vector.shape_cast %497 : vector<8x32xf32> to vector<1x8x32xf32>
    tpu.vector_store %arg31[%c0_310, %c0_311, %c0_312], %500 {strides = array<i32>} : memref<1x8x32xf32, #tpu.memory_space<vmem>>, vector<1x8x32xf32>,
    return
  }
  func.func @transform_0(%arg0: i32) -> (i32, i32, i32) {
    %c0_i32 = arith.constant 0 : i32
    %c0_i32_0 = arith.constant 0 : i32
    %c0_i32_1 = arith.constant 0 : i32
    return %arg0, %c0_i32, %c0_i32_0 : i32, i32, i32
  }
  func.func @transform_1(%arg0: i32) -> (i32, i32, i32) {
    %c0_i32 = arith.constant 0 : i32
    %c0_i32_0 = arith.constant 0 : i32
    %c0_i32_1 = arith.constant 0 : i32
    return %arg0, %c0_i32, %c0_i32_0 : i32, i32, i32
  }
  func.func @transform_2(%arg0: i32) -> (i32, i32, i32) {
    %c0_i32 = arith.constant 0 : i32
    %c0_i32_0 = arith.constant 0 : i32
    %c0_i32_1 = arith.constant 0 : i32
    return %arg0, %c0_i32, %c0_i32_0 : i32, i32, i32
  }
  func.func @transform_3(%arg0: i32) -> (i32, i32, i32) {
    %c0_i32 = arith.constant 0 : i32
    %c0_i32_0 = arith.constant 0 : i32
    %c0_i32_1 = arith.constant 0 : i32
    return %arg0, %c0_i32, %c0_i32_0 : i32, i32, i32
  }
  func.func @transform_4(%arg0: i32) -> (i32, i32, i32) {
    %c0_i32 = arith.constant 0 : i32
    %c0_i32_0 = arith.constant 0 : i32
    %c0_i32_1 = arith.constant 0 : i32
    %c0_i32_2 = arith.constant 0 : i32
    return %c0_i32, %c0_i32_0, %c0_i32_1 : i32, i32, i32
  }
  func.func @transform_5(%arg0: i32) -> (i32, i32, i32) {
    %c0_i32 = arith.constant 0 : i32
    %c0_i32_0 = arith.constant 0 : i32
    %c0_i32_1 = arith.constant 0 : i32
    %c0_i32_2 = arith.constant 0 : i32
    return %c0_i32, %c0_i32_0, %c0_i32_1 : i32, i32, i32
  }
  func.func @transform_6(%arg0: i32) -> (i32, i32, i32) {
    %c0_i32 = arith.constant 0 : i32
    %c0_i32_0 = arith.constant 0 : i32
    %c0_i32_1 = arith.constant 0 : i32
    %c0_i32_2 = arith.constant 0 : i32
    return %c0_i32, %c0_i32_0, %c0_i32_1 : i32, i32, i32
  }
  func.func @transform_7(%arg0: i32) -> (i32, i32, i32) {
    %c0_i32 = arith.constant 0 : i32
    %c0_i32_0 = arith.constant 0 : i32
    %c0_i32_1 = arith.constant 0 : i32
    %c0_i32_2 = arith.constant 0 : i32
    return %c0_i32, %c0_i32_0, %c0_i32_1 : i32, i32, i32
  }
  func.func @transform_8(%arg0: i32) -> (i32, i32, i32) {
    %c0_i32 = arith.constant 0 : i32
    %c0_i32_0 = arith.constant 0 : i32
    %c0_i32_1 = arith.constant 0 : i32
    %c0_i32_2 = arith.constant 0 : i32
    return %c0_i32, %c0_i32_0, %c0_i32_1 : i32, i32, i32
  }
  func.func @transform_9(%arg0: i32) -> (i32, i32, i32) {
    %c0_i32 = arith.constant 0 : i32
    %c0_i32_0 = arith.constant 0 : i32
    %c0_i32_1 = arith.constant 0 : i32
    %c0_i32_2 = arith.constant 0 : i32
    return %c0_i32, %c0_i32_0, %c0_i32_1 : i32, i32, i32
  }
  func.func @transform_10(%arg0: i32) -> (i32, i32, i32) {
    %c0_i32 = arith.constant 0 : i32
    %c0_i32_0 = arith.constant 0 : i32
    %c0_i32_1 = arith.constant 0 : i32
    %c0_i32_2 = arith.constant 0 : i32
    return %c0_i32, %c0_i32_0, %c0_i32_1 : i32, i32, i32
  }
  func.func @transform_11(%arg0: i32) -> (i32, i32) {
    %c0_i32 = arith.constant 0 : i32
    %c0_i32_0 = arith.constant 0 : i32
    %c0_i32_1 = arith.constant 0 : i32
    return %c0_i32, %c0_i32_0 : i32, i32
  }
  func.func @transform_12(%arg0: i32) -> (i32, i32) {
    %c0_i32 = arith.constant 0 : i32
    %c0_i32_0 = arith.constant 0 : i32
    %c0_i32_1 = arith.constant 0 : i32
    return %c0_i32, %c0_i32_0 : i32, i32
  }
  func.func @transform_13(%arg0: i32) -> (i32, i32) {
    %c0_i32 = arith.constant 0 : i32
    %c0_i32_0 = arith.constant 0 : i32
    %c0_i32_1 = arith.constant 0 : i32
    return %c0_i32, %c0_i32_0 : i32, i32
  }
  func.func @transform_14(%arg0: i32) -> (i32, i32, i32) {
    %c0_i32 = arith.constant 0 : i32
    %c0_i32_0 = arith.constant 0 : i32
    %c0_i32_1 = arith.constant 0 : i32
    %c0_i32_2 = arith.constant 0 : i32
    return %c0_i32, %c0_i32_0, %c0_i32_1 : i32, i32, i32
  }
  func.func @transform_15(%arg0: i32) -> (i32, i32, i32) {
    %c0_i32 = arith.constant 0 : i32
    %c0_i32_0 = arith.constant 0 : i32
    %c0_i32_1 = arith.constant 0 : i32
    %c0_i32_2 = arith.constant 0 : i32
    return %c0_i32, %c0_i32_0, %c0_i32_1 : i32, i32, i32
  }
  func.func @transform_16(%arg0: i32) -> (i32, i32, i32) {
    %c0_i32 = arith.constant 0 : i32
    %c0_i32_0 = arith.constant 0 : i32
    %c0_i32_1 = arith.constant 0 : i32
    %c0_i32_2 = arith.constant 0 : i32
    return %c0_i32, %c0_i32_0, %c0_i32_1 : i32, i32, i32
  }
  func.func @transform_17(%arg0: i32) -> (i32, i32, i32) {
    %c0_i32 = arith.constant 0 : i32
    %c0_i32_0 = arith.constant 0 : i32
    %c0_i32_1 = arith.constant 0 : i32
    %c0_i32_2 = arith.constant 0 : i32
    return %c0_i32, %c0_i32_0, %c0_i32_1 : i32, i32, i32
  }
  func.func @transform_18(%arg0: i32) -> (i32, i32, i32) {
    %c0_i32 = arith.constant 0 : i32
    %c0_i32_0 = arith.constant 0 : i32
    %c0_i32_1 = arith.constant 0 : i32
    %c0_i32_2 = arith.constant 0 : i32
    return %c0_i32, %c0_i32_0, %c0_i32_1 : i32, i32, i32
  }
  func.func @transform_19(%arg0: i32) -> (i32, i32, i32) {
    %c0_i32 = arith.constant 0 : i32
    %c0_i32_0 = arith.constant 0 : i32
    %c0_i32_1 = arith.constant 0 : i32
    %c0_i32_2 = arith.constant 0 : i32
    return %c0_i32, %c0_i32_0, %c0_i32_1 : i32, i32, i32
  }
  func.func @transform_20(%arg0: i32) -> (i32, i32, i32) {
    %c0_i32 = arith.constant 0 : i32
    %c0_i32_0 = arith.constant 0 : i32
    %c0_i32_1 = arith.constant 0 : i32
    %c0_i32_2 = arith.constant 0 : i32
    return %c0_i32, %c0_i32_0, %c0_i32_1 : i32, i32, i32
  }
  func.func @transform_21(%arg0: i32) -> (i32, i32) {
    %c0_i32 = arith.constant 0 : i32
    %c0_i32_0 = arith.constant 0 : i32
    %c0_i32_1 = arith.constant 0 : i32
    return %c0_i32, %c0_i32_0 : i32, i32
  }
  func.func @transform_22(%arg0: i32) -> (i32, i32) {
    %c0_i32 = arith.constant 0 : i32
    %c0_i32_0 = arith.constant 0 : i32
    %c0_i32_1 = arith.constant 0 : i32
    return %c0_i32, %c0_i32_0 : i32, i32
  }
  func.func @transform_23(%arg0: i32) -> (i32, i32) {
    %c0_i32 = arith.constant 0 : i32
    %c0_i32_0 = arith.constant 0 : i32
    %c0_i32_1 = arith.constant 0 : i32
    return %c0_i32, %c0_i32_0 : i32, i32
  }
  func.func @transform_24(%arg0: i32) -> (i32, i32) {
    %c0_i32 = arith.constant 0 : i32
    %c0_i32_0 = arith.constant 0 : i32
    %c0_i32_1 = arith.constant 0 : i32
    return %c0_i32, %c0_i32_0 : i32, i32
  }
  func.func @transform_25(%arg0: i32) -> (i32, i32) {
    %c0_i32 = arith.constant 0 : i32
    %c0_i32_0 = arith.constant 0 : i32
    %c0_i32_1 = arith.constant 0 : i32
    return %c0_i32, %c0_i32_0 : i32, i32
  }
  func.func @transform_26(%arg0: i32) -> (i32, i32) {
    %c0_i32 = arith.constant 0 : i32
    %c0_i32_0 = arith.constant 0 : i32
    %c0_i32_1 = arith.constant 0 : i32
    return %c0_i32, %c0_i32_0 : i32, i32
  }
  func.func @transform_27(%arg0: i32) -> (i32, i32) {
    %c0_i32 = arith.constant 0 : i32
    %c0_i32_0 = arith.constant 0 : i32
    %c0_i32_1 = arith.constant 0 : i32
    return %c0_i32, %c0_i32_0 : i32, i32
  }
  func.func @transform_28(%arg0: i32) -> (i32, i32) {
    %c0_i32 = arith.constant 0 : i32
    %c0_i32_0 = arith.constant 0 : i32
    %c0_i32_1 = arith.constant 0 : i32
    return %c0_i32, %c0_i32_0 : i32, i32
  }
  func.func @transform_29(%arg0: i32) -> (i32, i32) {
    %c0_i32 = arith.constant 0 : i32
    %c0_i32_0 = arith.constant 0 : i32
    %c0_i32_1 = arith.constant 0 : i32
    return %c0_i32, %c0_i32_0 : i32, i32
  }
  func.func @transform_30(%arg0: i32) -> (i32, i32, i32) {
    %c0_i32 = arith.constant 0 : i32
    %c0_i32_0 = arith.constant 0 : i32
    %c0_i32_1 = arith.constant 0 : i32
    return %arg0, %c0_i32, %c0_i32_0 : i32, i32, i32
  }
}

</mosaic_0001>

<bundles_post_ra>
// kernel: tpu_custom_call.1
= control target key start
LH: loop header
LB: loop body
LE: loop exit
PB: predicated region body
PF: predicated region fallthrough
CT: control target
= control target key end

     0   :  { %s5173_s6 = smov 1   ;;  %s5174_s10 = smov 2   ;;  %s5919_s0 = inlined_call_operand.smem [shape: u32[31], index: -1, kind: input, shape index: {}] }
   0x1   :  { %s5214_s5 = sld [smem:[%s5919_s0]]   ;;  %s5175_s14 = smov 3  }
   0x2   :  { %s5219_s9 = sld [smem:[%s5919_s0 + %s5173_s6]]   ;;  %s5176_s18 = smov 4  }
   0x3   :  { %s5224_s13 = sld [smem:[%s5919_s0 + %s5174_s10]]   ;;  %s5177_s22 = smov 5  }
   0x4   :  { %s5229_s17 = sld [smem:[%s5919_s0 + %s5175_s14]]   ;;  %s5178_s26 = smov 6  }
   0x5   :  { %s5234_s21 = sld [smem:[%s5919_s0 + %s5176_s18]]   ;;  %s5179_s30 = smov 7  }
   0x6   :  { %s5239_s25 = sld [smem:[%s5919_s0 + %s5177_s22]]   ;;  %s5180_s4 = smov 8  }
   0x7   :  { %5935 = sst [smem:[#allocation5_spill]] %s5214_s5  ;;  %s5181_s10 = smov 9  }
   0x8   :  { %5936 = sst [smem:[#allocation6_spill]] %s5219_s9  ;;  %s5182_s15 = smov 10  }
   0x9   :  { %5937 = sst [smem:[#allocation7_spill]] %s5224_s13  ;;  %s5183_s20 = smov 11  }
   0xa   :  { %5938 = sst [smem:[#allocation8_spill]] %s5229_s17  ;;  %s5185_s1 = smov 13  }
   0xb   :  { %s5244_s29 = sld [smem:[%s5919_s0 + %s5178_s26]]   ;;  %s5184_s26 = smov 12  }
   0xc   :  { %s5249_s3 = sld [smem:[%s5919_s0 + %s5179_s30]]   ;;  %s5186_s7 = smov 14  }
   0xd   :  { %s5254_s8 = sld [smem:[%s5919_s0 + %s5180_s4]]   ;;  %s5188_s22 = smov 16  }
   0xe   :  { %s5259_s14 = sld [smem:[%s5919_s0 + %s5181_s10]]   ;;  %s5189_s28 = smov 17  }
   0xf   :  { %s5264_s19 = sld [smem:[%s5919_s0 + %s5182_s15]]   ;;  %s5187_s15 = smov 15  }
  0x10   :  { %s5269_s24 = sld [smem:[%s5919_s0 + %s5183_s20]]  }
  0x11   :  { %s5274_s30 = sld [smem:[%s5919_s0 + %s5184_s26]]  }
  0x12   :  { %5939 = sst [smem:[#allocation9_spill]] %s5249_s3 }
  0x13   :  { %5940 = sst [smem:[#allocation10_spill]] %s5254_s8 }
  0x14   :  { %s5279_s6 = sld [smem:[%s5919_s0 + %s5185_s1]]  }
  0x15   :  { %s5284_s12 = sld [smem:[%s5919_s0 + %s5186_s7]]   ;;  %s5190_s7 = smov 18  }
  0x16   :  { %s5289_s20 = sld [smem:[%s5919_s0 + %s5187_s15]]   ;;  %s5191_s15 = smov 19  }
  0x17   :  { %s5294_s27 = sld [smem:[%s5919_s0 + %s5188_s22]]   ;;  %s5192_s22 = smov 20  }
  0x18   :  { %s5299_s4 = sld [smem:[%s5919_s0 + %s5189_s28]]   ;;  %s5193_s28 = smov 21  }
  0x19   :  { %s5304_s17 = sld [smem:[%s5919_s0 + %s5190_s7]]   ;;  %s5194_s7 = smov 22  }
  0x1a   :  { %5941 = sst [smem:[#allocation11_spill]] %s5279_s6 }
  0x1b   :  { %5942 = sst [smem:[#allocation12_spill]] %s5284_s12 }
  0x1c   :  { %5943 = sst [smem:[#allocation13_spill]] %s5289_s20 }
  0x1d   :  { %s5309_s20 = sld [smem:[%s5919_s0 + %s5191_s15]]   ;;  %s5195_s15 = smov 23  }
  0x1e   :  { %5944 = sst [smem:[#allocation14_spill]] %s5299_s4 }
  0x1f   :  { %5945 = sst [smem:[#allocation15_spill]] %s5304_s17 }
  0x20   :  { %s5314_s6 = sld [smem:[%s5919_s0 + %s5192_s22]]   ;;  %s5196_s22 = smov 24  }
  0x21   :  { %s5319_s4 = sld [smem:[%s5919_s0 + %s5193_s28]]   ;;  %s5197_s28 = smov 25  }
  0x22   :  { %s5324_s17 = sld [smem:[%s5919_s0 + %s5194_s7]]   ;;  %s5198_s7 = smov 26  }
  0x23   :  { %5946 = sst [smem:[#allocation16_spill]] %s5309_s20 }
  0x24   :  { %s5329_s20 = sld [smem:[%s5919_s0 + %s5195_s15]]   ;;  %s5199_s15 = smov 27  }
  0x26   :  { %5947 = sst [smem:[#allocation17_spill]] %s5314_s6 }
  0x27   :  { %5948 = sst [smem:[#allocation18_spill]] %s5319_s4 }
  0x28   :  { %5949 = sst [smem:[#allocation19_spill]] %s5324_s17 }
  0x29   :  { %s5334_s6 = sld [smem:[%s5919_s0 + %s5196_s22]]   ;;  %s5200_s22 = smov 28  }
  0x2a   :  { %5950 = sst [smem:[#allocation20_spill]] %s5329_s20 }
  0x2b   :  { %s5339_s4 = sld [smem:[%s5919_s0 + %s5197_s28]]   ;;  %s5201_s28 = smov 29  }
  0x2c   :  { %s5344_s17 = sld [smem:[%s5919_s0 + %s5198_s7]]   ;;  %s5202_s7 = smov 30  }
  0x2d   :  { %s5349_s20 = sld [smem:[%s5919_s0 + %s5199_s15]]  }
  0x2f   :  { %5951 = sst [smem:[#allocation21_spill]] %s5334_s6 }
  0x30   :  { %s5354_s6 = sld [smem:[%s5919_s0 + %s5200_s22]]  }
  0x31   :  { %5952 = sst [smem:[#allocation22_spill]] %s5339_s4 }
  0x32   :  { %5953 = sst [smem:[#allocation23_spill]] %s5344_s17 }
  0x33   :  { %s5359_s4 = sld [smem:[%s5919_s0 + %s5201_s28]]  }
  0x34   :  { %s5364_s17 = sld [smem:[%s5919_s0 + %s5202_s7]]  }
  0x39   :  { %5954 = sst [smem:[#allocation24_spill]] %s5359_s4 }
  0x3a   :  { %66 = vsyncpa [#allocation3], 0 }
  0x3b   :  { %68 = vsyncpa [#allocation3 + $0x1], 0  ;;  %s5366_s15 = smov 0   ;;  %s5368_s16 = smov 0  }
  0x3c   :  { %s5370_s18 = smov 0   ;;  %s5372_s22 = smov 0  }
  0x3d LB: > { %s5955_s12 = sld [smem:[#allocation12_spill]]  ;;  %s5956_s8 = sld [smem:[#allocation10_spill]]  ;;  %s5167_s18 = sphi %s5370_s18, %s5979_s18   ;;  %s5163_s16 = sphi %s5368_s16, %s5978_s16   ;;  %s5159_s15 = sphi %s5366_s15, %s5977_s15   ;;  %s5171_s22 = sphi %s5372_s22, %s5980_s22  }
  0x3e   : > { %s5957_s3 = sld [smem:[#allocation9_spill]]  ;;  %s5387_s0 = sadd.s32 4294967295, %s5171_s22  }
  0x3f   : > { %s4215_s23 = sadd.s32 4294967294, %s5171_s22   ;;  %s5391_s26 = sadd.s32 1, %s5171_s22  }
  0x40   : > { %s731_s28 = sadd.s32 1, %s5167_s18  ;;  %s728_s1 = ssub.s32 %s5171_s22, %s5391_s26 }
  0x41   : > { %p741_p0 = scmp.ne.s32.totalorder %s5167_s18, %s5163_s16  ;;  %p729_p1 = scmp.eq.s32.totalorder %s728_s1, 0 }
  0x42   : > { %p742_p2 = scmp.eq.s32.totalorder %s5387_s0, 1  ;;  %p747_p3 = scmp.ne.s32.totalorder %s5163_s16, %s5159_s15 }
  0x43   : > { %p748_p4 = scmp.eq.s32.totalorder %s4215_s23, 1  ;;  %p4218_p7 = scmp.ge.s32.totalorder %s5171_s22, 1 }
  0x44   : > { %s5402_s2 = scalar_select %p729_p1, %s5167_s18, %s731_s28  }
  0x45   : > { %p5404_p5 = por %p742_p2, %p741_p0  ;;  %p5408_p6 = por %p748_p4, %p747_p3 }
  0x46   : > { %p872_p8 = scmp.lt.s32.totalorder %s5171_s22, 3 }
  0x48   : > { %p873_p9 = pnand %p4218_p7, %p872_p8 }
  0x49   : > { %v5017_v0 = vld [vmem:[%s5244_s29] sm:$0xff] (!%p873_p9)   ;;  %v5203_v1 = vmov (!%p873_p9), 0.0   ;;  %s5960_s5 = sld [smem:[#allocation5_spill]] (!%p873_p9)  ;;  %v5018_v2 = vld [vmem:[%s5244_s29 + $0x8] sm:$0xff] (!%p873_p9)   ;;  %vm5204_vm0 = vmmov (!%p873_p9), 0   ;;  %p961_p10 = scmp.lt.s32.totalorder (!%p873_p9), %s5387_s0, 1 }
  0x4a   : > { %876 = sbr.rel (%p873_p9) target bundleno = 9269 (0x2435), region = 140  ;;  %4598 = vmatprep.subr.bf16.mxu1 (!%p873_p9), %v5203_v1  ;;  %4590 = vmatprep.subr.bf16.mxu0 (!%p873_p9), %v5203_v1  ;;  %v5019_v3 = vld [vmem:[%s5234_s21] sm:$0xff] (!%p873_p9)   ;;  %v5020_v4 = vld [vmem:[%s5234_s21 + $0x8] sm:$0xff] (!%p873_p9)   ;;  %vm1004_vm1 = vcmask (!%p873_p9), 261120   ;;  %vm1176_vm2 = vcmask (!%p873_p9), 64512   ;;  %s5961_s13 = sld [smem:[#allocation7_spill]] (!%p873_p9) }
  0x4b   : > { %4599 = vmatpush3.bf16.msra.mxu1 (!%p873_p9), %v5017_v0  ;;  %4602 = vmatprep.mubr.msk.bf16.mxu1 (!%p873_p9), %vm5204_vm0, %v5203_v1  ;;  %v4228_v7 = vld [vmem:[%s5957_s3] ss:$0 sm:$0xff] (!%p873_p9)  ;;  %v5022_v23 = vld [vmem:[%s5956_s8 + $0x8] sm:$0xff] (!%p873_p9)   ;;  %vm1242_vm4 = vcmask (!%p873_p9), 1043456   ;;  %v5025_v45 = vld [vmem:[%s5234_s21 + $0x10] sm:$0xff] (!%p873_p9)   ;;  %s5962_s9 = sld [smem:[#allocation6_spill]] (!%p873_p9) }
  0x4c   : > { %4600 = vmatprep.subr.bf16.mxu1 (!%p873_p9), %v5203_v1  ;;  %4594 = vmatprep.mubr.msk.bf16.mxu0 (!%p873_p9), %vm5204_vm0, %v5203_v1  ;;  %v4224_v14 = vld [vmem:[%s5239_s25] ss:$0 sm:$0xff] (!%p873_p9)  ;;  %v5026_v46 = vld [vmem:[%s5234_s21 + $0x18] sm:$0xff] (!%p873_p9)   ;;  %v5023_v50 = vld [vmem:[%s5244_s29 + $0x10] sm:$0xff] (!%p873_p9)   ;;  %vm4000_vm6 = vcmask (!%p873_p9), 523264   ;;  %s5976_s4 = sld [smem:[#allocation24_spill]] (!%p873_p9) }
  0x4d   : > { %4591 = vmatpush3.bf16.msra.mxu0 (!%p873_p9), %v5019_v3  ;;  %v5021_v22 = vld [vmem:[%s5956_s8] sm:$0xff] (!%p873_p9)   ;;  %v5024_v52 = vld [vmem:[%s5244_s29 + $0x18] sm:$0xff] (!%p873_p9)  }
  0x4e   : > { %4592 = vmatprep.subr.bf16.mxu0 (!%p873_p9), %v5203_v1  ;;  %v4232_v40 = vld [vmem:[%s5259_s14] ss:$0 sm:$0xff] (!%p873_p9)  ;;  %v4252_v61 = vld [vmem:[%s5957_s3 + $0x1] ss:$0 sm:$0xff] (!%p873_p9) }
  0x4f   : > { %4601 = vmatpush3.bf16.msra.mxu1 (!%p873_p9), %v5018_v2  ;;  %v4243_v3 = vld [vmem:[%s5239_s25 + $0x1] ss:$0 sm:$0xff] (!%p873_p9) }
  0x50   : > { %4614 = vmatprep.subr.bf16.mxu1 (!%p873_p9), %v5203_v1 }
  0x51   : > { %s962_s11 = scalar_select %p961_p10, %s5387_s0, 1  ;;  %4593 = vmatpush3.bf16.msra.mxu0 %v5020_v4 }
  0x52   : > { %4606 = vmatprep.subr.bf16.mxu0 %v5203_v1 }
  0x53   : > { %s5428_s23 = sshll.u32 %s962_s11, 3 }
  0x54   : > { %s964_s28 = scalar_lea.vmem %s5960_s5, %s5428_s23  ;;  %s972_s1 = scalar_lea.vmem %s5961_s13, %s5428_s23 }
  0x55   : > { %v5433_v5 = vld [vmem:[%s964_s28] sm:$0xff]  ;;  %s968_s11 = scalar_lea.vmem %s5962_s9, %s5428_s23  ;;  %s5963_s28 = sld [smem:[#allocation11_spill]] }
  0x56   : > { %v5437_v6 = vpack.c.bf16 %v5433_v5, %v5433_v5  ;;  %v5465_v24 = vld [vmem:[%s972_s1] sm:$0xff]  ;;  %s5964_s1 = sld [smem:[#allocation14_spill]] }
  0x57   : > { %vm1224_vm3 = vcmp.gt.f32.partialorder %v5465_v24, 0.0 }
  0x58   : > { %4603 = vmatmul.mubr.msk.bf16.vlgmr.msra.gmra.mrb[0].mxu1 %vm1004_vm1, %v5437_v6  ;;  %4595 = vmatmul.mubr.msk.bf16.vlgmr.msra.gmra.mrb[0].mxu0 %vm1004_vm1, %v5437_v6 }
  0x59   : > { %4616 = vmatprep.mubr.msk.bf16.mxu1 %vm5204_vm0, %v5203_v1  ;;  %4610 = vmatprep.mubr.msk.bf16.mxu0 %vm5204_vm0, %v5203_v1 }
  0x5a   : > { %4607 = vmatpush3.bf16.msra.mxu0 %v5021_v22 }
  0x5b   : > { %4608 = vmatprep.subr.bf16.mxu0 %v5203_v1 }
  0x5e   : > { %4609 = vmatpush3.bf16.msra.mxu0 %v5022_v23 }
  0x5f   : > { %4620 = vmatprep.subr.bf16.mxu0 %v5203_v1 }
  0x61   : > { %4611 = vmatmul.mubr.msk.bf16.vlgmr.msra.gmra.mrb[4].mxu0 %vm1004_vm1, %v5437_v6 }
  0x62   : > { %4622 = vmatprep.mubr.msk.bf16.mxu0 %vm5204_vm0, %v5203_v1 }
 0x12b   : > { %v1105_v8 = vpop.f32.mrb[0].mxu1  ;;  %v1042_v9 = vpop.f32.mrb[0].mxu0 }
 0x12c   : > { %v1106_v10 = vadd.f32 %v4228_v7, %v1105_v8  ;;  %v4604_v11 = vpop.f32.mrb[1].mxu1  ;;  %v4596_v12 = vpop.f32.mrb[1].mxu0  ;;  %v1043_v20 = vadd.f32 %v4224_v14, %v1042_v9 }
 0x12d   : > { %v1108_v13 = vpop.f32.mrb[2].mxu1  ;;  %v1045_v15 = vpop.f32.mrb[2].mxu0  ;;  %v5027_v11 = vld [vmem:[%s5956_s8 + $0x10] sm:$0xff]   ;;  %v5028_v12 = vld [vmem:[%s5956_s8 + $0x18] sm:$0xff]  }
 0x12e   : > { %v1175_v16 = vpack.c.bf16 %v1106_v10, %v1106_v10  ;;  %v4605_v17 = vpop.f32.mrb[3].mxu1  ;;  %v4597_v18 = vpop.f32.mrb[3].mxu0  ;;  %v1174_v21 = vpack.c.bf16 %v1043_v20, %v1043_v20  ;;  %v4261_v20 = vld [vmem:[%s5259_s14 + $0x1] ss:$0 sm:$0xff] }
 0x130   : > { %v1181_v19 = vsel %vm1176_vm2, %v1175_v16, 0 }
 0x131   : > { %4615 = vmatpush3.bf16.xpose.msra.mxu1 %v1181_v19 }
 0x132   : > { %4626 = vmatprep.subr.bf16.mxu1 %v5203_v1 }
 0x134   : > { %v1168_v37 = vpop.f32.mrb[4].mxu0 }
 0x135   : > { %v4612_v38 = vpop.f32.mrb[5].mxu0  ;;  %v1169_v42 = vadd.f32 %v4232_v40, %v1168_v37 }
 0x136   : > { %v1171_v39 = vpop.f32.mrb[6].mxu0  ;;  %v1287_v38 = vld [vmem:[%s5264_s19] sm:$0xf] }
 0x137   : > { %v4613_v41 = vpop.f32.mrb[7].mxu0  ;;  %v1238_v43 = vpack.c.bf16 %v1169_v42, %v1169_v42  ;;  %v5029_v42 = vld [vmem:[%s5244_s29 + $0x20] sm:$0xff]  }
 0x138   : > { %4617 = vmatmul.mubr.msk.bf16.vlgmr.msra.gmra.mrb[4].mxu1 %vm1176_vm2, %v1174_v21  ;;  %v1645_v41 = vsel %vm1242_vm4, %v1287_v38, 0  ;;  %v4299_v38 = vld [vmem:[%s5264_s19 + $0x8] sm:$0xf] }
 0x139   : > { %4630 = vmatprep.mubr.msk.bf16.mxu1 %vm5204_vm0, %v5203_v1  ;;  %v1244_v44 = vsel %vm1242_vm4, %v1238_v43, 0  ;;  %4627 = vmatpush3.bf16.msra.mxu1 %v5025_v45 }
 0x13a   : > { %4621 = vmatpush3.bf16.msra.mxu0 %v1244_v44  ;;  %4628 = vmatprep.subr.bf16.mxu1 %v5203_v1  ;;  %v5030_v44 = vld [vmem:[%s5244_s29 + $0x28] sm:$0xff]  }
 0x13b   : > { %4634 = vmatprep.subr.bf16.mxu0 %v5203_v1 }
 0x13d   : > { %4629 = vmatpush3.bf16.msra.mxu1 %v5026_v46  ;;  %v5031_v46 = vld [vmem:[%s5234_s21 + $0x20] sm:$0xff]  }
 0x13e   : > { %4642 = vmatprep.subr.bf16.mxu1 %v5203_v1 }
 0x140   : > { %4631 = vmatmul.mubr.msk.bf16.vlgmr.msra.gmra.mrb[8].mxu1 %vm1004_vm1, %v5437_v6 }
 0x141   : > { %4646 = vmatprep.mubr.msk.bf16.mxu1 %vm5204_vm0, %v5203_v1  ;;  %4643 = vmatpush3.bf16.msra.mxu1 %v5027_v11 }
 0x142   : > { %4644 = vmatprep.subr.bf16.mxu1 %v5203_v1 }
 0x145   : > { %4645 = vmatpush3.bf16.msra.mxu1 %v5028_v12 }
 0x146   : > { %4656 = vmatprep.subr.bf16.mxu1 %v5203_v1 }
 0x148   : > { %4647 = vmatmul.mubr.msk.bf16.vlgmr.msra.gmra.mrb[12].mxu1 %vm1004_vm1, %v5437_v6 }
 0x149   : > { %4658 = vmatprep.mubr.msk.bf16.mxu1 %vm5204_vm0, %v5203_v1 }
 0x20b   : > { %v1217_v25 = vpop.f32.mrb[4].mxu1 }
 0x20c   : > { %v1223_v26 = vmul.f32 0.35355338, %v1217_v25  ;;  %v4618_v27 = vpop.f32.mrb[5].mxu1 }
 0x20d   : > { %v1220_v28 = vpop.f32.mrb[6].mxu1 }
 0x20e   : > { %v4619_v29 = vpop.f32.mrb[7].mxu1  ;;  %v1225_v30 = vsel %vm1224_vm3, %v1223_v26, -10000.0 }
 0x20f   : > { %v1226_v31 = vsel %vm1176_vm2, %v1225_v30, -inf }
 0x210   : > { %1227 = vmax.xlane.f32.xlu0 %v1226_v31 }
 0x213   : > { %v1347_v53 = vpop.f32.mrb[8].mxu1 }
 0x214   : > { %v4632_v54 = vpop.f32.mrb[9].mxu1  ;;  %v1348_v9 = vadd.f32 %v4243_v3, %v1347_v53 }
 0x215   : > { %v1350_v55 = vpop.f32.mrb[10].mxu1 }
 0x216   : > { %v4633_v56 = vpop.f32.mrb[11].mxu1  ;;  %v1483_v10 = vpack.c.bf16 %v1348_v9, %v1348_v9 }
 0x217   : > { %v4284_v56 = vld [vmem:[%s5957_s3 + $0x2] ss:$0 sm:$0xff] }
 0x21b   : > { %v1477_v21 = vpop.f32.mrb[12].mxu1 }
 0x21c   : > { %v1478_v22 = vadd.f32 %v4261_v20, %v1477_v21  ;;  %v4648_v23 = vpop.f32.mrb[13].mxu1 }
 0x21d   : > { %v1480_v25 = vpop.f32.mrb[14].mxu1 }
 0x21e   : > { %v1545_v26 = vpack.c.bf16 %v1478_v22, %v1478_v22  ;;  %v4649_v27 = vpop.f32.mrb[15].mxu1 }
 0x220   : > { %v1550_v28 = vsel %vm1242_vm4, %v1545_v26, 0 }
 0x221   : > { %4657 = vmatpush3.bf16.msra.mxu1 %v1550_v28 }
 0x222   : > { %4668 = vmatprep.subr.bf16.mxu1 %v5203_v1 }
 0x29d   : > { %v1228_v32 = vpop.xlane.xlu0 %1227 }
 0x29e   : > { %v1229_v33 = vsub.f32 %v1225_v30, %v1228_v32 }
 0x2a0   : > { %v1230_v34 = vmul.f32 1.442695, %v1229_v33 }
 0x2a2   : > { %5071 = vpow2.f32 %v1230_v34  ;;  %v4267_v34 = vld [vmem:[%s5264_s19 + $0x4] sm:$0xf] }
 0x2ac   : > { %v5072_v35 = vpop.eup %5071 }
 0x2ad   : > { %v1232_v36 = vsel %vm1176_vm2, %v5072_v35, 0.0 }
 0x2ae   : > { %1233 = vadd.xlane.f32.xlu0 %v1232_v36 }
 0x33b   : > { %v1234_v47 = vpop.xlane.xlu0 %1233 }
 0x33c   : > { %5073 = vrcp.f32 %v1234_v47 }
 0x346   : > { %v5074_v48 = vpop.eup %5073 }
 0x347   : > { %v1236_v49 = vmul.f32 %v5074_v48, %v5072_v35  ;;  %v1599_v35 = vsel %vm1242_vm4, %v4267_v34, 0 }
 0x349   : > { %v1237_v51 = vpack.c.bf16 %v1236_v49, %v1236_v49 }
 0x34b   : > { %4623 = vmatmul.mubr.msk.bf16.vlgmr.msra.gmra.mrb[8].mxu0 %vm1176_vm2, %v1237_v51  ;;  %v5032_v51 = vld [vmem:[%s5234_s21 + $0x28] sm:$0xff]  }
 0x34c   : > { %4635 = vmatpush3.bf16.msra.mxu0 %v5023_v50  ;;  %4638 = vmatprep.mubr.msk.bf16.mxu0 %vm5204_vm0, %v5203_v1 }
 0x34d   : > { %4636 = vmatprep.subr.bf16.mxu0 %v5203_v1 }
 0x350   : > { %4637 = vmatpush3.bf16.msra.mxu0 %v5024_v52 }
 0x351   : > { %4650 = vmatprep.subr.bf16.mxu0 %v5203_v1 }
 0x353   : > { %4639 = vmatmul.mubr.msk.bf16.vlgmr.msra.gmra.mrb[12].mxu0 %vm1004_vm1, %v5437_v6 }
 0x354   : > { %4652 = vmatprep.mubr.msk.bf16.mxu0 %vm5204_vm0, %v5203_v1 }
 0x41e   : > { %v5494_v57 = vpop.f32.mrb[8].mxu0 }
 0x41f   : > { %v4624_v58 = vpop.f32.mrb[9].mxu0  ;;  %v1286_v43 = vpack.c.bf16 %v5494_v57, %v5494_v57 }
 0x420   : > { %v1283_v59 = vpop.f32.mrb[10].mxu0 }
 0x421   : > { %v4625_v60 = vpop.f32.mrb[11].mxu0 }
 0x426   : > { %v1412_v62 = vpop.f32.mrb[12].mxu0 }
 0x427   : > { %v1413_v63 = vadd.f32 %v4252_v61, %v1412_v62  ;;  %v4640_v0 = vpop.f32.mrb[13].mxu0 }
 0x428   : > { %v1415_v2 = vpop.f32.mrb[14].mxu0 }
 0x429   : > { %v1484_v4 = vpack.c.bf16 %v1413_v63, %v1413_v63  ;;  %v4641_v7 = vpop.f32.mrb[15].mxu0 }
 0x42b   : > { %v1489_v8 = vsel %vm1176_vm2, %v1484_v4, 0 }
 0x42c   : > { %4651 = vmatpush3.bf16.xpose.msra.mxu0 %v1489_v8  ;;  %v4275_v8 = vld [vmem:[%s5239_s25 + $0x2] ss:$0 sm:$0xff] }
 0x42d   : > { %4662 = vmatprep.subr.bf16.mxu0 %v5203_v1 }
 0x433   : > { %4653 = vmatmul.mubr.msk.bf16.vlgmr.msra.gmra.mrb[16].mxu0 %vm1176_vm2, %v1483_v10 }
 0x434   : > { %4664 = vmatprep.mubr.msk.bf16.mxu0 %vm5204_vm0, %v5203_v1  ;;  %4663 = vmatpush3.bf16.msra.mxu0 %v1599_v35 }
 0x435   : > { %4674 = vmatprep.subr.bf16.mxu0 %v5203_v1 }
 0x506   : > { %v1525_v13 = vpop.f32.mrb[16].mxu0 }
 0x507   : > { %v1531_v14 = vmul.f32 0.35355338, %v1525_v13  ;;  %v4654_v15 = vpop.f32.mrb[17].mxu0 }
 0x508   : > { %v1528_v16 = vpop.f32.mrb[18].mxu0  ;;  %v5033_v15 = vld [vmem:[%s5956_s8 + $0x20] sm:$0xff]  }
 0x509   : > { %v4655_v17 = vpop.f32.mrb[19].mxu0  ;;  %v1532_v18 = vsel %vm1224_vm3, %v1531_v14, -10000.0  ;;  %v5034_v16 = vld [vmem:[%s5956_s8 + $0x28] sm:$0xff]  }
 0x50a   : > { %v1533_v19 = vsel %vm1176_vm2, %v1532_v18, -inf }
 0x50b   : > { %1534 = vmax.xlane.f32.xlu1 %v1533_v19 }
 0x598   : > { %v1535_v29 = vpop.xlane.xlu1 %1534 }
 0x599   : > { %v1536_v30 = vsub.f32 %v1532_v18, %v1535_v29 }
 0x59b   : > { %v1537_v31 = vmul.f32 1.442695, %v1536_v30 }
 0x59d   : > { %5075 = vpow2.f32 %v1537_v31 }
 0x5a7   : > { %v5076_v32 = vpop.eup %5075 }
 0x5a8   : > { %v1539_v33 = vsel %vm1176_vm2, %v5076_v32, 0.0 }
 0x5a9   : > { %1540 = vadd.xlane.f32.xlu1 %v1539_v33  ;;  %v4293_v33 = vld [vmem:[%s5259_s14 + $0x2] ss:$0 sm:$0xff] }
 0x636   : > { %v1541_v36 = vpop.xlane.xlu1 %1540 }
 0x637   : > { %5077 = vrcp.f32 %v1541_v36 }
 0x641   : > { %v5078_v37 = vpop.eup %5077 }
 0x642   : > { %v1543_v39 = vmul.f32 %v5078_v37, %v5076_v32 }
 0x644   : > { %v1544_v40 = vpack.c.bf16 %v1543_v39, %v1543_v39  ;;  %v1998_v39 = vsel %vm1242_vm4, %v4299_v38, 0 }
 0x646   : > { %4659 = vmatmul.mubr.msk.bf16.vlgmr.msra.gmra.mrb[16].mxu1 %vm1176_vm2, %v1544_v40 }
 0x647   : > { %4669 = vmatpush3.bf16.msra.mxu1 %v1645_v41  ;;  %4670 = vmatprep.mubr.msk.bf16.mxu1 %vm5204_vm0, %v5203_v1 }
 0x648   : > { %4682 = vmatprep.subr.bf16.mxu1 %v5203_v1 }
 0x64e   : > { %4671 = vmatmul.mubr.msk.bf16.vlgmr.msra.gmra.mrb[20].mxu1 %vm1176_vm2, %v1286_v43 }
 0x64f   : > { %4683 = vmatpush3.bf16.msra.mxu1 %v5029_v42  ;;  %4686 = vmatprep.mubr.msk.bf16.mxu1 %vm5204_vm0, %v5203_v1 }
 0x650   : > { %4684 = vmatprep.subr.bf16.mxu1 %v5203_v1 }
 0x653   : > { %4685 = vmatpush3.bf16.msra.mxu1 %v5030_v44  ;;  %v5037_v44 = vld [vmem:[%s5234_s21 + $0x30] sm:$0xff]  }
 0x654   : > { %4698 = vmatprep.subr.bf16.mxu1 %v5203_v1 }
 0x656   : > { %4687 = vmatmul.mubr.msk.bf16.vlgmr.msra.gmra.mrb[24].mxu1 %vm1004_vm1, %v5437_v6 }
 0x657   : > { %4700 = vmatprep.mubr.msk.bf16.mxu1 %vm5204_vm0, %v5203_v1 }
 0x719   : > { %v1586_v45 = vpop.f32.mrb[16].mxu1 }
 0x71a   : > { %v1592_v47 = vpack.c.bf16 %v1586_v45, %v1586_v45  ;;  %v4660_v48 = vpop.f32.mrb[17].mxu1  ;;  %v5038_v45 = vld [vmem:[%s5234_s21 + $0x38] sm:$0xff]  }
 0x71b   : > { %v1589_v49 = vpop.f32.mrb[18].mxu1 }
 0x71c   : > { %v4661_v50 = vpop.f32.mrb[19].mxu1  ;;  %4665 = vmatmul.mubr.msk.bf16.vlgmr.msra.gmra.mrb[20].mxu0 %vm1176_vm2, %v1592_v47  ;;  %v5035_v47 = vld [vmem:[%s5244_s29 + $0x30] sm:$0xff]  }
 0x71d   : > { %4675 = vmatpush3.bf16.msra.mxu0 %v5031_v46  ;;  %4678 = vmatprep.mubr.msk.bf16.mxu0 %vm5204_vm0, %v5203_v1 }
 0x71e   : > { %4676 = vmatprep.subr.bf16.mxu0 %v5203_v1 }
 0x721   : > { %v1681_v52 = vpop.f32.mrb[20].mxu1  ;;  %4677 = vmatpush3.bf16.msra.mxu0 %v5032_v51 }
 0x722   : > { %v4672_v53 = vpop.f32.mrb[21].mxu1  ;;  %4690 = vmatprep.subr.bf16.mxu0 %v5203_v1 }
 0x723   : > { %v1684_v54 = vpop.f32.mrb[22].mxu1 }
 0x724   : > { %v4673_v55 = vpop.f32.mrb[23].mxu1  ;;  %4679 = vmatmul.mubr.msk.bf16.vlgmr.msra.gmra.mrb[24].mxu0 %vm1004_vm1, %v5437_v6 }
 0x725   : > { %4694 = vmatprep.mubr.msk.bf16.mxu0 %vm5204_vm0, %v5203_v1  ;;  %4691 = vmatpush3.bf16.msra.mxu0 %v5033_v15 }
 0x726   : > { %4692 = vmatprep.subr.bf16.mxu0 %v5203_v1 }
 0x729   : > { %v1811_v57 = vpop.f32.mrb[24].mxu1  ;;  %4693 = vmatpush3.bf16.msra.mxu0 %v5034_v16 }
 0x72a   : > { %v1812_v58 = vadd.f32 %v4284_v56, %v1811_v57  ;;  %v4688_v59 = vpop.f32.mrb[25].mxu1  ;;  %4704 = vmatprep.subr.bf16.mxu0 %v5203_v1 }
 0x72b   : > { %v1814_v60 = vpop.f32.mrb[26].mxu1 }
 0x72c   : > { %v1883_v61 = vpack.c.bf16 %v1812_v58, %v1812_v58  ;;  %v4689_v62 = vpop.f32.mrb[27].mxu1  ;;  %4695 = vmatmul.mubr.msk.bf16.vlgmr.msra.gmra.mrb[28].mxu0 %vm1004_vm1, %v5437_v6 }
 0x72d   : > { %4706 = vmatprep.mubr.msk.bf16.mxu0 %vm5204_vm0, %v5203_v1  ;;  %v4315_v62 = vld [vmem:[%s5957_s3 + $0x3] ss:$0 sm:$0xff]  ;;  %s5967_s3 = sld [smem:[#allocation8_spill]] }
 0x72e   : > { %v1888_v63 = vsel %vm1176_vm2, %v1883_v61, 0 }
 0x72f   : > { %4699 = vmatpush3.bf16.xpose.msra.mxu1 %v1888_v63 }
 0x730   : > { %4710 = vmatprep.subr.bf16.mxu1 %v5203_v1 }
 0x733   : > { %s976_s5 = scalar_lea.vmem %s5967_s3, %s5428_s23  ;;  %s5970_s3 = sld [smem:[#allocation18_spill]] }
 0x734   : > { %s5971_s23 = sld [smem:[#allocation21_spill]] }
 0x7ef   : > { %v1635_v0 = vpop.f32.mrb[20].mxu0 }
 0x7f0   : > { %v5554_v2 = vadd.f32 %v1681_v52, %v1635_v0  ;;  %v4666_v3 = vpop.f32.mrb[21].mxu0  ;;  %v5036_v52 = vld [vmem:[%s5244_s29 + $0x38] sm:$0xff]  }
 0x7f1   : > { %v1638_v4 = vpop.f32.mrb[22].mxu0 }
 0x7f2   : > { %v4667_v7 = vpop.f32.mrb[23].mxu0 }
 0x7f3   : > { %v4306_v7 = vld [vmem:[%s5239_s25 + $0x3] ss:$0 sm:$0xff] }
 0x7f7   : > { %v1746_v9 = vpop.f32.mrb[24].mxu0 }
 0x7f8   : > { %v1747_v10 = vadd.f32 %v4275_v8, %v1746_v9  ;;  %v4680_v11 = vpop.f32.mrb[25].mxu0 }
 0x7f9   : > { %v1749_v12 = vpop.f32.mrb[26].mxu0 }
 0x7fa   : > { %v1882_v13 = vpack.c.bf16 %v1747_v10, %v1747_v10  ;;  %v4681_v14 = vpop.f32.mrb[27].mxu0  ;;  %v5039_v12 = vld [vmem:[%s5956_s8 + $0x30] sm:$0xff]  }
 0x7fc   : > { %4701 = vmatmul.mubr.msk.bf16.vlgmr.msra.gmra.mrb[28].mxu1 %vm1176_vm2, %v1882_v13  ;;  %v5040_v13 = vld [vmem:[%s5956_s8 + $0x38] sm:$0xff]   ;;  %s5968_s8 = sld [smem:[#allocation16_spill]] }
 0x7fd   : > { %4712 = vmatprep.mubr.msk.bf16.mxu1 %vm5204_vm0, %v5203_v1  ;;  %4711 = vmatpush3.bf16.msra.mxu1 %v1998_v39 }
 0x7fe   : > { %4724 = vmatprep.subr.bf16.mxu1 %v5203_v1 }
 0x7ff   : > { %v1876_v30 = vpop.f32.mrb[28].mxu0 }
 0x800   : > { %v4696_v31 = vpop.f32.mrb[29].mxu0  ;;  %v1877_v35 = vadd.f32 %v4293_v33, %v1876_v30  ;;  %v4330_v33 = vld [vmem:[%s5264_s19 + $0xc] sm:$0xf] }
 0x801   : > { %v1879_v32 = vpop.f32.mrb[30].mxu0 }
 0x802   : > { %v4697_v34 = vpop.f32.mrb[31].mxu0  ;;  %v1944_v36 = vpack.c.bf16 %v1877_v35, %v1877_v35 }
 0x803   : > { %v2352_v34 = vsel %vm1242_vm4, %v4330_v33, 0 }
 0x804   : > { %v1949_v37 = vsel %vm1242_vm4, %v1944_v36, 0 }
 0x805   : > { %4705 = vmatpush3.bf16.msra.mxu0 %v1949_v37 }
 0x806   : > { %4716 = vmatprep.subr.bf16.mxu0 %v5203_v1 }
 0x8cf   : > { %v1924_v17 = vpop.f32.mrb[28].mxu1 }
 0x8d0   : > { %v1930_v18 = vmul.f32 0.35355338, %v1924_v17  ;;  %v4702_v19 = vpop.f32.mrb[29].mxu1 }
 0x8d1   : > { %v1927_v20 = vpop.f32.mrb[30].mxu1 }
 0x8d2   : > { %v4703_v21 = vpop.f32.mrb[31].mxu1  ;;  %v1931_v22 = vsel %vm1224_vm3, %v1930_v18, -10000.0 }
 0x8d3   : > { %v1932_v23 = vsel %vm1176_vm2, %v1931_v22, -inf }
 0x8d4   : > { %1933 = vmax.xlane.f32.xlu0 %v1932_v23 }
 0x961   : > { %v1934_v25 = vpop.xlane.xlu0 %1933 }
 0x962   : > { %v1935_v26 = vsub.f32 %v1931_v22, %v1934_v25 }
 0x964   : > { %v1936_v27 = vmul.f32 1.442695, %v1935_v26 }
 0x966   : > { %5079 = vpow2.f32 %v1936_v27 }
 0x970   : > { %v5080_v28 = vpop.eup %5079 }
 0x971   : > { %v1938_v29 = vsel %vm1176_vm2, %v5080_v28, 0.0 }
 0x972   : > { %1939 = vadd.xlane.f32.xlu1 %v1938_v29  ;;  %v4324_v29 = vld [vmem:[%s5259_s14 + $0x3] ss:$0 sm:$0xff] }
 0x9ff   : > { %v1940_v40 = vpop.xlane.xlu1 %1939 }
 0xa00   : > { %5081 = vrcp.f32 %v1940_v40 }
 0xa0a   : > { %v5082_v41 = vpop.eup %5081 }
 0xa0b   : > { %v1942_v42 = vmul.f32 %v5082_v41, %v5080_v28 }
 0xa0d   : > { %v1943_v43 = vpack.c.bf16 %v1942_v42, %v1942_v42 }
 0xa0f   : > { %4707 = vmatmul.mubr.msk.bf16.vlgmr.msra.gmra.mrb[32].mxu0 %vm1176_vm2, %v1943_v43 }
 0xa10   : > { %4720 = vmatprep.mubr.msk.bf16.mxu0 %vm5204_vm0, %v5203_v1  ;;  %4717 = vmatpush3.bf16.msra.mxu0 %v5037_v44 }
 0xa11   : > { %4718 = vmatprep.subr.bf16.mxu0 %v5203_v1 }
 0xa14   : > { %4719 = vmatpush3.bf16.msra.mxu0 %v5038_v45  ;;  %v4332_v45 = vld [vmem:[%s5269_s24] ss:$0 sm:$0xff] }
 0xa15   : > { %4732 = vmatprep.subr.bf16.mxu0 %v5203_v1 }
 0xa17   : > { %4721 = vmatmul.mubr.msk.bf16.vlgmr.msra.gmra.mrb[36].mxu0 %vm1004_vm1, %v5437_v6 }
 0xa18   : > { %4736 = vmatprep.mubr.msk.bf16.mxu0 %vm5204_vm0, %v5203_v1  ;;  %4733 = vmatpush3.bf16.msra.mxu0 %v5039_v12 }
 0xa19   : > { %4734 = vmatprep.subr.bf16.mxu0 %v5203_v1 }
 0xa1c   : > { %4735 = vmatpush3.bf16.msra.mxu0 %v5040_v13  ;;  %v4339_v13 = vld [vmem:[%s5964_s1] ss:$0 sm:$0xff] }
 0xa1d   : > { %4746 = vmatprep.subr.bf16.mxu0 %v5203_v1 }
 0xa1f   : > { %4737 = vmatmul.mubr.msk.bf16.vlgmr.msra.gmra.mrb[40].mxu0 %vm1004_vm1, %v5437_v6 }
 0xa20   : > { %4748 = vmatprep.mubr.msk.bf16.mxu0 %vm5204_vm0, %v5203_v1 }
 0xae2   : > { %v1985_v46 = vpop.f32.mrb[32].mxu0 }
 0xae3   : > { %v1991_v48 = vpack.c.bf16 %v1985_v46, %v1985_v46  ;;  %v4708_v49 = vpop.f32.mrb[33].mxu0 }
 0xae4   : > { %v1988_v50 = vpop.f32.mrb[34].mxu0 }
 0xae5   : > { %v4709_v51 = vpop.f32.mrb[35].mxu0  ;;  %4713 = vmatmul.mubr.msk.bf16.vlgmr.msra.gmra.mrb[32].mxu1 %vm1176_vm2, %v1991_v48 }
 0xae6   : > { %4725 = vmatpush3.bf16.msra.mxu1 %v5035_v47  ;;  %4728 = vmatprep.mubr.msk.bf16.mxu1 %vm5204_vm0, %v5203_v1 }
 0xae7   : > { %4726 = vmatprep.subr.bf16.mxu1 %v5203_v1 }
 0xaea   : > { %4727 = vmatpush3.bf16.msra.mxu1 %v5036_v52  ;;  %v2100_v53 = vpop.f32.mrb[36].mxu0 }
 0xaeb   : > { %4740 = vmatprep.subr.bf16.mxu1 %v5203_v1  ;;  %v4722_v54 = vpop.f32.mrb[37].mxu0  ;;  %v2101_v11 = vadd.f32 %v4306_v7, %v2100_v53 }
 0xaec   : > { %v2103_v55 = vpop.f32.mrb[38].mxu0 }
 0xaed   : > { %4729 = vmatmul.mubr.msk.bf16.vlgmr.msra.gmra.mrb[36].mxu1 %vm1004_vm1, %v5437_v6  ;;  %v4723_v56 = vpop.f32.mrb[39].mxu0 }
 0xaee   : > { %4742 = vmatprep.mubr.msk.bf16.mxu1 %vm5204_vm0, %v5203_v1 }
 0xaf2   : > { %v2230_v26 = vpop.f32.mrb[40].mxu0 }
 0xaf3   : > { %v4738_v27 = vpop.f32.mrb[41].mxu0  ;;  %v2231_v31 = vadd.f32 %v4324_v29, %v2230_v26  ;;  %v5045_v26 = vld [vmem:[%s5955_s12 + $0x10] sm:$0xff]   ;;  %v5046_v29 = vld [vmem:[%s5955_s12 + $0x18] sm:$0xff]  }
 0xaf4   : > { %v2233_v28 = vpop.f32.mrb[42].mxu0 }
 0xaf5   : > { %v4739_v30 = vpop.f32.mrb[43].mxu0  ;;  %v2298_v24 = vpack.c.bf16 %v2231_v31, %v2231_v31 }
 0xaf7   : > { %v2303_v32 = vsel %vm1242_vm4, %v2298_v24, 0  ;;  %v5692_v24 = vld [vmem:[%s976_s5] sm:$0xff]  ;;  %s5969_s5 = sld [smem:[#allocation17_spill]] }
 0xaf8   : > { %4747 = vmatpush3.bf16.msra.mxu0 %v2303_v32  ;;  %vm2683_vm5 = vcmp.gt.f32.partialorder %v5692_v24, 0.0 }
 0xaf9   : > { %4758 = vmatprep.subr.bf16.mxu0 %v5203_v1 }
 0xbb8   : > { %v2034_v57 = vpop.f32.mrb[32].mxu1 }
 0xbb9   : > { %v5601_v58 = vadd.f32 %v2034_v57, %v5554_v2  ;;  %v4714_v59 = vpop.f32.mrb[33].mxu1  ;;  %v2236_v2 = vpack.c.bf16 %v2101_v11, %v2101_v11 }
 0xbba   : > { %v2037_v60 = vpop.f32.mrb[34].mxu1  ;;  %v5042_v59 = vld [vmem:[%s5294_s27 + $0x8] sm:$0xff]  }
 0xbbb   : > { %v4715_v61 = vpop.f32.mrb[35].mxu1 }
 0xbbc   : > { %v5043_v61 = vld [vmem:[%s5955_s12] sm:$0xff]  }
 0xbc0   : > { %v2165_v63 = vpop.f32.mrb[36].mxu1 }
 0xbc1   : > { %v2166_v0 = vadd.f32 %v4315_v62, %v2165_v63  ;;  %v4730_v3 = vpop.f32.mrb[37].mxu1  ;;  %v5044_v62 = vld [vmem:[%s5955_s12 + $0x8] sm:$0xff]  }
 0xbc2   : > { %v2168_v4 = vpop.f32.mrb[38].mxu1 }
 0xbc3   : > { %v2237_v8 = vpack.c.bf16 %v2166_v0, %v2166_v0  ;;  %v4731_v9 = vpop.f32.mrb[39].mxu1 }
 0xbc5   : > { %v2242_v10 = vsel %vm1176_vm2, %v2237_v8, 0  ;;  %v4333_v8 = vld [vmem:[%s5274_s30] ss:$0 sm:$0xff] }
 0xbc6   : > { %4741 = vmatpush3.bf16.xpose.msra.mxu1 %v2242_v10  ;;  %v4334_v10 = vld [vmem:[%s5963_s28] ss:$0 sm:$0xff]  ;;  %s5966_s28 = sld [smem:[#allocation15_spill]] }
 0xbc7   : > { %4752 = vmatprep.subr.bf16.mxu1 %v5203_v1 }
 0xbcc   : > { %v5047_v30 = vld [vmem:[%s5966_s28] sm:$0xff]   ;;  %v5048_v31 = vld [vmem:[%s5966_s28 + $0x8] sm:$0xff]  }
 0xbcd   : > { %4743 = vmatmul.mubr.msk.bf16.vlgmr.msra.gmra.mrb[40].mxu1 %vm1176_vm2, %v2236_v2 }
 0xbce   : > { %4754 = vmatprep.mubr.msk.bf16.mxu1 %vm5204_vm0, %v5203_v1  ;;  %4753 = vmatpush3.bf16.msra.mxu1 %v2352_v34 }
 0xbcf   : > { %4766 = vmatprep.subr.bf16.mxu1 %v5203_v1 }
 0xca0   : > { %v2278_v14 = vpop.f32.mrb[40].mxu1 }
 0xca1   : > { %v2284_v15 = vmul.f32 0.35355338, %v2278_v14  ;;  %v4744_v16 = vpop.f32.mrb[41].mxu1 }
 0xca2   : > { %v2281_v17 = vpop.f32.mrb[42].mxu1 }
 0xca3   : > { %v4745_v18 = vpop.f32.mrb[43].mxu1  ;;  %v2285_v19 = vsel %vm1224_vm3, %v2284_v15, -10000.0 }
 0xca4   : > { %v2286_v20 = vsel %vm1176_vm2, %v2285_v19, -inf }
 0xca5   : > { %2287 = vmax.xlane.f32.xlu0 %v2286_v20 }
 0xd32   : > { %v2288_v21 = vpop.xlane.xlu0 %2287 }
 0xd33   : > { %v2289_v22 = vsub.f32 %v2285_v19, %v2288_v21 }
 0xd35   : > { %v2290_v23 = vmul.f32 1.442695, %v2289_v22 }
 0xd37   : > { %5083 = vpow2.f32 %v2290_v23 }
 0xd41   : > { %v5084_v6 = vpop.eup %5083 }
 0xd42   : > { %v2292_v25 = vsel %vm1176_vm2, %v5084_v6, 0.0 }
 0xd43   : > { %2293 = vadd.xlane.f32.xlu1 %v2292_v25 }
 0xdd0   : > { %v2294_v35 = vpop.xlane.xlu1 %2293 }
 0xdd1   : > { %5085 = vrcp.f32 %v2294_v35 }
 0xddb   : > { %v5086_v36 = vpop.eup %5085 }
 0xddc   : > { %v2296_v37 = vmul.f32 %v5086_v36, %v5084_v6 }
 0xdde   : > { %v2297_v38 = vpack.c.bf16 %v2296_v37, %v2296_v37 }
 0xde0   : > { %4749 = vmatmul.mubr.msk.bf16.vlgmr.msra.gmra.mrb[44].mxu0 %vm1176_vm2, %v2297_v38 }
 0xde1   : > { %4762 = vmatprep.mubr.msk.bf16.mxu0 %vm5204_vm0, %v5203_v1  ;;  %4759 = vmatpush3.bf16.msra.mxu0 %v5043_v61  ;;  %v5050_v61 = vld [vmem:[%s5294_s27 + $0x18] sm:$0xff]  }
 0xde2   : > { %4760 = vmatprep.subr.bf16.mxu0 %v5203_v1 }
 0xde5   : > { %4761 = vmatpush3.bf16.msra.mxu0 %v5044_v62 }
 0xde6   : > { %4774 = vmatprep.subr.bf16.mxu0 %v5203_v1 }
 0xeb3   : > { %v2339_v39 = vpop.f32.mrb[44].mxu0 }
 0xeb4   : > { %v2345_v40 = vpack.c.bf16 %v2339_v39, %v2339_v39  ;;  %v4750_v41 = vpop.f32.mrb[45].mxu0 }
 0xeb5   : > { %v2342_v42 = vpop.f32.mrb[46].mxu0 }
 0xeb6   : > { %v4751_v43 = vpop.f32.mrb[47].mxu0  ;;  %4755 = vmatmul.mubr.msk.bf16.vlgmr.msra.gmra.mrb[44].mxu1 %vm1176_vm2, %v2345_v40 }
 0xeb7   : > { %4770 = vmatprep.mubr.msk.bf16.mxu1 %vm5204_vm0, %v5203_v1 }
 0xf89   : > { %v2388_v44 = vpop.f32.mrb[44].mxu1 }
 0xf8a   : > { %v2394_v46 = vadd.f32 %v2388_v44, %v5601_v58  ;;  %v4756_v47 = vpop.f32.mrb[45].mxu1  ;;  %v5041_v58 = vld [vmem:[%s5294_s27] sm:$0xff]  }
 0xf8b   : > { %v2391_v48 = vpop.f32.mrb[46].mxu1  ;;  %4767 = vmatpush3.bf16.msra.mxu1 %v5041_v58 }
 0xf8c   : > { %v2402_v49 = vadd.f32 %v4332_v45, %v2394_v46  ;;  %v4757_v50 = vpop.f32.mrb[47].mxu1  ;;  %4768 = vmatprep.subr.bf16.mxu1 %v5203_v1 }
 0xf8e   : > { %v2405_v51 = vadd.f32 %v2402_v49, %v5433_v5  ;;  %v2435_v5 = vld [vmem:[%s968_s11] sm:$0xff]  ;;  %s5965_s11 = sld [smem:[#allocation13_spill]] }
 0xf8f   : > { %4769 = vmatpush3.bf16.msra.mxu1 %v5042_v59  ;;  %v5644_v60 = vpack.c.bf16 %v2435_v5, %v2435_v5  ;;  %v5049_v59 = vld [vmem:[%s5294_s27 + $0x10] sm:$0xff]  }
 0xf90   : > { %v2406_v52 = vsel %vm1004_vm1, %v2405_v51, 0.0  ;;  %4782 = vmatprep.subr.bf16.mxu1 %v5203_v1 }
 0xf91   : > { %2407 = vadd.xlane.f32.xlu0 %v2406_v52 }
 0xf92   : > { %4771 = vmatmul.mubr.msk.bf16.vlgmr.msra.gmra.mrb[48].mxu1 %vm1004_vm1, %v5644_v60 }
 0xf93   : > { %4784 = vmatprep.mubr.msk.bf16.mxu1 %vm5204_vm0, %v5203_v1 }
 0xf94   : > { %v4335_v21 = vld [vmem:[%s5965_s11] ss:$0 sm:$0xff] }
0x101e   : > { %v2408_v53 = vpop.xlane.xlu0 %2407 }
0x101f   : > { %v2410_v54 = vmul.f32 0.03125, %v2408_v53 }
0x1021   : > { %v2411_v55 = vsub.f32 %v2405_v51, %v2410_v54  ;;  %v4343_v51 = vld [vmem:[%s5968_s8] ss:$0 sm:$0xff] }
0x1023   : > { %v2412_v56 = vmul.f32 %v2411_v55, %v2411_v55 }
0x1025   : > { %v2413_v57 = vsel %vm1004_vm1, %v2412_v56, 0.0 }
0x1026   : > { %2414 = vadd.xlane.f32.xlu1 %v2413_v57 }
0x1065   : > { %v2565_v14 = vpop.f32.mrb[48].mxu1 }
0x1066   : > { %v2566_v15 = vadd.f32 %v4339_v13, %v2565_v14  ;;  %v4772_v16 = vpop.f32.mrb[49].mxu1  ;;  %v4354_v14 = vld [vmem:[%s5965_s11 + $0x1] ss:$0 sm:$0xff] }
0x1067   : > { %v2568_v17 = vpop.f32.mrb[50].mxu1 }
0x1068   : > { %v2635_v18 = vpack.c.bf16 %v2566_v15, %v2566_v15  ;;  %v4773_v19 = vpop.f32.mrb[51].mxu1 }
0x1069   : > { %v5052_v19 = vld [vmem:[%s5966_s28 + $0x18] sm:$0xff]  }
0x106a   : > { %v2640_v20 = vsel %vm1176_vm2, %v2635_v18, 0  ;;  %v5051_v18 = vld [vmem:[%s5966_s28 + $0x10] sm:$0xff]  }
0x106b   : > { %4783 = vmatpush3.bf16.xpose.msra.mxu1 %v2640_v20 }
0x106c   : > { %4794 = vmatprep.subr.bf16.mxu1 %v5203_v1 }
0x10b3   : > { %v2415_v63 = vpop.xlane.xlu1 %2414 }
0x10b4   : > { %v2416_v0 = vmul.f32 0.03125, %v2415_v63 }
0x10b6   : > { %v2417_v3 = vmax.f32 %v2416_v0, 1e-10 }
0x10b8   : > { %v2418_v4 = vadd.f32 1e-10, %v2417_v3 }
0x10ba   : > { %5087 = vrsqrt.f32 %v2418_v4  ;;  %v4363_v4 = vld [vmem:[%s5964_s1 + $0x1] ss:$0 sm:$0xff] }
0x10c4   : > { %v5088_v7 = vpop.eup %5087 }
0x10c5   : > { %v2420_v9 = vmul.f32 %v5088_v7, %v2411_v55 }
0x10c7   : > { %v2427_v11 = vmul.f32 %v4333_v8, %v2420_v9 }
0x10c9   : > { %v5657_v2 = vadd.f32 %v4334_v10, %v2427_v11 }
0x10cb   : > { %v5661_v12 = vpack.c.bf16 %v5657_v2, %v5657_v2 }
0x10cd   : > { %4763 = vmatmul.mubr.msk.bf16.vlgmr.msra.gmra.mrb[48].mxu0 %vm1004_vm1, %v5661_v12 }
0x10ce   : > { %4778 = vmatprep.mubr.msk.bf16.mxu0 %vm5204_vm0, %v5203_v1  ;;  %4775 = vmatpush3.bf16.msra.mxu0 %v5047_v30 }
0x10cf   : > { %4776 = vmatprep.subr.bf16.mxu0 %v5203_v1 }
0x10d2   : > { %4777 = vmatpush3.bf16.msra.mxu0 %v5048_v31 }
0x10d3   : > { %4788 = vmatprep.subr.bf16.mxu0 %v5203_v1 }
0x10d5   : > { %4779 = vmatmul.mubr.msk.bf16.vlgmr.msra.gmra.mrb[52].mxu0 %vm1004_vm1, %v5644_v60 }
0x10d6   : > { %4790 = vmatprep.mubr.msk.bf16.mxu0 %vm5204_vm0, %v5203_v1 }
0x11a0   : > { %v2499_v22 = vpop.f32.mrb[48].mxu0 }
0x11a1   : > { %v2500_v23 = vadd.f32 %v4335_v21, %v2499_v22  ;;  %v4764_v6 = vpop.f32.mrb[49].mxu0 }
0x11a2   : > { %v2502_v25 = vpop.f32.mrb[50].mxu0 }
0x11a3   : > { %v2634_v27 = vpack.c.bf16 %v2500_v23, %v2500_v23  ;;  %v4765_v28 = vpop.f32.mrb[51].mxu0 }
0x11a5   : > { %4785 = vmatmul.mubr.msk.bf16.vlgmr.msra.gmra.mrb[52].mxu1 %vm1176_vm2, %v2634_v27  ;;  %v4372_v27 = vld [vmem:[%s5968_s8 + $0x1] ss:$0 sm:$0xff] }
0x11a6   : > { %4795 = vmatpush3.bf16.msra.mxu1 %v5045_v26  ;;  %4798 = vmatprep.mubr.msk.bf16.mxu1 %vm5204_vm0, %v5203_v1 }
0x11a7   : > { %4796 = vmatprep.subr.bf16.mxu1 %v5203_v1 }
0x11a8   : > { %v2628_v48 = vpop.f32.mrb[52].mxu0 }
0x11a9   : > { %v4780_v49 = vpop.f32.mrb[53].mxu0  ;;  %v2629_v53 = vadd.f32 %v4343_v51, %v2628_v48  ;;  %v5053_v48 = vld [vmem:[%s5294_s27 + $0x20] sm:$0xff]  }
0x11aa   : > { %4797 = vmatpush3.bf16.msra.mxu1 %v5046_v29  ;;  %v2631_v50 = vpop.f32.mrb[54].mxu0 }
0x11ab   : > { %4810 = vmatprep.subr.bf16.mxu1 %v5203_v1  ;;  %v4781_v52 = vpop.f32.mrb[55].mxu0  ;;  %v2697_v54 = vpack.c.bf16 %v2629_v53, %v2629_v53  ;;  %v5054_v50 = vld [vmem:[%s5294_s27 + $0x28] sm:$0xff]  }
0x11ac   : > { %v5055_v52 = vld [vmem:[%s5955_s12 + $0x20] sm:$0xff]  }
0x11ad   : > { %4799 = vmatmul.mubr.msk.bf16.vlgmr.msra.gmra.mrb[56].mxu1 %vm1004_vm1, %v5661_v12  ;;  %v2702_v55 = vsel %vm1242_vm4, %v2697_v54, 0 }
0x11ae   : > { %4814 = vmatprep.mubr.msk.bf16.mxu1 %vm5204_vm0, %v5203_v1  ;;  %4789 = vmatpush3.bf16.msra.mxu0 %v2702_v55 }
0x11af   : > { %4802 = vmatprep.subr.bf16.mxu0 %v5203_v1  ;;  %4811 = vmatpush3.bf16.msra.mxu1 %v5051_v18 }
0x11b0   : > { %4812 = vmatprep.subr.bf16.mxu1 %v5203_v1 }
0x11b3   : > { %4813 = vmatpush3.bf16.msra.mxu1 %v5052_v19 }
0x11b4   : > { %4824 = vmatprep.subr.bf16.mxu1 %v5203_v1 }
0x11b6   : > { %4815 = vmatmul.mubr.msk.bf16.vlgmr.msra.gmra.mrb[60].mxu1 %vm1004_vm1, %v5644_v60 }
0x11b7   : > { %4826 = vmatprep.mubr.msk.bf16.mxu1 %vm5204_vm0, %v5203_v1 }
0x1278   : > { %v2676_v32 = vpop.f32.mrb[52].mxu1 }
0x1279   : > { %v2682_v33 = vmul.f32 0.35355338, %v2676_v32  ;;  %v4786_v34 = vpop.f32.mrb[53].mxu1 }
0x127a   : > { %v2679_v35 = vpop.f32.mrb[54].mxu1 }
0x127b   : > { %v4787_v36 = vpop.f32.mrb[55].mxu1  ;;  %v2684_v37 = vsel %vm2683_vm5, %v2682_v33, -10000.0 }
0x127c   : > { %v2685_v38 = vsel %vm1176_vm2, %v2684_v37, -inf }
0x127d   : > { %2686 = vmax.xlane.f32.xlu0 %v2685_v38 }
0x1280   : > { %v2805_v39 = vpop.f32.mrb[56].mxu1 }
0x1281   : > { %v4800_v40 = vpop.f32.mrb[57].mxu1  ;;  %v2806_v16 = vadd.f32 %v4354_v14, %v2805_v39 }
0x1282   : > { %v2808_v41 = vpop.f32.mrb[58].mxu1  ;;  %v4378_v40 = vld [vmem:[%s5969_s5 + $0x4] sm:$0xf] }
0x1283   : > { %v4801_v42 = vpop.f32.mrb[59].mxu1  ;;  %v2941_v17 = vpack.c.bf16 %v2806_v16, %v2806_v16  ;;  %v3057_v41 = vsel %vm1242_vm4, %v4378_v40, 0  ;;  %v4386_v16 = vld [vmem:[%s5965_s11 + $0x2] ss:$0 sm:$0xff] }
0x1284   : > { %v4404_v40 = vld [vmem:[%s5968_s8 + $0x2] ss:$0 sm:$0xff] }
0x1289   : > { %v2935_v28 = vpop.f32.mrb[60].mxu1 }
0x128a   : > { %v2936_v29 = vadd.f32 %v4372_v27, %v2935_v28  ;;  %v4816_v30 = vpop.f32.mrb[61].mxu1 }
0x128b   : > { %v2938_v31 = vpop.f32.mrb[62].mxu1 }
0x128c   : > { %v3003_v32 = vpack.c.bf16 %v2936_v29, %v2936_v29  ;;  %v4817_v33 = vpop.f32.mrb[63].mxu1 }
0x128e   : > { %v3008_v34 = vsel %vm1242_vm4, %v3003_v32, 0 }
0x128f   : > { %4825 = vmatpush3.bf16.msra.mxu1 %v3008_v34 }
0x1290   : > { %4836 = vmatprep.subr.bf16.mxu1 %v5203_v1 }
0x130a   : > { %v2687_v43 = vpop.xlane.xlu0 %2686 }
0x130b   : > { %v2688_v44 = vsub.f32 %v2684_v37, %v2687_v43 }
0x130d   : > { %v2689_v45 = vmul.f32 1.442695, %v2688_v44  ;;  %v2745_v44 = vld [vmem:[%s5969_s5] sm:$0xf] }
0x130f   : > { %5089 = vpow2.f32 %v2689_v45 }
0x1319   : > { %v5090_v46 = vpop.eup %5089 }
0x131a   : > { %v2691_v47 = vsel %vm1176_vm2, %v5090_v46, 0.0 }
0x131b   : > { %2692 = vadd.xlane.f32.xlu1 %v2691_v47  ;;  %v3103_v47 = vsel %vm1242_vm4, %v2745_v44, 0 }
0x13a8   : > { %v2693_v56 = vpop.xlane.xlu1 %2692 }
0x13a9   : > { %5091 = vrcp.f32 %v2693_v56 }
0x13b3   : > { %v5092_v57 = vpop.eup %5091 }
0x13b4   : > { %v2695_v58 = vmul.f32 %v5092_v57, %v5090_v46  ;;  %v5056_v57 = vld [vmem:[%s5955_s12 + $0x28] sm:$0xff]  }
0x13b6   : > { %v2696_v5 = vpack.c.bf16 %v2695_v58, %v2695_v58 }
0x13b8   : > { %4791 = vmatmul.mubr.msk.bf16.vlgmr.msra.gmra.mrb[56].mxu0 %vm1176_vm2, %v2696_v5 }
0x13b9   : > { %4803 = vmatpush3.bf16.msra.mxu0 %v5049_v59  ;;  %4806 = vmatprep.mubr.msk.bf16.mxu0 %vm5204_vm0, %v5203_v1 }
0x13ba   : > { %4804 = vmatprep.subr.bf16.mxu0 %v5203_v1 }
0x13bd   : > { %4805 = vmatpush3.bf16.msra.mxu0 %v5050_v61 }
0x13be   : > { %4818 = vmatprep.subr.bf16.mxu0 %v5203_v1 }
0x13c0   : > { %4807 = vmatmul.mubr.msk.bf16.vlgmr.msra.gmra.mrb[60].mxu0 %vm1004_vm1, %v5644_v60 }
0x13c1   : > { %4820 = vmatprep.mubr.msk.bf16.mxu0 %vm5204_vm0, %v5203_v1 }
0x148b   : > { %v5713_v62 = vpop.f32.mrb[56].mxu0 }
0x148c   : > { %v4792_v63 = vpop.f32.mrb[57].mxu0  ;;  %v2744_v49 = vpack.c.bf16 %v5713_v62, %v5713_v62  ;;  %v4395_v62 = vld [vmem:[%s5964_s1 + $0x2] ss:$0 sm:$0xff] }
0x148d   : > { %v2741_v0 = vpop.f32.mrb[58].mxu0 }
0x148e   : > { %v4793_v3 = vpop.f32.mrb[59].mxu0 }
0x1493   : > { %v2870_v7 = vpop.f32.mrb[60].mxu0 }
0x1494   : > { %v2871_v8 = vadd.f32 %v4363_v4, %v2870_v7  ;;  %v4808_v9 = vpop.f32.mrb[61].mxu0 }
0x1495   : > { %v2873_v10 = vpop.f32.mrb[62].mxu0 }
0x1496   : > { %v2942_v11 = vpack.c.bf16 %v2871_v8, %v2871_v8  ;;  %v4809_v13 = vpop.f32.mrb[63].mxu0 }
0x1498   : > { %v2947_v15 = vsel %vm1176_vm2, %v2942_v11, 0 }
0x1499   : > { %4819 = vmatpush3.bf16.xpose.msra.mxu0 %v2947_v15 }
0x149a   : > { %4830 = vmatprep.subr.bf16.mxu0 %v5203_v1 }
0x14a0   : > { %4821 = vmatmul.mubr.msk.bf16.vlgmr.msra.gmra.mrb[64].mxu0 %vm1176_vm2, %v2941_v17 }
0x14a1   : > { %4832 = vmatprep.mubr.msk.bf16.mxu0 %vm5204_vm0, %v5203_v1  ;;  %4831 = vmatpush3.bf16.msra.mxu0 %v3057_v41 }
0x14a2   : > { %4842 = vmatprep.subr.bf16.mxu0 %v5203_v1 }
0x1573   : > { %v2983_v20 = vpop.f32.mrb[64].mxu0 }
0x1574   : > { %v2989_v21 = vmul.f32 0.35355338, %v2983_v20  ;;  %v4822_v22 = vpop.f32.mrb[65].mxu0 }
0x1575   : > { %v2986_v23 = vpop.f32.mrb[66].mxu0 }
0x1576   : > { %v4823_v6 = vpop.f32.mrb[67].mxu0  ;;  %v2990_v25 = vsel %vm2683_vm5, %v2989_v21, -10000.0  ;;  %v5057_v23 = vld [vmem:[%s5966_s28 + $0x20] sm:$0xff]  }
0x1577   : > { %v2991_v26 = vsel %vm1176_vm2, %v2990_v25, -inf  ;;  %v5058_v6 = vld [vmem:[%s5966_s28 + $0x28] sm:$0xff]  }
0x1578   : > { %2992 = vmax.xlane.f32.xlu0 %v2991_v26 }
0x1605   : > { %v2993_v35 = vpop.xlane.xlu0 %2992 }
0x1606   : > { %v2994_v36 = vsub.f32 %v2990_v25, %v2993_v35 }
0x1608   : > { %v2995_v37 = vmul.f32 1.442695, %v2994_v36 }
0x160a   : > { %5093 = vpow2.f32 %v2995_v37 }
0x1614   : > { %v5094_v38 = vpop.eup %5093 }
0x1615   : > { %v2997_v39 = vsel %vm1176_vm2, %v5094_v38, 0.0 }
0x1616   : > { %2998 = vadd.xlane.f32.xlu1 %v2997_v39 }
0x16a3   : > { %v2999_v42 = vpop.xlane.xlu1 %2998 }
0x16a4   : > { %5095 = vrcp.f32 %v2999_v42 }
0x16ae   : > { %v5096_v43 = vpop.eup %5095 }
0x16af   : > { %v3001_v45 = vmul.f32 %v5096_v43, %v5094_v38 }
0x16b1   : > { %v3002_v46 = vpack.c.bf16 %v3001_v45, %v3001_v45  ;;  %v4410_v45 = vld [vmem:[%s5969_s5 + $0x8] sm:$0xf] }
0x16b3   : > { %4827 = vmatmul.mubr.msk.bf16.vlgmr.msra.gmra.mrb[64].mxu1 %vm1176_vm2, %v3002_v46  ;;  %v3456_v46 = vsel %vm1242_vm4, %v4410_v45, 0 }
0x16b4   : > { %4837 = vmatpush3.bf16.msra.mxu1 %v3103_v47  ;;  %4838 = vmatprep.mubr.msk.bf16.mxu1 %vm5204_vm0, %v5203_v1 }
0x16b5   : > { %4850 = vmatprep.subr.bf16.mxu1 %v5203_v1 }
0x16bb   : > { %4839 = vmatmul.mubr.msk.bf16.vlgmr.msra.gmra.mrb[68].mxu1 %vm1176_vm2, %v2744_v49 }
0x16bc   : > { %4851 = vmatpush3.bf16.msra.mxu1 %v5053_v48  ;;  %4854 = vmatprep.mubr.msk.bf16.mxu1 %vm5204_vm0, %v5203_v1 }
0x16bd   : > { %4852 = vmatprep.subr.bf16.mxu1 %v5203_v1 }
0x16c0   : > { %4853 = vmatpush3.bf16.msra.mxu1 %v5054_v50  ;;  %v5059_v50 = vld [vmem:[%s5955_s12 + $0x30] sm:$0xff]  }
0x16c1   : > { %4866 = vmatprep.subr.bf16.mxu1 %v5203_v1 }
0x16c3   : > { %4855 = vmatmul.mubr.msk.bf16.vlgmr.msra.gmra.mrb[72].mxu1 %vm1004_vm1, %v5644_v60 }
0x16c4   : > { %4868 = vmatprep.mubr.msk.bf16.mxu1 %vm5204_vm0, %v5203_v1 }
0x1786   : > { %v3044_v51 = vpop.f32.mrb[64].mxu1 }
0x1787   : > { %v3050_v53 = vpack.c.bf16 %v3044_v51, %v3044_v51  ;;  %v4828_v54 = vpop.f32.mrb[65].mxu1 }
0x1788   : > { %v3047_v55 = vpop.f32.mrb[66].mxu1  ;;  %v5061_v54 = vld [vmem:[%s5294_s27 + $0x30] sm:$0xff]  }
0x1789   : > { %v4829_v56 = vpop.f32.mrb[67].mxu1  ;;  %4833 = vmatmul.mubr.msk.bf16.vlgmr.msra.gmra.mrb[68].mxu0 %vm1176_vm2, %v3050_v53 }
0x178a   : > { %4843 = vmatpush3.bf16.msra.mxu0 %v5055_v52  ;;  %4846 = vmatprep.mubr.msk.bf16.mxu0 %vm5204_vm0, %v5203_v1  ;;  %v5060_v52 = vld [vmem:[%s5955_s12 + $0x38] sm:$0xff]  }
0x178b   : > { %4844 = vmatprep.subr.bf16.mxu0 %v5203_v1 }
0x178e   : > { %v3139_v58 = vpop.f32.mrb[68].mxu1  ;;  %4845 = vmatpush3.bf16.msra.mxu0 %v5056_v57 }
0x178f   : > { %v4840_v59 = vpop.f32.mrb[69].mxu1  ;;  %4858 = vmatprep.subr.bf16.mxu0 %v5203_v1 }
0x1790   : > { %v3142_v5 = vpop.f32.mrb[70].mxu1  ;;  %v5062_v59 = vld [vmem:[%s5294_s27 + $0x38] sm:$0xff]  }
0x1791   : > { %v4841_v61 = vpop.f32.mrb[71].mxu1  ;;  %4847 = vmatmul.mubr.msk.bf16.vlgmr.msra.gmra.mrb[72].mxu0 %vm1004_vm1, %v5661_v12 }
0x1792   : > { %4862 = vmatprep.mubr.msk.bf16.mxu0 %vm5204_vm0, %v5203_v1  ;;  %4859 = vmatpush3.bf16.msra.mxu0 %v5057_v23 }
0x1793   : > { %4860 = vmatprep.subr.bf16.mxu0 %v5203_v1 }
0x1796   : > { %v3269_v63 = vpop.f32.mrb[72].mxu1  ;;  %4861 = vmatpush3.bf16.msra.mxu0 %v5058_v6 }
0x1797   : > { %v3270_v0 = vadd.f32 %v4395_v62, %v3269_v63  ;;  %v4856_v3 = vpop.f32.mrb[73].mxu1  ;;  %4872 = vmatprep.subr.bf16.mxu0 %v5203_v1 }
0x1798   : > { %v3272_v4 = vpop.f32.mrb[74].mxu1 }
0x1799   : > { %v3341_v7 = vpack.c.bf16 %v3270_v0, %v3270_v0  ;;  %v4857_v8 = vpop.f32.mrb[75].mxu1  ;;  %4863 = vmatmul.mubr.msk.bf16.vlgmr.msra.gmra.mrb[76].mxu0 %vm1004_vm1, %v5644_v60 }
0x179a   : > { %4874 = vmatprep.mubr.msk.bf16.mxu0 %vm5204_vm0, %v5203_v1  ;;  %v4426_v8 = vld [vmem:[%s5964_s1 + $0x3] ss:$0 sm:$0xff]  ;;  %s5972_s1 = sld [smem:[#allocation23_spill]] }
0x179b   : > { %v3346_v9 = vsel %vm1176_vm2, %v3341_v7, 0 }
0x179c   : > { %4867 = vmatpush3.bf16.xpose.msra.mxu1 %v3346_v9 }
0x179d   : > { %4878 = vmatprep.subr.bf16.mxu1 %v5203_v1 }
0x185c   : > { %v3093_v10 = vpop.f32.mrb[68].mxu0 }
0x185d   : > { %v5773_v11 = vadd.f32 %v3139_v58, %v3093_v10  ;;  %v4834_v13 = vpop.f32.mrb[69].mxu0 }
0x185e   : > { %v3096_v14 = vpop.f32.mrb[70].mxu0 }
0x185f   : > { %v4835_v15 = vpop.f32.mrb[71].mxu0 }
0x1864   : > { %v3204_v17 = vpop.f32.mrb[72].mxu0 }
0x1865   : > { %v3205_v18 = vadd.f32 %v4386_v16, %v3204_v17  ;;  %v4848_v19 = vpop.f32.mrb[73].mxu0  ;;  %v4417_v17 = vld [vmem:[%s5965_s11 + $0x3] ss:$0 sm:$0xff] }
0x1866   : > { %v3207_v20 = vpop.f32.mrb[74].mxu0 }
0x1867   : > { %v3340_v21 = vpack.c.bf16 %v3205_v18, %v3205_v18  ;;  %v4849_v22 = vpop.f32.mrb[75].mxu0  ;;  %v5063_v20 = vld [vmem:[%s5966_s28 + $0x30] sm:$0xff]  }
0x1869   : > { %4869 = vmatmul.mubr.msk.bf16.vlgmr.msra.gmra.mrb[76].mxu1 %vm1176_vm2, %v3340_v21  ;;  %v5064_v21 = vld [vmem:[%s5966_s28 + $0x38] sm:$0xff]  }
0x186a   : > { %4880 = vmatprep.mubr.msk.bf16.mxu1 %vm5204_vm0, %v5203_v1  ;;  %4879 = vmatpush3.bf16.msra.mxu1 %v3456_v46 }
0x186b   : > { %4892 = vmatprep.subr.bf16.mxu1 %v5203_v1 }
0x186c   : > { %v3334_v37 = vpop.f32.mrb[76].mxu0 }
0x186d   : > { %v4864_v38 = vpop.f32.mrb[77].mxu0  ;;  %v3335_v42 = vadd.f32 %v4404_v40, %v3334_v37  ;;  %v4441_v40 = vld [vmem:[%s5969_s5 + $0xc] sm:$0xf]  ;;  %s5974_s5 = sld [smem:[#allocation20_spill]] }
0x186e   : > { %v3337_v39 = vpop.f32.mrb[78].mxu0 }
0x186f   : > { %v4865_v41 = vpop.f32.mrb[79].mxu0  ;;  %v3402_v43 = vpack.c.bf16 %v3335_v42, %v3335_v42 }
0x1870   : > { %v3810_v41 = vsel %vm1242_vm4, %v4441_v40, 0 }
0x1871   : > { %v3407_v44 = vsel %vm1242_vm4, %v3402_v43, 0 }
0x1872   : > { %4873 = vmatpush3.bf16.msra.mxu0 %v3407_v44 }
0x1873   : > { %4884 = vmatprep.subr.bf16.mxu0 %v5203_v1 }
0x193c   : > { %v3382_v25 = vpop.f32.mrb[76].mxu1 }
0x193d   : > { %v3388_v26 = vmul.f32 0.35355338, %v3382_v25  ;;  %v4870_v27 = vpop.f32.mrb[77].mxu1 }
0x193e   : > { %v3385_v28 = vpop.f32.mrb[78].mxu1 }
0x193f   : > { %v4871_v29 = vpop.f32.mrb[79].mxu1  ;;  %v3389_v30 = vsel %vm2683_vm5, %v3388_v26, -10000.0 }
0x1940   : > { %v3390_v31 = vsel %vm1176_vm2, %v3389_v30, -inf }
0x1941   : > { %3391 = vmax.xlane.f32.xlu0 %v3390_v31 }
0x19ce   : > { %v3392_v32 = vpop.xlane.xlu0 %3391 }
0x19cf   : > { %v3393_v33 = vsub.f32 %v3389_v30, %v3392_v32 }
0x19d1   : > { %v3394_v34 = vmul.f32 1.442695, %v3393_v33 }
0x19d3   : > { %5097 = vpow2.f32 %v3394_v34 }
0x19dd   : > { %v5098_v35 = vpop.eup %5097 }
0x19de   : > { %v3396_v36 = vsel %vm1176_vm2, %v5098_v35, 0.0 }
0x19df   : > { %3397 = vadd.xlane.f32.xlu1 %v3396_v36  ;;  %v4435_v36 = vld [vmem:[%s5968_s8 + $0x3] ss:$0 sm:$0xff]  ;;  %s5975_s8 = sld [smem:[#allocation22_spill]] }
0x1a6c   : > { %v3398_v47 = vpop.xlane.xlu1 %3397 }
0x1a6d   : > { %5099 = vrcp.f32 %v3398_v47 }
0x1a77   : > { %v5100_v48 = vpop.eup %5099 }
0x1a78   : > { %v3400_v49 = vmul.f32 %v5100_v48, %v5098_v35 }
0x1a7a   : > { %v3401_v51 = vpack.c.bf16 %v3400_v49, %v3400_v49 }
0x1a7c   : > { %4875 = vmatmul.mubr.msk.bf16.vlgmr.msra.gmra.mrb[80].mxu0 %vm1176_vm2, %v3401_v51 }
0x1a7d   : > { %4885 = vmatpush3.bf16.msra.mxu0 %v5059_v50  ;;  %4888 = vmatprep.mubr.msk.bf16.mxu0 %vm5204_vm0, %v5203_v1 }
0x1a7e   : > { %4886 = vmatprep.subr.bf16.mxu0 %v5203_v1 }
0x1a81   : > { %4887 = vmatpush3.bf16.msra.mxu0 %v5060_v52  ;;  %v4443_v52 = vld [vmem:[%s5970_s3] ss:$0 sm:$0xff]  ;;  %s5973_s3 = sld [smem:[#allocation19_spill]] }
0x1a82   : > { %4900 = vmatprep.subr.bf16.mxu0 %v5203_v1 }
0x1a84   : > { %4889 = vmatmul.mubr.msk.bf16.vlgmr.msra.gmra.mrb[84].mxu0 %vm1004_vm1, %v5661_v12 }
0x1a85   : > { %4904 = vmatprep.mubr.msk.bf16.mxu0 %vm5204_vm0, %v5203_v1  ;;  %4901 = vmatpush3.bf16.msra.mxu0 %v5063_v20  ;;  %v5070_v20 = vld [vmem:[%s5972_s1 + $0x18] sm:$0xff]  }
0x1a86   : > { %4902 = vmatprep.subr.bf16.mxu0 %v5203_v1 }
0x1a89   : > { %4903 = vmatpush3.bf16.msra.mxu0 %v5064_v21  ;;  %v4446_v21 = vld [vmem:[%s5975_s8] ss:$0 sm:$0xff]  ;;  %s958_s8 = sand.u32 1, %s5163_s16  }
0x1a8a   : > { %4914 = vmatprep.subr.bf16.mxu0 %v5203_v1  ;;  %s4077_s12 = scalar_lea.sflag [#allocation3], %s958_s8 }
0x1a8c   : > { %4905 = vmatmul.mubr.msk.bf16.vlgmr.msra.gmra.mrb[88].mxu0 %vm1004_vm1, %v5644_v60 }
0x1a8d   : > { %4916 = vmatprep.mubr.msk.bf16.mxu0 %vm5204_vm0, %v5203_v1 }
0x1b4f   : > { %v3443_v53 = vpop.f32.mrb[80].mxu0 }
0x1b50   : > { %v3449_v55 = vpack.c.bf16 %v3443_v53, %v3443_v53  ;;  %v4876_v56 = vpop.f32.mrb[81].mxu0 }
0x1b51   : > { %v3446_v57 = vpop.f32.mrb[82].mxu0 }
0x1b52   : > { %v4877_v58 = vpop.f32.mrb[83].mxu0  ;;  %4881 = vmatmul.mubr.msk.bf16.vlgmr.msra.gmra.mrb[80].mxu1 %vm1176_vm2, %v3449_v55 }
0x1b53   : > { %4893 = vmatpush3.bf16.msra.mxu1 %v5061_v54  ;;  %4896 = vmatprep.mubr.msk.bf16.mxu1 %vm5204_vm0, %v5203_v1 }
0x1b54   : > { %4894 = vmatprep.subr.bf16.mxu1 %v5203_v1 }
0x1b57   : > { %v3558_v12 = vpop.f32.mrb[84].mxu0  ;;  %4895 = vmatpush3.bf16.msra.mxu1 %v5062_v59 }
0x1b58   : > { %v4890_v5 = vpop.f32.mrb[85].mxu0  ;;  %4908 = vmatprep.subr.bf16.mxu1 %v5203_v1  ;;  %v3559_v19 = vadd.f32 %v4417_v17, %v3558_v12 }
0x1b59   : > { %v3561_v61 = vpop.f32.mrb[86].mxu0 }
0x1b5a   : > { %v4891_v62 = vpop.f32.mrb[87].mxu0  ;;  %4897 = vmatmul.mubr.msk.bf16.vlgmr.msra.gmra.mrb[84].mxu1 %vm1004_vm1, %v5644_v60 }
0x1b5b   : > { %4910 = vmatprep.mubr.msk.bf16.mxu1 %vm5204_vm0, %v5203_v1 }
0x1b5f   : > { %v3688_v33 = vpop.f32.mrb[88].mxu0 }
0x1b60   : > { %v4906_v34 = vpop.f32.mrb[89].mxu0  ;;  %v3689_v38 = vadd.f32 %v4435_v36, %v3688_v33 }
0x1b61   : > { %v3691_v35 = vpop.f32.mrb[90].mxu0 }
0x1b62   : > { %v4907_v37 = vpop.f32.mrb[91].mxu0  ;;  %v3756_v24 = vpack.c.bf16 %v3689_v38, %v3689_v38 }
0x1b64   : > { %v3761_v39 = vsel %vm1242_vm4, %v3756_v24, 0 }
0x1b65   : > { %4915 = vmatpush3.bf16.msra.mxu0 %v3761_v39 }
0x1b66   : > { %4926 = vmatprep.subr.bf16.mxu0 %v5203_v1 }
0x1c25   : > { %v3492_v63 = vpop.f32.mrb[80].mxu1 }
0x1c26   : > { %v5820_v0 = vadd.f32 %v3492_v63, %v5773_v11  ;;  %v4882_v3 = vpop.f32.mrb[81].mxu1  ;;  %v3694_v11 = vpack.c.bf16 %v3559_v19, %v3559_v19 }
0x1c27   : > { %v3495_v4 = vpop.f32.mrb[82].mxu1  ;;  %v5066_v3 = vld [vmem:[%s5971_s23 + $0x8] sm:$0xff]  }
0x1c28   : > { %v4883_v7 = vpop.f32.mrb[83].mxu1  ;;  %v5068_v4 = vld [vmem:[%s5972_s1 + $0x8] sm:$0xff]  }
0x1c2d   : > { %v3623_v9 = vpop.f32.mrb[84].mxu1 }
0x1c2e   : > { %v3624_v10 = vadd.f32 %v4426_v8, %v3623_v9  ;;  %v4898_v13 = vpop.f32.mrb[85].mxu1 }
0x1c2f   : > { %v3626_v14 = vpop.f32.mrb[86].mxu1 }
0x1c30   : > { %v3695_v15 = vpack.c.bf16 %v3624_v10, %v3624_v10  ;;  %v4899_v16 = vpop.f32.mrb[87].mxu1  ;;  %v4444_v14 = vld [vmem:[%s5973_s3] ss:$0 sm:$0xff]  ;;  %s4459_s3 = sshll.u32 %s5387_s0, 7  ;;  %s5205_s0 = smov [#allocation2]  }
0x1c31   : > { %v4445_v16 = vld [vmem:[%s5974_s5] ss:$0 sm:$0xff]  ;;  %s4219_s5 = sshll.u32 %s958_s8, 3  ;;  %s5880_s11 = scalar_lea.hbm %s5364_s17, %s4459_s3 }
0x1c32   : > { %v3700_v18 = vsel %vm1176_vm2, %v3695_v15, 0 }
0x1c33   : > { %4909 = vmatpush3.bf16.xpose.msra.mxu1 %v3700_v18 }
0x1c34   : > { %4920 = vmatprep.subr.bf16.mxu1 %v5203_v1 }
0x1c3a   : > { %4911 = vmatmul.mubr.msk.bf16.vlgmr.msra.gmra.mrb[88].mxu1 %vm1176_vm2, %v3694_v11  ;;  %v5069_v11 = vld [vmem:[%s5972_s1 + $0x10] sm:$0xff]  }
0x1c3b   : > { %4922 = vmatprep.mubr.msk.bf16.mxu1 %vm5204_vm0, %v5203_v1  ;;  %4921 = vmatpush3.bf16.msra.mxu1 %v3810_v41 }
0x1c3c   : > { %4934 = vmatprep.subr.bf16.mxu1 %v5203_v1 }
0x1d0d   : > { %v3736_v22 = vpop.f32.mrb[88].mxu1 }
0x1d0e   : > { %v3742_v23 = vmul.f32 0.35355338, %v3736_v22  ;;  %v4912_v6 = vpop.f32.mrb[89].mxu1 }
0x1d0f   : > { %v3739_v25 = vpop.f32.mrb[90].mxu1 }
0x1d10   : > { %v4913_v26 = vpop.f32.mrb[91].mxu1  ;;  %v3743_v27 = vsel %vm2683_vm5, %v3742_v23, -10000.0 }
0x1d11   : > { %v3744_v28 = vsel %vm1176_vm2, %v3743_v27, -inf }
0x1d12   : > { %3745 = vmax.xlane.f32.xlu0 %v3744_v28 }
0x1d9f   : > { %v3746_v29 = vpop.xlane.xlu0 %3745 }
0x1da0   : > { %v3747_v30 = vsub.f32 %v3743_v27, %v3746_v29  ;;  %v4450_v29 = vld [vmem:[%s5349_s20] ss:$0 sm:$0xff] }
0x1da2   : > { %v3748_v31 = vmul.f32 1.442695, %v3747_v30 }
0x1da4   : > { %5101 = vpow2.f32 %v3748_v31 }
0x1dae   : > { %v5102_v60 = vpop.eup %5101 }
0x1daf   : > { %v3750_v32 = vsel %vm1176_vm2, %v5102_v60, 0.0 }
0x1db0   : > { %3751 = vadd.xlane.f32.xlu1 %v3750_v32 }
0x1e3d   : > { %v3752_v42 = vpop.xlane.xlu1 %3751 }
0x1e3e   : > { %5103 = vrcp.f32 %v3752_v42 }
0x1e48   : > { %v5104_v43 = vpop.eup %5103 }
0x1e49   : > { %v3754_v44 = vmul.f32 %v5104_v43, %v5102_v60 }
0x1e4b   : > { %v3755_v45 = vpack.c.bf16 %v3754_v44, %v3754_v44  ;;  %v4456_v44 = vld [vmem:[%s5354_s6] ss:$0 sm:$0xff] }
0x1e4d   : > { %4917 = vmatmul.mubr.msk.bf16.vlgmr.msra.gmra.mrb[92].mxu0 %vm1176_vm2, %v3755_v45 }
0x1e4e   : > { %4930 = vmatprep.mubr.msk.bf16.mxu0 %vm5204_vm0, %v5203_v1 }
0x1f20   : > { %v3797_v46 = vpop.f32.mrb[92].mxu0 }
0x1f21   : > { %v3803_v47 = vpack.c.bf16 %v3797_v46, %v3797_v46  ;;  %v4918_v48 = vpop.f32.mrb[93].mxu0  ;;  %v4457_v46 = vld [vmem:[%s5976_s4] ss:$0 sm:$0xff] }
0x1f22   : > { %v3800_v49 = vpop.f32.mrb[94].mxu0 }
0x1f23   : > { %v4919_v50 = vpop.f32.mrb[95].mxu0  ;;  %4923 = vmatmul.mubr.msk.bf16.vlgmr.msra.gmra.mrb[92].mxu1 %vm1176_vm2, %v3803_v47 }
0x1f24   : > { %4942 = vmatprep.mubr.msk.bf16.mxu1 %vm5204_vm0, %v5203_v1 }
0x1ff6   : > { %v3846_v51 = vpop.f32.mrb[92].mxu1 }
0x1ff7   : > { %v3852_v53 = vadd.f32 %v3846_v51, %v5820_v0  ;;  %v4924_v54 = vpop.f32.mrb[93].mxu1  ;;  %v5065_v0 = vld [vmem:[%s5971_s23] sm:$0xff]  }
0x1ff8   : > { %v3849_v55 = vpop.f32.mrb[94].mxu1  ;;  %4927 = vmatpush3.bf16.msra.mxu0 %v5065_v0 }
0x1ff9   : > { %v3860_v56 = vadd.f32 %v4443_v52, %v3852_v53  ;;  %v4925_v57 = vpop.f32.mrb[95].mxu1  ;;  %4928 = vmatprep.subr.bf16.mxu0 %v5203_v1 }
0x1ffb   : > { %v3863_v58 = vadd.f32 %v3860_v56, %v5657_v2  ;;  %v5067_v2 = vld [vmem:[%s5972_s1] sm:$0xff]   ;;  %s960_s1 = scalar_lea.vmem [#allocation2], %s4219_s5  ;;  %s5113_s5 = sshll.u32 %s5205_s0, 4  ;;  %s5114_s5 = int_to_ptr.vmem [resolvable:$false] %s5113_s5 }
0x1ffc   : > { %4929 = vmatpush3.bf16.msra.mxu0 %v5066_v3  ;;  %4935 = vmatpush3.bf16.msra.mxu1 %v5067_v2  ;;  %s4090_s9 = sshll.u32 %s960_s1, 4  ;;  %s5115_s4 = scalar_lea.vmem %s5114_s5, 256  ;;  %s5882_s9 = int_to_ptr.vmem [resolvable:$true] %s4090_s9 }
0x1ffd   : > { %v3864_v59 = vsel %vm1004_vm1, %v3863_v58, 0.0  ;;  %4936 = vmatprep.subr.bf16.mxu1 %v5203_v1  ;;  %s5109_s13 = scalar_lea.vmem %s5882_s9, 128  ;;  %p5116_p0 = scmp.lt.s32.totalorder %s5882_s9, %s5114_s5 }
0x1ffe   : > { %3865 = vadd.xlane.f32.xlu0 %v3864_v59  ;;  %p5110_p11 = scmp.ne.s32.totalorder %s5882_s9, %s5109_s13  ;;  %p5117_p1 = scmp.lt.s32.totalorder %s5115_s4, %s5109_s13 }
0x2000   : > { %4937 = vmatpush3.bf16.msra.mxu1 %v5068_v4  ;;  %p5111_p12 = pnand %p5110_p11, %p5404_p5  ;;  %p5118_p2 = por %p5117_p1, %p5116_p0 }
0x2001   : > { %4938 = vmatprep.subr.bf16.mxu1 %v5203_v1 }
0x2002   : > { %p5112_p13 = pneg %p5111_p12 }
0x2004   : > { %4939 = vmatpush3.bf16.msra.mxu1 %v5069_v11  ;;  %p5119_p3 = pnand %p5118_p2, %p5112_p13 }
0x2005   : > { %4940 = vmatprep.subr.bf16.mxu1 %v5203_v1 }
0x2008   : > { %4941 = vmatpush3.bf16.msra.mxu1 %v5070_v20 }
0x208b   : > { %v3866_v12 = vpop.xlane.xlu0 %3865 }
0x208c   : > { %v3867_v5 = vmul.f32 0.03125, %v3866_v12 }
0x208e   : > { %v3868_v61 = vsub.f32 %v3863_v58, %v3867_v5 }
0x2090   : > { %v3869_v62 = vmul.f32 %v3868_v61, %v3868_v61 }
0x2092   : > { %v3870_v63 = vsel %vm1004_vm1, %v3869_v62, 0.0 }
0x2093   : > { %3871 = vadd.xlane.f32.xlu1 %v3870_v63 }
0x2120   : > { %v3872_v7 = vpop.xlane.xlu1 %3871 }
0x2121   : > { %v3873_v8 = vmul.f32 0.03125, %v3872_v7 }
0x2123   : > { %v3874_v9 = vmax.f32 %v3873_v8, 1e-10 }
0x2125   : > { %v3875_v10 = vadd.f32 1e-10, %v3874_v9 }
0x2127   : > { %5105 = vrsqrt.f32 %v3875_v10 }
0x2131   : > { %v5106_v13 = vpop.eup %5105 }
0x2132   : > { %v3877_v15 = vmul.f32 %v5106_v13, %v3868_v61 }
0x2134   : > { %v3884_v17 = vmul.f32 %v4444_v14, %v3877_v15 }
0x2136   : > { %v3891_v18 = vadd.f32 %v4445_v16, %v3884_v17 }
0x2138   : > { %v3892_v19 = vpack.c.bf16 %v3891_v18, %v3891_v18 }
0x213a   : > { %4931 = vmatmul.mubr.msk.bf16.vlgmr.msra.gmra.mrb[96].mxu0 %vm1004_vm1, %v3892_v19 }
0x220d   : > { %v3953_v22 = vpop.f32.mrb[96].mxu0 }
0x220e   : > { %v3954_v23 = vadd.f32 %v4446_v21, %v3953_v22  ;;  %v4932_v6 = vpop.f32.mrb[97].mxu0 }
0x220f   : > { %v3956_v25 = vpop.f32.mrb[98].mxu0 }
0x2210   : > { %v3959_v26 = vmax.f32 %v3954_v23, 0.0  ;;  %v4933_v27 = vpop.f32.mrb[99].mxu0 }
0x2212   : > { %v3960_v28 = vpack.c.bf16 %v3959_v26, %v3959_v26 }
0x2214   : > { %4943 = vmatmul.mubr.msk.bf16.vlgmr.msra.gmra.mrb[96].mxu1 %vm4000_vm6, %v3960_v28 }
0x22e7   : > { %v4038_v30 = vpop.f32.mrb[96].mxu1 }
0x22e8   : > { %v4039_v31 = vadd.f32 %v4450_v29, %v4038_v30  ;;  %v4944_v60 = vpop.f32.mrb[97].mxu1 }
0x22e9   : > { %v4041_v32 = vpop.f32.mrb[98].mxu1 }
0x22ea   : > { %v4945_v33 = vpop.f32.mrb[99].mxu1  ;;  %v4046_v1 = vadd.f32 %v4039_v31, %v3891_v18 }
0x22ec   : > { %v4047_v34 = vsel %vm1004_vm1, %v4046_v1, 0.0 }
0x22ed   : > { %4048 = vadd.xlane.f32.xlu0 %v4047_v34 }
0x237a   : > { %v4049_v35 = vpop.xlane.xlu0 %4048 }
0x237b   : > { %v4050_v36 = vmul.f32 0.03125, %v4049_v35 }
0x237d   : > { %v4051_v37 = vsub.f32 %v4046_v1, %v4050_v36 }
0x237f   : > { %v4052_v38 = vmul.f32 %v4051_v37, %v4051_v37 }
0x2381   : > { %v4053_v24 = vsel %vm1004_vm1, %v4052_v38, 0.0 }
0x2382   : > { %4054 = vadd.xlane.f32.xlu1 %v4053_v24 }
0x240f   : > { %v4055_v39 = vpop.xlane.xlu1 %4054 }
0x2410   : > { %v4056_v40 = vmul.f32 0.03125, %v4055_v39 }
0x2412   : > { %v4057_v41 = vmax.f32 %v4056_v40, 1e-10 }
0x2414   : > { %v4058_v42 = vadd.f32 1e-10, %v4057_v41 }
0x2416   : > { %5107 = vrsqrt.f32 %v4058_v42 }
0x2420   : > { %v5108_v43 = vpop.eup %5107 }
0x2421   : > { %v4060_v45 = vmul.f32 %v5108_v43, %v4051_v37 }
0x2423   : > { %v4067_v47 = vmul.f32 %v4456_v44, %v4060_v45 }
0x2425   : > { %v4074_v48 = vadd.f32 %v4457_v46, %v4067_v47 }
0x2427   : > { %4075 = vst.msk [vmem:[%s960_s1] sm:$0xff] %vm1004_vm1, %v4074_v48 }
0x2428   : > { %5122 = shalt.err (!%p5119_p3)
}
0x2429   : > { %s5123_s1 = scalar_lea.hbm %s5880_s11, 128  ;;  %s5127_s8 = scalar_lea.hbm %s5364_s17, 256 }
0x242a   : > { %p5124_p4 = scmp.ne.s32.totalorder %s5880_s11, %s5123_s1  ;;  %p5128_p9 = scmp.lt.u32.totalorder %s5880_s11, %s5364_s17 }
0x242b   : > { %p5129_p10 = scmp.lt.u32.totalorder %s5127_s8, %s5123_s1  ;;  %p5131_p12 = scmp.lt.u32.totalorder %s5123_s1, %s5880_s11 }
0x242c   : > { %p5125_p7 = pnand %p5124_p4, %p5404_p5 }
0x242d   : > { %p5130_p11 = por %p5129_p10, %p5128_p9 }
0x242e   : > { %p5126_p8 = pneg %p5125_p7 }
0x242f   : > { %p5132_p0 = por %p5131_p12, %p5130_p11 }
0x2431   : > { %p5133_p13 = pnand %p5132_p0, %p5126_p8 }
0x2433   : > { %5136 = shalt.err (!%p5133_p13)
}
0x2434   : > { %4946 = dma.vmem_to_hbm [thread:$0]  (%p5404_p5), %s5882_s9, 128, %s5880_s11, %s4077_s12  }
0x2435 PF: > { %p4952_p1 = scmp.ge.s32.totalorder %s5171_s22, 2  ;;  %s4102_s13 = sand.u32 1, %s5159_s15  }
0x2436   : > { %s4103_s4 = scalar_lea.sflag [#allocation3], %s4102_s13 }
0x2437   : > { %p4949_p2 = pnand %p4952_p1, %p5408_p6 }
0x2439   : > { %5154 = dma.done.wait (!%p4949_p2), %s4103_s4, 128  }
0x243a   : > { %5156 = vsyncadd (!%p4949_p2), %s4103_s4, 4294967168  ;;  %p71_p3 = scmp.ge.s32.totalorder %s5391_s26, 4   ;;  %s5977_s15 = smov %s5163_s16 }
0x243b   : > { %s5978_s16 = smov %s5167_s18  ;;  %s5979_s18 = smov %s5402_s2 }
0x243c   : > { %s5980_s22 = smov %s5391_s26  ;;  %73 = sbr.rel (!%p71_p3) target bundleno = 61 (0x3d), region = 256 }
0x2443   :  { %4108 = vsyncpa [#allocation3], 1 }
0x2444   :  { %4110 = vsyncpa [#allocation3 + $0x1], 1 }

</bundles_post_ra>
